<compile_context>
chip_gen: v5e
topology: v5e:2x2
jax: 0.10.0
libtpu: 0.0.40
codegen_flags: <defaults>
</compile_context>

<pallas_src>
import numpy as np
import jax
import jax.numpy as jnp
from jax.experimental import pallas as pl
from jax.experimental.pallas import tpu as pltpu

_EPS = 1e-5
_LANES = 128


def _round_up(x, m):
    return (x + m - 1) // m * m


# --------------------------------------------------------------------------
# call 1: conv1 (3x3) [+ projection 1x1 conv] + partial BN statistics
# --------------------------------------------------------------------------
def _make_conv1_kernel(H, W, Cin, Pp, Wg, has_proj):
    He = H + 2                      # extended ("once-padded") output frame
    Mp = He * Wg

    def kernel(xw_ref, w1_ref, *rest):
        if has_proj:
            ws_ref, mask_ref, y1_ref, st1_ref, ysc_ref, stsc_ref = rest
        else:
            mask_ref, y1_ref, st1_ref = rest

        xv = xw_ref[0]                                   # (H+4, Wg, 3*Cin) bf16
        acc = jnp.zeros((Mp, Pp), jnp.float32)
        sc_acc = None
        for di in range(3):
            # major-axis slice + layout-trivial collapse -> (Mp, 3*Cin) slab
            slab = xv[di:di + He].reshape(Mp, 3 * Cin)
            acc += jnp.dot(slab, w1_ref[di], preferred_element_type=jnp.float32)
            if has_proj and di == 1:
                # 1x1 projection conv folded into the middle slab (K = 3*Cin,
                # only the centre Cin rows of ws_ref are non-zero).
                sc_acc = jnp.dot(slab, ws_ref[...],
                                 preferred_element_type=jnp.float32)

        y1_ref[0] = acc
        m = mask_ref[...]                                # (Mp, 1) interior mask
        st1_ref[0] = jnp.concatenate(
            [jnp.sum(acc * m, axis=0, keepdims=True),
             jnp.sum(acc * acc * m, axis=0, keepdims=True)], axis=0)
        if has_proj:
            ysc_ref[0] = sc_acc
            stsc_ref[0] = jnp.concatenate(
                [jnp.sum(sc_acc * m, axis=0, keepdims=True),
                 jnp.sum(sc_acc * sc_acc * m, axis=0, keepdims=True)], axis=0)

    return kernel


# --------------------------------------------------------------------------
# call 2: bn1 (folded scale/shift) + ReLU + conv2 (3x3) + partial BN2 stats
# --------------------------------------------------------------------------
def _make_conv2_kernel(H, W, Pp):
    HW = H * W

    def kernel(y1_ref, sc1_ref, sh1_ref, mask_ref, w2_ref, y2_ref, st2_ref):
        y1v = y1_ref[0]                                          # (He, Wg, Pp) f32
        a1 = jnp.maximum(y1v * sc1_ref[...] + sh1_ref[...], 0.0)
        a1 = (a1 * mask_ref[...]).astype(jnp.bfloat16)           # zero the halo ring
        # dj-widen along the lane axis (128-aligned concat -> no shuffles)
        a1w = jnp.concatenate(
            [a1[:, 0:W, :], a1[:, 1:W + 1, :], a1[:, 2:W + 2, :]], axis=-1)
        acc = jnp.zeros((HW, Pp), jnp.float32)
        for di in range(3):
            slab = a1w[di:di + H].reshape(HW, 3 * Pp)            # K = 3*Pp matmul
            acc += jnp.dot(slab, w2_ref[di], preferred_element_type=jnp.float32)
        y2_ref[0] = acc
        st2_ref[0] = jnp.concatenate(
            [jnp.sum(acc, axis=0, keepdims=True),
             jnp.sum(acc * acc, axis=0, keepdims=True)], axis=0)

    return kernel


# --------------------------------------------------------------------------
# call 3: bn2 + shortcut (+ bn_sc) + add + ReLU
# --------------------------------------------------------------------------
def _make_finalize_kernel(H, W, Pp, has_proj):
    HW = H * W

    def kernel(*refs):
        if has_proj:
            y2_ref, sc_ref, s2_ref, h2_ref, ss_ref, hs_ref, out_ref = refs
            scv = sc_ref[0][1:H + 1, 1:W + 1, :].reshape(HW, Pp)
            short = scv * ss_ref[...] + hs_ref[...]
        else:
            y2_ref, sc_ref, s2_ref, h2_ref, out_ref = refs
            short = sc_ref[0]
        out = y2_ref[0] * s2_ref[...] + h2_ref[...] + short
        out_ref[0] = jnp.maximum(out, 0.0)

    return kernel


# --------------------------------------------------------------------------
# wrapper
# --------------------------------------------------------------------------
def basic_block_forward(x_nchw, p, stride=1):
    """Fused BasicBlock forward. Input/output are NCHW (PyTorch convention)."""
    assert stride == 1, "only stride=1 implemented"
    # TODO(synk): stride>1 needs pre-strided conv1 / shortcut slabs in the glue.
    N, Cin, H, W = x_nchw.shape
    P = p["w1"].shape[0]
    has_proj = (stride != 1) or (Cin != P)

    Pp = _round_up(P, _LANES)          # lane-dense output channels
    He = H + 2
    We = W + 2
    Wg = _round_up(We, 8)              # sublane-aligned extended width
    extra = Wg - We
    Mp = He * Wg
    HW = H * W
    count = float(N * H * W)
    f32, bf16 = jnp.float32, jnp.bfloat16

    # ---------------- layout glue (NCHW -> NHWC, pad, dj-widen, repack) ----------
    x = jnp.transpose(x_nchw, (0, 2, 3, 1)).astype(f32)                  # (N,H,W,Cin)
    x2p = jnp.pad(x, ((0, 0), (2, 2), (2, 2 + extra), (0, 0)))           # (N,H+4,Wg+2,Cin)
    x_wide = jnp.concatenate(
        [x2p[:, :, 0:Wg, :], x2p[:, :, 1:Wg + 1, :], x2p[:, :, 2:Wg + 2, :]],
        axis=-1).astype(bf16)                                            # (N,H+4,Wg,3Cin)

    # weights: OIHW -> (kh, kw, in, out) -> per-kh (3*in, out), channel-padded, bf16
    w1 = jnp.transpose(p["w1"], (2, 3, 1, 0)).reshape(3, 3 * Cin, P)
    w1 = jnp.pad(w1, ((0, 0), (0, 0), (0, Pp - P))).astype(bf16)         # (3,3Cin,Pp)
    w2 = jnp.transpose(p["w2"], (2, 3, 1, 0))                            # (3,3,P,P)
    w2 = jnp.pad(w2, ((0, 0), (0, 0), (0, Pp - P), (0, Pp - P)))
    w2 = w2.reshape(3, 3 * Pp, Pp).astype(bf16)                          # (3,3Pp,Pp)

    g1 = jnp.pad(p["g1"], (0, Pp - P)); b1 = jnp.pad(p["b1"], (0, Pp - P))
    g2 = jnp.pad(p["g2"], (0, Pp - P)); b2 = jnp.pad(p["b2"], (0, Pp - P))

    # interior mask over the extended (once-padded) frame
    ri = jax.lax.broadcasted_iota(jnp.int32, (He, Wg, 1), 0)
    ci = jax.lax.broadcasted_iota(jnp.int32, (He, Wg, 1), 1)
    interior = ((ri >= 1) & (ri <= H) & (ci >= 1) & (ci <= W)).astype(f32)
    mask_flat = interior.reshape(Mp, 1)

    cparams = pltpu.CompilerParams(dimension_semantics=("parallel",),
                                   vmem_limit_bytes=32 * 1024 * 1024)

    # ---------------- call 1: conv1 (+ projection conv) + partial stats ----------
    c1_in = [x_wide, w1]
    c1_specs = [pl.BlockSpec((1, H + 4, Wg, 3 * Cin), lambda n: (n, 0, 0, 0)),
                pl.BlockSpec((3, 3 * Cin, Pp), lambda n: (0, 0, 0))]
    if has_proj:
        ws = jnp.transpose(p["ws"][:, :, 0, 0], (1, 0))                  # (Cin,P)
        ws = jnp.pad(ws, ((0, 0), (0, Pp - P)))
        ws_ext = jnp.zeros((3 * Cin, Pp), f32).at[Cin:2 * Cin].set(ws).astype(bf16)
        gs = jnp.pad(p["gs"], (0, Pp - P)); bs = jnp.pad(p["bs"], (0, Pp - P))
        c1_in.append(ws_ext)
        c1_specs.append(pl.BlockSpec((3 * Cin, Pp), lambda n: (0, 0)))
    c1_in.append(mask_flat)
    c1_specs.append(pl.BlockSpec((Mp, 1), lambda n: (0, 0)))

    c1_out_shape = [jax.ShapeDtypeStruct((N, Mp, Pp), f32),
                    jax.ShapeDtypeStruct((N, 2, Pp), f32)]
    c1_out_specs = [pl.BlockSpec((1, Mp, Pp), lambda n: (n, 0, 0)),
                    pl.BlockSpec((1, 2, Pp), lambda n: (n, 0, 0))]
    if has_proj:
        c1_out_shape += [jax.ShapeDtypeStruct((N, Mp, Pp), f32),
                         jax.ShapeDtypeStruct((N, 2, Pp), f32)]
        c1_out_specs += [pl.BlockSpec((1, Mp, Pp), lambda n: (n, 0, 0)),
                         pl.BlockSpec((1, 2, Pp), lambda n: (n, 0, 0))]

    flops1 = 2 * N * Mp * 3 * Cin * Pp * (3 + (1 if has_proj else 0))
    bytes1 = (x_wide.size * 2 + w1.size * 2
              + sum(int(np.prod(s.shape)) * 4 for s in c1_out_shape))
    res1 = pl.pallas_call(
        _make_conv1_kernel(H, W, Cin, Pp, Wg, has_proj),
        grid=(N,),
        in_specs=c1_specs,
        out_specs=tuple(c1_out_specs),
        out_shape=tuple(c1_out_shape),
        compiler_params=cparams,
        cost_estimate=pl.CostEstimate(flops=flops1, transcendentals=0,
                                      bytes_accessed=bytes1),
    )(*c1_in)
    if has_proj:
        y1, st1, ysc, stsc = res1
    else:
        y1, st1 = res1

    # ---------------- glue: fold batch stats into per-channel scale/shift --------
    def _bn_scale_shift(stats, gamma, beta):
        s = jnp.sum(stats, axis=0)                        # (2, Pp)
        mean = s[0] / count
        var = jnp.maximum(s[1] / count - mean * mean, 0.0)
        inv = jax.lax.rsqrt(var + _EPS)
        scale = gamma * inv
        shift = beta - mean * scale
        return scale[None, :].astype(f32), shift[None, :].astype(f32)

    scale1, shift1 = _bn_scale_shift(st1, g1, b1)

    # ---------------- call 2: bn1 + relu + conv2 + partial stats ------------------
    y1_4d = y1.reshape(N, He, Wg, Pp)
    flops2 = 2 * N * HW * 3 * Pp * Pp * 3
    bytes2 = y1.size * 4 + N * HW * Pp * 4 + w2.size * 2
    y2, st2 = pl.pallas_call(
        _make_conv2_kernel(H, W, Pp),
        grid=(N,),
        in_specs=[pl.BlockSpec((1, He, Wg, Pp), lambda n: (n, 0, 0, 0)),
                  pl.BlockSpec((1, Pp), lambda n: (0, 0)),
                  pl.BlockSpec((1, Pp), lambda n: (0, 0)),
                  pl.BlockSpec((He, Wg, 1), lambda n: (0, 0, 0)),
                  pl.BlockSpec((3, 3 * Pp, Pp), lambda n: (0, 0, 0))],
        out_specs=(pl.BlockSpec((1, HW, Pp), lambda n: (n, 0, 0)),
                   pl.BlockSpec((1, 2, Pp), lambda n: (n, 0, 0))),
        out_shape=(jax.ShapeDtypeStruct((N, HW, Pp), f32),
                   jax.ShapeDtypeStruct((N, 2, Pp), f32)),
        compiler_params=cparams,
        cost_estimate=pl.CostEstimate(flops=flops2, transcendentals=0,
                                      bytes_accessed=bytes2),
    )(y1_4d, scale1, shift1, interior, w2)

    scale2, shift2 = _bn_scale_shift(st2, g2, b2)

    # ---------------- call 3: bn2 + shortcut + add + relu -------------------------
    if has_proj:
        scale_s, shift_s = _bn_scale_shift(stsc, gs, bs)
        sc_in = ysc.reshape(N, He, Wg, Pp)
        c3_in = [y2, sc_in, scale2, shift2, scale_s, shift_s]
        c3_specs = [pl.BlockSpec((1, HW, Pp), lambda n: (n, 0, 0)),
                    pl.BlockSpec((1, He, Wg, Pp), lambda n: (n, 0, 0, 0)),
                    pl.BlockSpec((1, Pp), lambda n: (0, 0)),
                    pl.BlockSpec((1, Pp), lambda n: (0, 0)),
                    pl.BlockSpec((1, Pp), lambda n: (0, 0)),
                    pl.BlockSpec((1, Pp), lambda n: (0, 0))]
        sc_bytes = N * Mp * Pp * 4
    else:
        # identity shortcut: channel-padded input, already in the output frame
        sc_in = jnp.pad(x, ((0, 0), (0, 0), (0, 0), (0, Pp - Cin))).reshape(N, HW, Pp)
        c3_in = [y2, sc_in, scale2, shift2]
        c3_specs = [pl.BlockSpec((1, HW, Pp), lambda n: (n, 0, 0)),
                    pl.BlockSpec((1, HW, Pp), lambda n: (n, 0, 0)),
                    pl.BlockSpec((1, Pp), lambda n: (0, 0)),
                    pl.BlockSpec((1, Pp), lambda n: (0, 0))]
        sc_bytes = N * HW * Pp * 4

    out_flat = pl.pallas_call(
        _make_finalize_kernel(H, W, Pp, has_proj),
        grid=(N,),
        in_specs=c3_specs,
        out_specs=pl.BlockSpec((1, HW, Pp), lambda n: (n, 0, 0)),
        out_shape=jax.ShapeDtypeStruct((N, HW, Pp), f32),
        compiler_params=cparams,
        cost_estimate=pl.CostEstimate(flops=6 * N * HW * Pp, transcendentals=0,
                                      bytes_accessed=2 * N * HW * Pp * 4 + sc_bytes),
    )(*c3_in)

    out = out_flat[:, :, :P].reshape(N, H, W, P)
    return jnp.transpose(out, (0, 3, 1, 2))                              # back to NCHW


# ---------------- deterministic parameter init (shapes from __init__) ----------------
def init_params(key, in_planes, planes):
    ks = jax.random.split(key, 9)
    return {
        "w1": 0.2 * jax.random.normal(ks[0], (planes, in_planes, 3, 3), jnp.float32),
        "g1": 1.0 + 0.1 * jax.random.normal(ks[1], (planes,), jnp.float32),
        "b1": 0.1 * jax.random.normal(ks[2], (planes,), jnp.float32),
        "w2": 0.2 * jax.random.normal(ks[3], (planes, planes, 3, 3), jnp.float32),
        "g2": 1.0 + 0.1 * jax.random.normal(ks[4], (planes,), jnp.float32),
        "b2": 0.1 * jax.random.normal(ks[5], (planes,), jnp.float32),
        "ws": 0.2 * jax.random.normal(ks[6], (planes, in_planes, 1, 1), jnp.float32),
        "gs": 1.0 + 0.1 * jax.random.normal(ks[7], (planes,), jnp.float32),
        "bs": 0.1 * jax.random.normal(ks[8], (planes,), jnp.float32),
    }


# ---------------- pure-JAX reference for correctness checking ----------------
def _bn_train_ref(x, g, b):
    mean = jnp.mean(x, axis=(0, 1, 2), keepdims=True)
    var = jnp.mean((x - mean) ** 2, axis=(0, 1, 2), keepdims=True)
    return (x - mean) * jax.lax.rsqrt(var + _EPS) * g + b


def basic_block_reference(x_nchw, p, stride=1):
    x = jnp.transpose(x_nchw, (0, 2, 3, 1)).astype(jnp.float32)

    def conv(inp, w_oihw, s, pad):
        w = jnp.transpose(w_oihw, (2, 3, 1, 0))  # HWIO
        return jax.lax.conv_general_dilated(
            inp, w, (s, s), [(pad, pad), (pad, pad)],
            dimension_numbers=("NHWC", "HWIO", "NHWC"))

    out = jax.nn.relu(_bn_train_ref(conv(x, p["w1"], stride, 1), p["g1"], p["b1"]))
    out = _bn_train_ref(conv(out, p["w2"], 1, 1), p["g2"], p["b2"])
    if stride != 1 or p["w1"].shape[1] != p["w1"].shape[0]:
        sc = _bn_train_ref(conv(x, p["ws"], stride, 0), p["gs"], p["bs"])
    else:
        sc = x
    out = jax.nn.relu(out + sc)
    return jnp.transpose(out, (0, 3, 1, 2))


if __name__ == "__main__":
    key = jax.random.PRNGKey(0)
    k_x, k_p = jax.random.split(key)

    N, Cin, H, W = 2, 4, 16, 16
    planes = 8                                   # Cin != planes -> projection shortcut

    x = jax.random.normal(k_x, (N, Cin, H, W), jnp.float32)
    params = init_params(k_p, Cin, planes)

    fwd = jax.jit(basic_block_forward)
    out = jax.block_until_ready(fwd(x, params))
    assert out.shape == (N, planes, H, W)

    ref = basic_block_reference(x, params, stride=1)
    err = float(jnp.max(jnp.abs(out - ref)))
    # bf16 matmul operands (f32 accumulation / f32 BN) -> loosened tolerance.
    if not np.allclose(np.asarray(out), np.asarray(ref), atol=5e-2, rtol=5e-2):
        raise SystemExit("KERNEL_MISMATCH: max abs err = %g" % err)
    print("KERNEL_OK")
</pallas_src>

<mosaic_0001>
module attributes {stable_mosaic.version = 11 : i64} {
  func.func @kernel(%arg0: i32, %arg1: memref<1x20x24x12xbf16, #tpu.memory_space<vmem>>, %arg2: memref<3x12x128xbf16, #tpu.memory_space<vmem>>, %arg3: memref<12x128xbf16, #tpu.memory_space<vmem>>, %arg4: memref<432x1xf32, #tpu.memory_space<vmem>>, %arg5: memref<1x432x128xf32, #tpu.memory_space<vmem>>, %arg6: memref<1x2x128xf32, #tpu.memory_space<vmem>>, %arg7: memref<1x432x128xf32, #tpu.memory_space<vmem>>, %arg8: memref<1x2x128xf32, #tpu.memory_space<vmem>>) attributes {dimension_semantics = [#tpu.dimension_semantics<parallel>], iteration_bounds = array<i64: 2>, scalar_prefetch = 0 : i64, scratch_operands = 0 : i64, tpu.core_type = #tpu.core_type<tc>, window_params = [{transform_indices = @transform_0, window_bounds = array<i64: 1, 20, 24, 12>}, {pipeline_mode = #tpu.pipeline_mode<synchronous>, transform_indices = @transform_1, window_bounds = array<i64: 3, 12, 128>}, {pipeline_mode = #tpu.pipeline_mode<synchronous>, transform_indices = @transform_2, window_bounds = array<i64: 12, 128>}, {pipeline_mode = #tpu.pipeline_mode<synchronous>, transform_indices = @transform_3, window_bounds = array<i64: 432, 1>}, {transform_indices = @transform_4, window_bounds = array<i64: 1, 432, 128>}, {transform_indices = @transform_5, window_bounds = array<i64: 1, 2, 128>}, {transform_indices = @transform_6, window_bounds = array<i64: 1, 432, 128>}, {transform_indices = @transform_7, window_bounds = array<i64: 1, 2, 128>}]} {
    %c0 = arith.constant 0 : index
    %c0_0 = arith.constant 0 : index
    %c0_1 = arith.constant 0 : index
    %c0_2 = arith.constant 0 : index
    %0 = vector.load %arg1[%c0, %c0_0, %c0_1, %c0_2] : memref<1x20x24x12xbf16, #tpu.memory_space<vmem>>, vector<1x20x24x12xbf16>
    %1 = vector.shape_cast %0 : vector<1x20x24x12xbf16> to vector<20x24x12xbf16>
    %cst = arith.constant 0.000000e+00 : f32
    %2 = vector.broadcast %cst : f32 to vector<432x128xf32>
    %3 = vector.extract_strided_slice %1 {offsets = [0, 0, 0], sizes = [18, 24, 12], strides = [1, 1, 1]} : vector<20x24x12xbf16> to vector<18x24x12xbf16>
    %4 = vector.shape_cast %3 : vector<18x24x12xbf16> to vector<432x12xbf16>
    %c0_3 = arith.constant 0 : index
    %c0_4 = arith.constant 0 : index
    %c0_5 = arith.constant 0 : index
    %5 = vector.load %arg2[%c0_3, %c0_4, %c0_5] : memref<3x12x128xbf16, #tpu.memory_space<vmem>>, vector<1x12x128xbf16>
    %6 = vector.shape_cast %5 : vector<1x12x128xbf16> to vector<12x128xbf16>
    %cst_6 = arith.constant dense<0.000000e+00> : vector<432x128xf32>
    %7 = tpu.matmul %4, %6, %cst_6 {dimension_numbers = #tpu.dot_dimension_numbers<[1], [0], [0], [1], [0, 0, 1, 1], [], []>} : vector<432x12xbf16>, vector<12x128xbf16>, vector<432x128xf32> -> vector<432x128xf32>
    %8 = arith.addf %2, %7 : vector<432x128xf32>
    %9 = vector.extract_strided_slice %1 {offsets = [1, 0, 0], sizes = [18, 24, 12], strides = [1, 1, 1]} : vector<20x24x12xbf16> to vector<18x24x12xbf16>
    %10 = vector.shape_cast %9 : vector<18x24x12xbf16> to vector<432x12xbf16>
    %c1 = arith.constant 1 : index
    %c0_7 = arith.constant 0 : index
    %c0_8 = arith.constant 0 : index
    %11 = vector.load %arg2[%c1, %c0_7, %c0_8] : memref<3x12x128xbf16, #tpu.memory_space<vmem>>, vector<1x12x128xbf16>
    %12 = vector.shape_cast %11 : vector<1x12x128xbf16> to vector<12x128xbf16>
    %cst_9 = arith.constant dense<0.000000e+00> : vector<432x128xf32>
    %13 = tpu.matmul %10, %12, %cst_9 {dimension_numbers = #tpu.dot_dimension_numbers<[1], [0], [0], [1], [0, 0, 1, 1], [], []>} : vector<432x12xbf16>, vector<12x128xbf16>, vector<432x128xf32> -> vector<432x128xf32>
    %14 = arith.addf %8, %13 : vector<432x128xf32>
    %c0_10 = arith.constant 0 : index
    %c0_11 = arith.constant 0 : index
    %15 = vector.load %arg3[%c0_10, %c0_11] : memref<12x128xbf16, #tpu.memory_space<vmem>>, vector<12x128xbf16>
    %cst_12 = arith.constant dense<0.000000e+00> : vector<432x128xf32>
    %16 = tpu.matmul %10, %15, %cst_12 {dimension_numbers = #tpu.dot_dimension_numbers<[1], [0], [0], [1], [0, 0, 1, 1], [], []>} : vector<432x12xbf16>, vector<12x128xbf16>, vector<432x128xf32> -> vector<432x128xf32>
    %17 = vector.extract_strided_slice %1 {offsets = [2, 0, 0], sizes = [18, 24, 12], strides = [1, 1, 1]} : vector<20x24x12xbf16> to vector<18x24x12xbf16>
    %18 = vector.shape_cast %17 : vector<18x24x12xbf16> to vector<432x12xbf16>
    %c2 = arith.constant 2 : index
    %c0_13 = arith.constant 0 : index
    %c0_14 = arith.constant 0 : index
    %19 = vector.load %arg2[%c2, %c0_13, %c0_14] : memref<3x12x128xbf16, #tpu.memory_space<vmem>>, vector<1x12x128xbf16>
    %20 = vector.shape_cast %19 : vector<1x12x128xbf16> to vector<12x128xbf16>
    %cst_15 = arith.constant dense<0.000000e+00> : vector<432x128xf32>
    %21 = tpu.matmul %18, %20, %cst_15 {dimension_numbers = #tpu.dot_dimension_numbers<[1], [0], [0], [1], [0, 0, 1, 1], [], []>} : vector<432x12xbf16>, vector<12x128xbf16>, vector<432x128xf32> -> vector<432x128xf32>
    %22 = arith.addf %14, %21 : vector<432x128xf32>
    %c0_16 = arith.constant 0 : index
    %c0_17 = arith.constant 0 : index
    %c0_18 = arith.constant 0 : index
    %23 = vector.load %arg5[%c0_16, %c0_17, %c0_18] : memref<1x432x128xf32, #tpu.memory_space<vmem>>, vector<1x432x128xf32>
    %24 = vector.shape_cast %23 : vector<1x432x128xf32> to vector<432x128xf32>
    %25 = vector.shape_cast %22 : vector<432x128xf32> to vector<1x432x128xf32>
    tpu.vector_store %arg5[%c0_16, %c0_17, %c0_18], %25 {strides = array<i32>} : memref<1x432x128xf32, #tpu.memory_space<vmem>>, vector<1x432x128xf32>,
    %c0_19 = arith.constant 0 : index
    %c0_20 = arith.constant 0 : index
    %26 = vector.load %arg4[%c0_19, %c0_20] : memref<432x1xf32, #tpu.memory_space<vmem>>, vector<432x1xf32>
    %27 = vector.broadcast %26 : vector<432x1xf32> to vector<432x128xf32>
    %28 = arith.mulf %22, %27 : vector<432x128xf32>
    %cst_21 = arith.constant dense<0.000000e+00> : vector<128xf32>
    %29 = vector.multi_reduction <add>, %28, %cst_21 [0] : vector<432x128xf32> to vector<128xf32>
    %30 = vector.shape_cast %29 : vector<128xf32> to vector<1x128xf32>
    %31 = arith.mulf %22, %22 : vector<432x128xf32>
    %32 = vector.broadcast %26 : vector<432x1xf32> to vector<432x128xf32>
    %33 = arith.mulf %31, %32 : vector<432x128xf32>
    %cst_22 = arith.constant dense<0.000000e+00> : vector<128xf32>
    %34 = vector.multi_reduction <add>, %33, %cst_22 [0] : vector<432x128xf32> to vector<128xf32>
    %35 = vector.shape_cast %34 : vector<128xf32> to vector<1x128xf32>
    %36 = tpu.concatenate %30, %35 in 0 : vector<1x128xf32>, vector<1x128xf32> -> vector<2x128xf32>
    %c0_23 = arith.constant 0 : index
    %c0_24 = arith.constant 0 : index
    %c0_25 = arith.constant 0 : index
    %37 = vector.load %arg6[%c0_23, %c0_24, %c0_25] : memref<1x2x128xf32, #tpu.memory_space<vmem>>, vector<1x2x128xf32>
    %38 = vector.shape_cast %37 : vector<1x2x128xf32> to vector<2x128xf32>
    %39 = vector.shape_cast %36 : vector<2x128xf32> to vector<1x2x128xf32>
    tpu.vector_store %arg6[%c0_23, %c0_24, %c0_25], %39 {strides = array<i32>} : memref<1x2x128xf32, #tpu.memory_space<vmem>>, vector<1x2x128xf32>,
    %c0_26 = arith.constant 0 : index
    %c0_27 = arith.constant 0 : index
    %c0_28 = arith.constant 0 : index
    %40 = vector.load %arg7[%c0_26, %c0_27, %c0_28] : memref<1x432x128xf32, #tpu.memory_space<vmem>>, vector<1x432x128xf32>
    %41 = vector.shape_cast %40 : vector<1x432x128xf32> to vector<432x128xf32>
    %42 = vector.shape_cast %16 : vector<432x128xf32> to vector<1x432x128xf32>
    tpu.vector_store %arg7[%c0_26, %c0_27, %c0_28], %42 {strides = array<i32>} : memref<1x432x128xf32, #tpu.memory_space<vmem>>, vector<1x432x128xf32>,
    %43 = vector.broadcast %26 : vector<432x1xf32> to vector<432x128xf32>
    %44 = arith.mulf %16, %43 : vector<432x128xf32>
    %cst_29 = arith.constant dense<0.000000e+00> : vector<128xf32>
    %45 = vector.multi_reduction <add>, %44, %cst_29 [0] : vector<432x128xf32> to vector<128xf32>
    %46 = vector.shape_cast %45 : vector<128xf32> to vector<1x128xf32>
    %47 = arith.mulf %16, %16 : vector<432x128xf32>
    %48 = vector.broadcast %26 : vector<432x1xf32> to vector<432x128xf32>
    %49 = arith.mulf %47, %48 : vector<432x128xf32>
    %cst_30 = arith.constant dense<0.000000e+00> : vector<128xf32>
    %50 = vector.multi_reduction <add>, %49, %cst_30 [0] : vector<432x128xf32> to vector<128xf32>
    %51 = vector.shape_cast %50 : vector<128xf32> to vector<1x128xf32>
    %52 = tpu.concatenate %46, %51 in 0 : vector<1x128xf32>, vector<1x128xf32> -> vector<2x128xf32>
    %c0_31 = arith.constant 0 : index
    %c0_32 = arith.constant 0 : index
    %c0_33 = arith.constant 0 : index
    %53 = vector.load %arg8[%c0_31, %c0_32, %c0_33] : memref<1x2x128xf32, #tpu.memory_space<vmem>>, vector<1x2x128xf32>
    %54 = vector.shape_cast %53 : vector<1x2x128xf32> to vector<2x128xf32>
    %55 = vector.shape_cast %52 : vector<2x128xf32> to vector<1x2x128xf32>
    tpu.vector_store %arg8[%c0_31, %c0_32, %c0_33], %55 {strides = array<i32>} : memref<1x2x128xf32, #tpu.memory_space<vmem>>, vector<1x2x128xf32>,
    return
  }
  func.func @transform_0(%arg0: i32) -> (i32, i32, i32, i32) {
    %c0_i32 = arith.constant 0 : i32
    %c0_i32_0 = arith.constant 0 : i32
    %c0_i32_1 = arith.constant 0 : i32
    %c0_i32_2 = arith.constant 0 : i32
    return %arg0, %c0_i32, %c0_i32_0, %c0_i32_1 : i32, i32, i32, i32
  }
  func.func @transform_1(%arg0: i32) -> (i32, i32, i32) {
    %c0_i32 = arith.constant 0 : i32
    %c0_i32_0 = arith.constant 0 : i32
    %c0_i32_1 = arith.constant 0 : i32
    %c0_i32_2 = arith.constant 0 : i32
    return %c0_i32, %c0_i32_0, %c0_i32_1 : i32, i32, i32
  }
  func.func @transform_2(%arg0: i32) -> (i32, i32) {
    %c0_i32 = arith.constant 0 : i32
    %c0_i32_0 = arith.constant 0 : i32
    %c0_i32_1 = arith.constant 0 : i32
    return %c0_i32, %c0_i32_0 : i32, i32
  }
  func.func @transform_3(%arg0: i32) -> (i32, i32) {
    %c0_i32 = arith.constant 0 : i32
    %c0_i32_0 = arith.constant 0 : i32
    %c0_i32_1 = arith.constant 0 : i32
    return %c0_i32, %c0_i32_0 : i32, i32
  }
  func.func @transform_4(%arg0: i32) -> (i32, i32, i32) {
    %c0_i32 = arith.constant 0 : i32
    %c0_i32_0 = arith.constant 0 : i32
    %c0_i32_1 = arith.constant 0 : i32
    return %arg0, %c0_i32, %c0_i32_0 : i32, i32, i32
  }
  func.func @transform_5(%arg0: i32) -> (i32, i32, i32) {
    %c0_i32 = arith.constant 0 : i32
    %c0_i32_0 = arith.constant 0 : i32
    %c0_i32_1 = arith.constant 0 : i32
    return %arg0, %c0_i32, %c0_i32_0 : i32, i32, i32
  }
  func.func @transform_6(%arg0: i32) -> (i32, i32, i32) {
    %c0_i32 = arith.constant 0 : i32
    %c0_i32_0 = arith.constant 0 : i32
    %c0_i32_1 = arith.constant 0 : i32
    return %arg0, %c0_i32, %c0_i32_0 : i32, i32, i32
  }
  func.func @transform_7(%arg0: i32) -> (i32, i32, i32) {
    %c0_i32 = arith.constant 0 : i32
    %c0_i32_0 = arith.constant 0 : i32
    %c0_i32_1 = arith.constant 0 : i32
    return %arg0, %c0_i32, %c0_i32_0 : i32, i32, i32
  }
}

module attributes {stable_mosaic.version = 11 : i64} {
  func.func @kernel(%arg0: i32, %arg1: memref<1x256x128xf32, #tpu.memory_space<vmem>>, %arg2: memref<1x18x24x128xf32, #tpu.memory_space<vmem>>, %arg3: memref<1x128xf32, #tpu.memory_space<vmem>>, %arg4: memref<1x128xf32, #tpu.memory_space<vmem>>, %arg5: memref<1x128xf32, #tpu.memory_space<vmem>>, %arg6: memref<1x128xf32, #tpu.memory_space<vmem>>, %arg7: memref<1x256x128xf32, #tpu.memory_space<vmem>>) attributes {dimension_semantics = [#tpu.dimension_semantics<parallel>], iteration_bounds = array<i64: 2>, scalar_prefetch = 0 : i64, scratch_operands = 0 : i64, tpu.core_type = #tpu.core_type<tc>, window_params = [{transform_indices = @transform_0, window_bounds = array<i64: 1, 256, 128>}, {transform_indices = @transform_1, window_bounds = array<i64: 1, 18, 24, 128>}, {pipeline_mode = #tpu.pipeline_mode<synchronous>, transform_indices = @transform_2, window_bounds = array<i64: 1, 128>}, {pipeline_mode = #tpu.pipeline_mode<synchronous>, transform_indices = @transform_3, window_bounds = array<i64: 1, 128>}, {pipeline_mode = #tpu.pipeline_mode<synchronous>, transform_indices = @transform_4, window_bounds = array<i64: 1, 128>}, {pipeline_mode = #tpu.pipeline_mode<synchronous>, transform_indices = @transform_5, window_bounds = array<i64: 1, 128>}, {transform_indices = @transform_6, window_bounds = array<i64: 1, 256, 128>}]} {
    %c0 = arith.constant 0 : index
    %c0_0 = arith.constant 0 : index
    %c0_1 = arith.constant 0 : index
    %c0_2 = arith.constant 0 : index
    %0 = vector.load %arg2[%c0, %c0_0, %c0_1, %c0_2] : memref<1x18x24x128xf32, #tpu.memory_space<vmem>>, vector<1x18x24x128xf32>
    %1 = vector.shape_cast %0 : vector<1x18x24x128xf32> to vector<18x24x128xf32>
    %2 = vector.extract_strided_slice %1 {offsets = [1, 1, 0], sizes = [16, 16, 128], strides = [1, 1, 1]} : vector<18x24x128xf32> to vector<16x16x128xf32>
    %3 = vector.shape_cast %2 : vector<16x16x128xf32> to vector<256x128xf32>
    %c0_3 = arith.constant 0 : index
    %c0_4 = arith.constant 0 : index
    %4 = vector.load %arg5[%c0_3, %c0_4] : memref<1x128xf32, #tpu.memory_space<vmem>>, vector<1x128xf32>
    %5 = vector.broadcast %4 : vector<1x128xf32> to vector<256x128xf32>
    %6 = arith.mulf %3, %5 : vector<256x128xf32>
    %c0_5 = arith.constant 0 : index
    %c0_6 = arith.constant 0 : index
    %7 = vector.load %arg6[%c0_5, %c0_6] : memref<1x128xf32, #tpu.memory_space<vmem>>, vector<1x128xf32>
    %8 = vector.broadcast %7 : vector<1x128xf32> to vector<256x128xf32>
    %9 = arith.addf %6, %8 : vector<256x128xf32>
    %c0_7 = arith.constant 0 : index
    %c0_8 = arith.constant 0 : index
    %c0_9 = arith.constant 0 : index
    %10 = vector.load %arg1[%c0_7, %c0_8, %c0_9] : memref<1x256x128xf32, #tpu.memory_space<vmem>>, vector<1x256x128xf32>
    %11 = vector.shape_cast %10 : vector<1x256x128xf32> to vector<256x128xf32>
    %c0_10 = arith.constant 0 : index
    %c0_11 = arith.constant 0 : index
    %12 = vector.load %arg3[%c0_10, %c0_11] : memref<1x128xf32, #tpu.memory_space<vmem>>, vector<1x128xf32>
    %13 = vector.broadcast %12 : vector<1x128xf32> to vector<256x128xf32>
    %14 = arith.mulf %11, %13 : vector<256x128xf32>
    %c0_12 = arith.constant 0 : index
    %c0_13 = arith.constant 0 : index
    %15 = vector.load %arg4[%c0_12, %c0_13] : memref<1x128xf32, #tpu.memory_space<vmem>>, vector<1x128xf32>
    %16 = vector.broadcast %15 : vector<1x128xf32> to vector<256x128xf32>
    %17 = arith.addf %14, %16 : vector<256x128xf32>
    %18 = arith.addf %17, %9 : vector<256x128xf32>
    %cst = arith.constant 0.000000e+00 : f32
    %19 = vector.broadcast %cst : f32 to vector<256x128xf32>
    %20 = arith.maximumf %18, %19 : vector<256x128xf32>
    %c0_14 = arith.constant 0 : index
    %c0_15 = arith.constant 0 : index
    %c0_16 = arith.constant 0 : index
    %21 = vector.load %arg7[%c0_14, %c0_15, %c0_16] : memref<1x256x128xf32, #tpu.memory_space<vmem>>, vector<1x256x128xf32>
    %22 = vector.shape_cast %21 : vector<1x256x128xf32> to vector<256x128xf32>
    %23 = vector.shape_cast %20 : vector<256x128xf32> to vector<1x256x128xf32>
    tpu.vector_store %arg7[%c0_14, %c0_15, %c0_16], %23 {strides = array<i32>} : memref<1x256x128xf32, #tpu.memory_space<vmem>>, vector<1x256x128xf32>,
    return
  }
  func.func @transform_0(%arg0: i32) -> (i32, i32, i32) {
    %c0_i32 = arith.constant 0 : i32
    %c0_i32_0 = arith.constant 0 : i32
    %c0_i32_1 = arith.constant 0 : i32
    return %arg0, %c0_i32, %c0_i32_0 : i32, i32, i32
  }
  func.func @transform_1(%arg0: i32) -> (i32, i32, i32, i32) {
    %c0_i32 = arith.constant 0 : i32
    %c0_i32_0 = arith.constant 0 : i32
    %c0_i32_1 = arith.constant 0 : i32
    %c0_i32_2 = arith.constant 0 : i32
    return %arg0, %c0_i32, %c0_i32_0, %c0_i32_1 : i32, i32, i32, i32
  }
  func.func @transform_2(%arg0: i32) -> (i32, i32) {
    %c0_i32 = arith.constant 0 : i32
    %c0_i32_0 = arith.constant 0 : i32
    %c0_i32_1 = arith.constant 0 : i32
    return %c0_i32, %c0_i32_0 : i32, i32
  }
  func.func @transform_3(%arg0: i32) -> (i32, i32) {
    %c0_i32 = arith.constant 0 : i32
    %c0_i32_0 = arith.constant 0 : i32
    %c0_i32_1 = arith.constant 0 : i32
    return %c0_i32, %c0_i32_0 : i32, i32
  }
  func.func @transform_4(%arg0: i32) -> (i32, i32) {
    %c0_i32 = arith.constant 0 : i32
    %c0_i32_0 = arith.constant 0 : i32
    %c0_i32_1 = arith.constant 0 : i32
    return %c0_i32, %c0_i32_0 : i32, i32
  }
  func.func @transform_5(%arg0: i32) -> (i32, i32) {
    %c0_i32 = arith.constant 0 : i32
    %c0_i32_0 = arith.constant 0 : i32
    %c0_i32_1 = arith.constant 0 : i32
    return %c0_i32, %c0_i32_0 : i32, i32
  }
  func.func @transform_6(%arg0: i32) -> (i32, i32, i32) {
    %c0_i32 = arith.constant 0 : i32
    %c0_i32_0 = arith.constant 0 : i32
    %c0_i32_1 = arith.constant 0 : i32
    return %arg0, %c0_i32, %c0_i32_0 : i32, i32, i32
  }
}

module attributes {stable_mosaic.version = 11 : i64} {
  func.func @kernel(%arg0: i32, %arg1: memref<1x18x24x128xf32, #tpu.memory_space<vmem>>, %arg2: memref<1x128xf32, #tpu.memory_space<vmem>>, %arg3: memref<1x128xf32, #tpu.memory_space<vmem>>, %arg4: memref<18x24x1xf32, #tpu.memory_space<vmem>>, %arg5: memref<3x384x128xbf16, #tpu.memory_space<vmem>>, %arg6: memref<1x256x128xf32, #tpu.memory_space<vmem>>, %arg7: memref<1x2x128xf32, #tpu.memory_space<vmem>>) attributes {dimension_semantics = [#tpu.dimension_semantics<parallel>], iteration_bounds = array<i64: 2>, scalar_prefetch = 0 : i64, scratch_operands = 0 : i64, tpu.core_type = #tpu.core_type<tc>, window_params = [{transform_indices = @transform_0, window_bounds = array<i64: 1, 18, 24, 128>}, {pipeline_mode = #tpu.pipeline_mode<synchronous>, transform_indices = @transform_1, window_bounds = array<i64: 1, 128>}, {pipeline_mode = #tpu.pipeline_mode<synchronous>, transform_indices = @transform_2, window_bounds = array<i64: 1, 128>}, {pipeline_mode = #tpu.pipeline_mode<synchronous>, transform_indices = @transform_3, window_bounds = array<i64: 18, 24, 1>}, {pipeline_mode = #tpu.pipeline_mode<synchronous>, transform_indices = @transform_4, window_bounds = array<i64: 3, 384, 128>}, {transform_indices = @transform_5, window_bounds = array<i64: 1, 256, 128>}, {transform_indices = @transform_6, window_bounds = array<i64: 1, 2, 128>}]} {
    %c0 = arith.constant 0 : index
    %c0_0 = arith.constant 0 : index
    %c0_1 = arith.constant 0 : index
    %c0_2 = arith.constant 0 : index
    %0 = vector.load %arg1[%c0, %c0_0, %c0_1, %c0_2] : memref<1x18x24x128xf32, #tpu.memory_space<vmem>>, vector<1x18x24x128xf32>
    %1 = vector.shape_cast %0 : vector<1x18x24x128xf32> to vector<18x24x128xf32>
    %c0_3 = arith.constant 0 : index
    %c0_4 = arith.constant 0 : index
    %2 = vector.load %arg2[%c0_3, %c0_4] : memref<1x128xf32, #tpu.memory_space<vmem>>, vector<1x128xf32>
    %3 = vector.shape_cast %2 : vector<1x128xf32> to vector<1x1x128xf32>
    %4 = vector.broadcast %3 : vector<1x1x128xf32> to vector<18x24x128xf32>
    %5 = arith.mulf %1, %4 : vector<18x24x128xf32>
    %c0_5 = arith.constant 0 : index
    %c0_6 = arith.constant 0 : index
    %6 = vector.load %arg3[%c0_5, %c0_6] : memref<1x128xf32, #tpu.memory_space<vmem>>, vector<1x128xf32>
    %7 = vector.shape_cast %6 : vector<1x128xf32> to vector<1x1x128xf32>
    %8 = vector.broadcast %7 : vector<1x1x128xf32> to vector<18x24x128xf32>
    %9 = arith.addf %5, %8 : vector<18x24x128xf32>
    %cst = arith.constant 0.000000e+00 : f32
    %10 = vector.broadcast %cst : f32 to vector<18x24x128xf32>
    %11 = arith.maximumf %9, %10 : vector<18x24x128xf32>
    %c0_7 = arith.constant 0 : index
    %c0_8 = arith.constant 0 : index
    %c0_9 = arith.constant 0 : index
    %12 = vector.load %arg4[%c0_7, %c0_8, %c0_9] : memref<18x24x1xf32, #tpu.memory_space<vmem>>, vector<18x24x1xf32>
    %13 = vector.broadcast %12 : vector<18x24x1xf32> to vector<18x24x128xf32>
    %14 = arith.mulf %11, %13 : vector<18x24x128xf32>
    %15 = arith.truncf %14 : vector<18x24x128xf32> to vector<18x24x128xbf16>
    %16 = vector.extract_strided_slice %15 {offsets = [0, 0, 0], sizes = [18, 16, 128], strides = [1, 1, 1]} : vector<18x24x128xbf16> to vector<18x16x128xbf16>
    %17 = vector.extract_strided_slice %15 {offsets = [0, 1, 0], sizes = [18, 16, 128], strides = [1, 1, 1]} : vector<18x24x128xbf16> to vector<18x16x128xbf16>
    %18 = vector.extract_strided_slice %15 {offsets = [0, 2, 0], sizes = [18, 16, 128], strides = [1, 1, 1]} : vector<18x24x128xbf16> to vector<18x16x128xbf16>
    %19 = tpu.concatenate %16, %17, %18 in 2 : vector<18x16x128xbf16>, vector<18x16x128xbf16>, vector<18x16x128xbf16> -> vector<18x16x384xbf16>
    %cst_10 = arith.constant 0.000000e+00 : f32
    %20 = vector.broadcast %cst_10 : f32 to vector<256x128xf32>
    %21 = vector.extract_strided_slice %19 {offsets = [0, 0, 0], sizes = [16, 16, 384], strides = [1, 1, 1]} : vector<18x16x384xbf16> to vector<16x16x384xbf16>
    %22 = vector.shape_cast %21 : vector<16x16x384xbf16> to vector<256x384xbf16>
    %c0_11 = arith.constant 0 : index
    %c0_12 = arith.constant 0 : index
    %c0_13 = arith.constant 0 : index
    %23 = vector.load %arg5[%c0_11, %c0_12, %c0_13] : memref<3x384x128xbf16, #tpu.memory_space<vmem>>, vector<1x384x128xbf16>
    %24 = vector.shape_cast %23 : vector<1x384x128xbf16> to vector<384x128xbf16>
    %cst_14 = arith.constant dense<0.000000e+00> : vector<256x128xf32>
    %25 = tpu.matmul %22, %24, %cst_14 {dimension_numbers = #tpu.dot_dimension_numbers<[1], [0], [0], [1], [0, 0, 1, 1], [], []>} : vector<256x384xbf16>, vector<384x128xbf16>, vector<256x128xf32> -> vector<256x128xf32>
    %26 = arith.addf %20, %25 : vector<256x128xf32>
    %27 = vector.extract_strided_slice %19 {offsets = [1, 0, 0], sizes = [16, 16, 384], strides = [1, 1, 1]} : vector<18x16x384xbf16> to vector<16x16x384xbf16>
    %28 = vector.shape_cast %27 : vector<16x16x384xbf16> to vector<256x384xbf16>
    %c1 = arith.constant 1 : index
    %c0_15 = arith.constant 0 : index
    %c0_16 = arith.constant 0 : index
    %29 = vector.load %arg5[%c1, %c0_15, %c0_16] : memref<3x384x128xbf16, #tpu.memory_space<vmem>>, vector<1x384x128xbf16>
    %30 = vector.shape_cast %29 : vector<1x384x128xbf16> to vector<384x128xbf16>
    %cst_17 = arith.constant dense<0.000000e+00> : vector<256x128xf32>
    %31 = tpu.matmul %28, %30, %cst_17 {dimension_numbers = #tpu.dot_dimension_numbers<[1], [0], [0], [1], [0, 0, 1, 1], [], []>} : vector<256x384xbf16>, vector<384x128xbf16>, vector<256x128xf32> -> vector<256x128xf32>
    %32 = arith.addf %26, %31 : vector<256x128xf32>
    %33 = vector.extract_strided_slice %19 {offsets = [2, 0, 0], sizes = [16, 16, 384], strides = [1, 1, 1]} : vector<18x16x384xbf16> to vector<16x16x384xbf16>
    %34 = vector.shape_cast %33 : vector<16x16x384xbf16> to vector<256x384xbf16>
    %c2 = arith.constant 2 : index
    %c0_18 = arith.constant 0 : index
    %c0_19 = arith.constant 0 : index
    %35 = vector.load %arg5[%c2, %c0_18, %c0_19] : memref<3x384x128xbf16, #tpu.memory_space<vmem>>, vector<1x384x128xbf16>
    %36 = vector.shape_cast %35 : vector<1x384x128xbf16> to vector<384x128xbf16>
    %cst_20 = arith.constant dense<0.000000e+00> : vector<256x128xf32>
    %37 = tpu.matmul %34, %36, %cst_20 {dimension_numbers = #tpu.dot_dimension_numbers<[1], [0], [0], [1], [0, 0, 1, 1], [], []>} : vector<256x384xbf16>, vector<384x128xbf16>, vector<256x128xf32> -> vector<256x128xf32>
    %38 = arith.addf %32, %37 : vector<256x128xf32>
    %c0_21 = arith.constant 0 : index
    %c0_22 = arith.constant 0 : index
    %c0_23 = arith.constant 0 : index
    %39 = vector.load %arg6[%c0_21, %c0_22, %c0_23] : memref<1x256x128xf32, #tpu.memory_space<vmem>>, vector<1x256x128xf32>
    %40 = vector.shape_cast %39 : vector<1x256x128xf32> to vector<256x128xf32>
    %41 = vector.shape_cast %38 : vector<256x128xf32> to vector<1x256x128xf32>
    tpu.vector_store %arg6[%c0_21, %c0_22, %c0_23], %41 {strides = array<i32>} : memref<1x256x128xf32, #tpu.memory_space<vmem>>, vector<1x256x128xf32>,
    %cst_24 = arith.constant dense<0.000000e+00> : vector<128xf32>
    %42 = vector.multi_reduction <add>, %38, %cst_24 [0] : vector<256x128xf32> to vector<128xf32>
    %43 = vector.shape_cast %42 : vector<128xf32> to vector<1x128xf32>
    %44 = arith.mulf %38, %38 : vector<256x128xf32>
    %cst_25 = arith.constant dense<0.000000e+00> : vector<128xf32>
    %45 = vector.multi_reduction <add>, %44, %cst_25 [0] : vector<256x128xf32> to vector<128xf32>
    %46 = vector.shape_cast %45 : vector<128xf32> to vector<1x128xf32>
    %47 = tpu.concatenate %43, %46 in 0 : vector<1x128xf32>, vector<1x128xf32> -> vector<2x128xf32>
    %c0_26 = arith.constant 0 : index
    %c0_27 = arith.constant 0 : index
    %c0_28 = arith.constant 0 : index
    %48 = vector.load %arg7[%c0_26, %c0_27, %c0_28] : memref<1x2x128xf32, #tpu.memory_space<vmem>>, vector<1x2x128xf32>
    %49 = vector.shape_cast %48 : vector<1x2x128xf32> to vector<2x128xf32>
    %50 = vector.shape_cast %47 : vector<2x128xf32> to vector<1x2x128xf32>
    tpu.vector_store %arg7[%c0_26, %c0_27, %c0_28], %50 {strides = array<i32>} : memref<1x2x128xf32, #tpu.memory_space<vmem>>, vector<1x2x128xf32>,
    return
  }
  func.func @transform_0(%arg0: i32) -> (i32, i32, i32, i32) {
    %c0_i32 = arith.constant 0 : i32
    %c0_i32_0 = arith.constant 0 : i32
    %c0_i32_1 = arith.constant 0 : i32
    %c0_i32_2 = arith.constant 0 : i32
    return %arg0, %c0_i32, %c0_i32_0, %c0_i32_1 : i32, i32, i32, i32
  }
  func.func @transform_1(%arg0: i32) -> (i32, i32) {
    %c0_i32 = arith.constant 0 : i32
    %c0_i32_0 = arith.constant 0 : i32
    %c0_i32_1 = arith.constant 0 : i32
    return %c0_i32, %c0_i32_0 : i32, i32
  }
  func.func @transform_2(%arg0: i32) -> (i32, i32) {
    %c0_i32 = arith.constant 0 : i32
    %c0_i32_0 = arith.constant 0 : i32
    %c0_i32_1 = arith.constant 0 : i32
    return %c0_i32, %c0_i32_0 : i32, i32
  }
  func.func @transform_3(%arg0: i32) -> (i32, i32, i32) {
    %c0_i32 = arith.constant 0 : i32
    %c0_i32_0 = arith.constant 0 : i32
    %c0_i32_1 = arith.constant 0 : i32
    %c0_i32_2 = arith.constant 0 : i32
    return %c0_i32, %c0_i32_0, %c0_i32_1 : i32, i32, i32
  }
  func.func @transform_4(%arg0: i32) -> (i32, i32, i32) {
    %c0_i32 = arith.constant 0 : i32
    %c0_i32_0 = arith.constant 0 : i32
    %c0_i32_1 = arith.constant 0 : i32
    %c0_i32_2 = arith.constant 0 : i32
    return %c0_i32, %c0_i32_0, %c0_i32_1 : i32, i32, i32
  }
  func.func @transform_5(%arg0: i32) -> (i32, i32, i32) {
    %c0_i32 = arith.constant 0 : i32
    %c0_i32_0 = arith.constant 0 : i32
    %c0_i32_1 = arith.constant 0 : i32
    return %arg0, %c0_i32, %c0_i32_0 : i32, i32, i32
  }
  func.func @transform_6(%arg0: i32) -> (i32, i32, i32) {
    %c0_i32 = arith.constant 0 : i32
    %c0_i32_0 = arith.constant 0 : i32
    %c0_i32_1 = arith.constant 0 : i32
    return %arg0, %c0_i32, %c0_i32_0 : i32, i32, i32
  }
}

</mosaic_0001>

<bundles_post_ra>
// kernel: basic_block_forward.5
= control target key start
LH: loop header
LB: loop body
LE: loop exit
PB: predicated region body
PF: predicated region fallthrough
CT: control target
= control target key end

     0   :  { %s890_s21 = smov 0   ;;  %s1216_s0 = inlined_call_operand.vmem [shape: f32[2,256,128], index: 0, kind: input, shape index: {}]   ;;  %s1217_s1 = inlined_call_operand.vmem [shape: f32[2,18,24,128], index: 1, kind: input, shape index: {}]   ;;  %s1218_s2 = inlined_call_operand.vmem [shape: f32[1,128], index: 2, kind: input, shape index: {}]   ;;  %s1219_s3 = inlined_call_operand.vmem [shape: f32[1,128], index: 3, kind: input, shape index: {}]   ;;  %s1220_s4 = inlined_call_operand.vmem [shape: f32[1,128], index: 4, kind: input, shape index: {}]   ;;  %s1221_s5 = inlined_call_operand.vmem [shape: f32[1,128], index: 5, kind: input, shape index: {}]   ;;  %s1222_s6 = inlined_call_operand.vmem [shape: f32[2,256,128], index: 6, kind: output, shape index: {}]  }
   0x1 LB: > { %s820_s22 = sadd.s32 4294967295, %s853_s21   ;;  %p824_p0 = scmp.ge.s32.totalorder %s853_s21, 1  ;;  %s853_s21 = sphi %s890_s21, %s16_s21  }
   0x2   : > { %p222_p1 = scmp.lt.s32.totalorder %s853_s21, 3 }
   0x4   : > { %p223_p2 = pnand %p824_p0, %p222_p1 }
   0x5   : > { %p257_p3 = scmp.lt.s32.totalorder (!%p223_p2), %s820_s22, 1 }
   0x6   : > { %226 = sbr.rel (%p223_p2) target bundleno = 90 (0x5a), region = 44 }
   0xb   : > { %s1224_s22 = smov (!%p257_p3, %s820_s22), 1  ;;  %v903_v0 = vld [vmem:[%s1218_s2] ss:$0 sm:$0xff]  ;;  %vm368_vm0 = vcmask 1046528  }
   0xc   : > { %s832_s25 = sshll.u32 %s1224_s22, 8  ;;  %s834_s26 = smul.u32 432, %s1224_s22  ;;  %v917_v1 = vld [vmem:[%s1220_s4] ss:$0 sm:$0xff] }
   0xd   : > { %s912_s29 = scalar_lea.vmem %s1216_s0, %s832_s25  ;;  %v922_v2 = vld [vmem:[%s1219_s3] ss:$0 sm:$0xff]  ;;  %s978_s17 = scalar_lea.vmem %s1222_s6, %s832_s25 }
   0xe   : > { %s927_s12 = scalar_lea.vmem %s1217_s1, %s834_s26  ;;  %v553_v3 = vld [vmem:[%s912_s29] sm:$0xff]  ;;  %v554_v4 = vld [vmem:[%s912_s29 + $0x8] sm:$0xff]  ;;  %v555_v5 = vld [vmem:[%s912_s29 + $0x10] sm:$0xff] }
   0xf   : > { %v272_v6 = vld [vmem:[%s927_s12 + $0x18] sm:$0xff]  ;;  %v273_v7 = vld [vmem:[%s927_s12 + $0x20] sm:$0xff]  ;;  %v589_v9 = vmul.f32 %v903_v0, %v553_v3  ;;  %v274_v10 = vld [vmem:[%s927_s12 + $0x28] sm:$0xff]  ;;  %v590_v11 = vmul.f32 %v903_v0, %v554_v4  ;;  %v591_v12 = vmul.f32 %v903_v0, %v555_v5 }
  0x10   : > { %v937_v8 = vld [vmem:[%s1221_s5] ss:$0 sm:$0xff]  ;;  %v369_v13 = vrot.slane %v272_v6, 1  ;;  %v370_v14 = vrot.slane %v273_v7, 1  ;;  %v372_v15 = vrot.slane %v274_v10, 1  ;;  %v275_v16 = vld [vmem:[%s927_s12 + $0x30] sm:$0xff] }
  0x11   : > { %v276_v17 = vld [vmem:[%s927_s12 + $0x38] sm:$0xff]  ;;  %v277_v18 = vld [vmem:[%s927_s12 + $0x40] sm:$0xff]  ;;  %v625_v19 = vadd.f32 %v922_v2, %v589_v9  ;;  %v626_v20 = vadd.f32 %v922_v2, %v590_v11  ;;  %v374_v21 = vrot.slane %v275_v16, 1  ;;  %v278_v24 = vld [vmem:[%s927_s12 + $0x48] sm:$0xff]  ;;  %v627_v28 = vadd.f32 %v922_v2, %v591_v12 }
  0x12   : > { %v375_v22 = vrot.slane %v276_v17, 1  ;;  %v556_v23 = vld [vmem:[%s912_s29 + $0x18] sm:$0xff]  ;;  %v279_v25 = vld [vmem:[%s927_s12 + $0x50] sm:$0xff]  ;;  %v371_v26 = vsel %vm368_vm0, %v369_v13, %v370_v14  ;;  %v373_v27 = vsel %vm368_vm0, %v370_v14, %v372_v15  ;;  %v377_v29 = vrot.slane %v277_v18, 1  ;;  %v557_v34 = vld [vmem:[%s912_s29 + $0x20] sm:$0xff] }
  0x13   : > { %v485_v30 = vmul.f32 %v917_v1, %v371_v26  ;;  %v486_v31 = vmul.f32 %v917_v1, %v373_v27  ;;  %v592_v33 = vmul.f32 %v903_v0, %v556_v23  ;;  %v280_v35 = vld [vmem:[%s927_s12 + $0x58] sm:$0xff]  ;;  %v379_v38 = vrot.slane %v278_v24, 1  ;;  %v558_v44 = vld [vmem:[%s912_s29 + $0x28] sm:$0xff]  ;;  %v281_v53 = vld [vmem:[%s927_s12 + $0x60] sm:$0xff] }
  0x14   : > { %v376_v32 = vsel %vm368_vm0, %v374_v21, %v375_v22  ;;  %v378_v37 = vsel %vm368_vm0, %v375_v22, %v377_v29  ;;  %v380_v39 = vrot.slane %v279_v25, 1  ;;  %v593_v47 = vmul.f32 %v903_v0, %v557_v34  ;;  %v282_v58 = vld [vmem:[%s927_s12 + $0x68] sm:$0xff]  ;;  %v559_v59 = vld [vmem:[%s912_s29 + $0x30] sm:$0xff]  ;;  %v560_v4 = vld [vmem:[%s912_s29 + $0x38] sm:$0xff] }
  0x15   : > { %v487_v36 = vmul.f32 %v917_v1, %v376_v32  ;;  %v521_v40 = vadd.f32 %v937_v8, %v485_v30  ;;  %v522_v41 = vadd.f32 %v937_v8, %v486_v31  ;;  %v488_v42 = vmul.f32 %v917_v1, %v378_v37  ;;  %v283_v3 = vld [vmem:[%s927_s12 + $0x70] sm:$0xff]  ;;  %v284_v5 = vld [vmem:[%s927_s12 + $0x78] sm:$0xff]  ;;  %v285_v11 = vld [vmem:[%s927_s12 + $0x80] sm:$0xff] }
  0x16   : > { %v628_v43 = vadd.f32 %v922_v2, %v592_v33  ;;  %v381_v46 = vsel %vm368_vm0, %v379_v38, %v380_v39  ;;  %v382_v48 = vrot.slane %v280_v35, 1  ;;  %v629_v55 = vadd.f32 %v922_v2, %v593_v47  ;;  %v286_v21 = vld [vmem:[%s927_s12 + $0x88] sm:$0xff]  ;;  %v287_v31 = vld [vmem:[%s927_s12 + $0x90] sm:$0xff]  ;;  %v564_v47 = vld [vmem:[%s912_s29 + $0x58] sm:$0xff] }
  0x17   : > { %v523_v45 = vadd.f32 %v937_v8, %v487_v36  ;;  %v657_v49 = vadd.f32 %v625_v19, %v521_v40  ;;  %v658_v50 = vadd.f32 %v626_v20, %v522_v41  ;;  %v524_v51 = vadd.f32 %v937_v8, %v488_v42  ;;  %v561_v20 = vld [vmem:[%s912_s29 + $0x40] sm:$0xff]  ;;  %v562_v26 = vld [vmem:[%s912_s29 + $0x48] sm:$0xff]  ;;  %v288_v40 = vld [vmem:[%s927_s12 + $0x98] sm:$0xff] }
  0x18   : > { %v489_v52 = vmul.f32 %v917_v1, %v381_v46  ;;  %v383_v56 = vsel %vm368_vm0, %v380_v39, %v382_v48  ;;  %v594_v57 = vmul.f32 %v903_v0, %v558_v44  ;;  %v384_v10 = vrot.slane %v281_v53, 1  ;;  %v563_v41 = vld [vmem:[%s912_s29 + $0x50] sm:$0xff]  ;;  %v289_v42 = vld [vmem:[%s927_s12 + $0xa0] sm:$0xff] }
  0x19   : > { %v659_v54 = vadd.f32 %v627_v28, %v523_v45  ;;  %v689_v60 = vmax.f32 %v657_v49, 0.0  ;;  %v690_v61 = vmax.f32 %v658_v50, 0.0  ;;  %v660_v62 = vadd.f32 %v628_v43, %v524_v51 }
  0x1a   : > { %v525_v63 = vadd.f32 %v937_v8, %v489_v52  ;;  %v490_v7 = vmul.f32 %v917_v1, %v383_v56  ;;  %v630_v9 = vadd.f32 %v922_v2, %v594_v57  ;;  %v385_v14 = vrot.slane %v282_v58, 1 }
  0x1b   : > { %v691_v6 = vmax.f32 %v659_v54, 0.0  ;;  %721 = vst [vmem:[%s978_s17] sm:$0xff] %v689_v60  ;;  %v692_v12 = vmax.f32 %v660_v62, 0.0  ;;  %v595_v15 = vmul.f32 %v903_v0, %v559_v59  ;;  %v387_v17 = vrot.slane %v283_v3, 1  ;;  %v290_v60 = vld [vmem:[%s927_s12 + $0xa8] sm:$0xff]  ;;  %v565_v62 = vld [vmem:[%s912_s29 + $0x60] sm:$0xff] }
  0x1c   : > { %v661_v13 = vadd.f32 %v629_v55, %v525_v63  ;;  %722 = vst [vmem:[%s978_s17 + $0x8] sm:$0xff] %v690_v61  ;;  %v526_v16 = vadd.f32 %v937_v8, %v490_v7  ;;  %v596_v18 = vmul.f32 %v903_v0, %v560_v4  ;;  %v389_v19 = vrot.slane %v284_v5, 1  ;;  %v291_v61 = vld [vmem:[%s927_s12 + $0xb0] sm:$0xff] }
  0x1d   : > { %723 = vst [vmem:[%s978_s17 + $0x10] sm:$0xff] %v691_v6  ;;  %v386_v23 = vsel %vm368_vm0, %v384_v10, %v385_v14  ;;  %v631_v24 = vadd.f32 %v922_v2, %v595_v15  ;;  %v390_v25 = vrot.slane %v285_v11, 1  ;;  %v388_v29 = vsel %vm368_vm0, %v385_v14, %v387_v17  ;;  %v292_v6 = vld [vmem:[%s927_s12 + $0xb8] sm:$0xff] }
  0x1e   : > { %v693_v22 = vmax.f32 %v661_v13, 0.0  ;;  %724 = vst [vmem:[%s978_s17 + $0x18] sm:$0xff] %v692_v12  ;;  %v662_v27 = vadd.f32 %v630_v9, %v526_v16  ;;  %v491_v28 = vmul.f32 %v917_v1, %v386_v23  ;;  %v632_v30 = vadd.f32 %v922_v2, %v596_v18  ;;  %v566_v12 = vld [vmem:[%s912_s29 + $0x68] sm:$0xff]  ;;  %v293_v13 = vld [vmem:[%s927_s12 + $0xc0] sm:$0xff]  ;;  %v567_v23 = vld [vmem:[%s912_s29 + $0x70] sm:$0xff] }
  0x1f   : > { %v492_v32 = vmul.f32 %v917_v1, %v388_v29  ;;  %v391_v33 = vsel %vm368_vm0, %v389_v19, %v390_v25  ;;  %v597_v34 = vmul.f32 %v903_v0, %v561_v20  ;;  %v392_v35 = vrot.slane %v286_v21, 1 }
  0x20   : > { %725 = vst [vmem:[%s978_s17 + $0x20] sm:$0xff] %v693_v22  ;;  %v694_v36 = vmax.f32 %v662_v27, 0.0  ;;  %v527_v37 = vadd.f32 %v937_v8, %v491_v28  ;;  %v493_v38 = vmul.f32 %v917_v1, %v391_v33  ;;  %v598_v39 = vmul.f32 %v903_v0, %v562_v26  ;;  %v294_v22 = vld [vmem:[%s927_s12 + $0xc8] sm:$0xff]  ;;  %v295_v28 = vld [vmem:[%s927_s12 + $0xd0] sm:$0xff]  ;;  %v568_v33 = vld [vmem:[%s912_s29 + $0x78] sm:$0xff] }
  0x21   : > { %v528_v43 = vadd.f32 %v937_v8, %v492_v32  ;;  %v633_v44 = vadd.f32 %v922_v2, %v597_v34  ;;  %v393_v45 = vsel %vm368_vm0, %v390_v25, %v392_v35  ;;  %v394_v46 = vrot.slane %v287_v31, 1 }
  0x22   : > { %726 = vst [vmem:[%s978_s17 + $0x28] sm:$0xff] %v694_v36  ;;  %v663_v48 = vadd.f32 %v631_v24, %v527_v37  ;;  %v529_v49 = vadd.f32 %v937_v8, %v493_v38  ;;  %v494_v50 = vmul.f32 %v917_v1, %v393_v45  ;;  %v634_v51 = vadd.f32 %v922_v2, %v598_v39  ;;  %v296_v38 = vld [vmem:[%s927_s12 + $0xd8] sm:$0xff] }
  0x23   : > { %v664_v52 = vadd.f32 %v632_v30, %v528_v43  ;;  %v395_v53 = vrot.slane %v288_v40, 1  ;;  %v599_v54 = vmul.f32 %v903_v0, %v563_v41  ;;  %v397_v55 = vrot.slane %v289_v42, 1  ;;  %v297_v43 = vld [vmem:[%s927_s12 + $0xe0] sm:$0xff] }
  0x24   : > { %v695_v56 = vmax.f32 %v663_v48, 0.0  ;;  %v665_v57 = vadd.f32 %v633_v44, %v529_v49  ;;  %v530_v58 = vadd.f32 %v937_v8, %v494_v50  ;;  %v600_v59 = vmul.f32 %v903_v0, %v564_v47  ;;  %v569_v48 = vld [vmem:[%s912_s29 + $0x80] sm:$0xff]  ;;  %v298_v49 = vld [vmem:[%s927_s12 + $0xe8] sm:$0xff] }
  0x25   : > { %v696_v63 = vmax.f32 %v664_v52, 0.0  ;;  %v396_v3 = vsel %vm368_vm0, %v394_v46, %v395_v53  ;;  %v635_v4 = vadd.f32 %v922_v2, %v599_v54  ;;  %v398_v5 = vsel %vm368_vm0, %v395_v53, %v397_v55  ;;  %v570_v54 = vld [vmem:[%s912_s29 + $0x88] sm:$0xff] }
  0x26   : > { %727 = vst [vmem:[%s978_s17 + $0x30] sm:$0xff] %v695_v56  ;;  %v697_v7 = vmax.f32 %v665_v57, 0.0  ;;  %v666_v9 = vadd.f32 %v634_v51, %v530_v58  ;;  %v495_v10 = vmul.f32 %v917_v1, %v396_v3  ;;  %v496_v11 = vmul.f32 %v917_v1, %v398_v5 }
  0x27   : > { %728 = vst [vmem:[%s978_s17 + $0x38] sm:$0xff] %v696_v63  ;;  %v636_v14 = vadd.f32 %v922_v2, %v600_v59  ;;  %v399_v15 = vrot.slane %v290_v60, 1  ;;  %v400_v16 = vrot.slane %v291_v61, 1  ;;  %v601_v17 = vmul.f32 %v903_v0, %v565_v62  ;;  %v299_v63 = vld [vmem:[%s927_s12 + $0xf0] sm:$0xff] }
  0x28   : > { %729 = vst [vmem:[%s978_s17 + $0x40] sm:$0xff] %v697_v7  ;;  %v698_v18 = vmax.f32 %v666_v9, 0.0  ;;  %v531_v19 = vadd.f32 %v937_v8, %v495_v10  ;;  %v532_v20 = vadd.f32 %v937_v8, %v496_v11  ;;  %v402_v21 = vrot.slane %v292_v6, 1  ;;  %v300_v7 = vld [vmem:[%s927_s12 + $0xf8] sm:$0xff]  ;;  %v571_v9 = vld [vmem:[%s912_s29 + $0x90] sm:$0xff] }
  0x29   : > { %v401_v24 = vsel %vm368_vm0, %v399_v15, %v400_v16  ;;  %v637_v25 = vadd.f32 %v922_v2, %v601_v17  ;;  %v602_v26 = vmul.f32 %v903_v0, %v566_v12  ;;  %v404_v27 = vrot.slane %v293_v13, 1  ;;  %v572_v15 = vld [vmem:[%s912_s29 + $0x98] sm:$0xff] }
  0x2a   : > { %730 = vst [vmem:[%s978_s17 + $0x48] sm:$0xff] %v698_v18  ;;  %v667_v29 = vadd.f32 %v635_v4, %v531_v19  ;;  %v668_v30 = vadd.f32 %v636_v14, %v532_v20  ;;  %v497_v31 = vmul.f32 %v917_v1, %v401_v24  ;;  %v403_v32 = vsel %vm368_vm0, %v400_v16, %v402_v21  ;;  %v301_v14 = vld [vmem:[%s927_s12 + $0x100] sm:$0xff]  ;;  %v302_v20 = vld [vmem:[%s927_s12 + $0x108] sm:$0xff] }
  0x2b   : > { %v498_v34 = vmul.f32 %v917_v1, %v403_v32  ;;  %v638_v35 = vadd.f32 %v922_v2, %v602_v26  ;;  %v405_v36 = vrot.slane %v294_v22, 1  ;;  %v603_v37 = vmul.f32 %v903_v0, %v567_v23 }
  0x2c   : > { %v699_v39 = vmax.f32 %v667_v29, 0.0  ;;  %v700_v40 = vmax.f32 %v668_v30, 0.0  ;;  %v533_v41 = vadd.f32 %v937_v8, %v497_v31  ;;  %v407_v42 = vrot.slane %v295_v28, 1  ;;  %v303_v29 = vld [vmem:[%s927_s12 + $0x110] sm:$0xff]  ;;  %v573_v30 = vld [vmem:[%s912_s29 + $0xa0] sm:$0xff] }
  0x2d   : > { %v534_v44 = vadd.f32 %v937_v8, %v498_v34  ;;  %v406_v45 = vsel %vm368_vm0, %v404_v27, %v405_v36  ;;  %v639_v46 = vadd.f32 %v922_v2, %v603_v37  ;;  %v604_v47 = vmul.f32 %v903_v0, %v568_v33 }
  0x2e   : > { %731 = vst [vmem:[%s978_s17 + $0x50] sm:$0xff] %v699_v39  ;;  %v669_v50 = vadd.f32 %v637_v25, %v533_v41  ;;  %v499_v51 = vmul.f32 %v917_v1, %v406_v45  ;;  %v408_v52 = vsel %vm368_vm0, %v405_v36, %v407_v42  ;;  %v409_v53 = vrot.slane %v296_v38, 1  ;;  %v574_v36 = vld [vmem:[%s912_s29 + $0xa8] sm:$0xff]  ;;  %v305_v41 = vld [vmem:[%s927_s12 + $0x120] sm:$0xff] }
  0x2f   : > { %732 = vst [vmem:[%s978_s17 + $0x58] sm:$0xff] %v700_v40  ;;  %v670_v55 = vadd.f32 %v638_v35, %v534_v44  ;;  %v500_v56 = vmul.f32 %v917_v1, %v408_v52  ;;  %v640_v57 = vadd.f32 %v922_v2, %v604_v47  ;;  %v410_v58 = vrot.slane %v297_v43, 1  ;;  %v304_v35 = vld [vmem:[%s927_s12 + $0x118] sm:$0xff] }
  0x30   : > { %v701_v59 = vmax.f32 %v669_v50, 0.0  ;;  %v535_v60 = vadd.f32 %v937_v8, %v499_v51  ;;  %v605_v61 = vmul.f32 %v903_v0, %v569_v48  ;;  %v412_v62 = vrot.slane %v298_v49, 1  ;;  %v306_v50 = vld [vmem:[%s927_s12 + $0x128] sm:$0xff]  ;;  %v575_v51 = vld [vmem:[%s912_s29 + $0xb0] sm:$0xff] }
  0x31   : > { %v702_v3 = vmax.f32 %v670_v55, 0.0  ;;  %v536_v4 = vadd.f32 %v937_v8, %v500_v56  ;;  %v411_v5 = vsel %vm368_vm0, %v409_v53, %v410_v58  ;;  %v606_v6 = vmul.f32 %v903_v0, %v570_v54  ;;  %v307_v56 = vld [vmem:[%s927_s12 + $0x130] sm:$0xff] }
  0x32   : > { %733 = vst [vmem:[%s978_s17 + $0x60] sm:$0xff] %v701_v59  ;;  %v671_v10 = vadd.f32 %v639_v46, %v535_v60  ;;  %v501_v11 = vmul.f32 %v917_v1, %v411_v5  ;;  %v641_v12 = vadd.f32 %v922_v2, %v605_v61  ;;  %v413_v13 = vsel %vm368_vm0, %v410_v58, %v412_v62 }
  0x33   : > { %734 = vst [vmem:[%s978_s17 + $0x68] sm:$0xff] %v702_v3  ;;  %v672_v16 = vadd.f32 %v640_v57, %v536_v4  ;;  %v502_v17 = vmul.f32 %v917_v1, %v413_v13  ;;  %v642_v18 = vadd.f32 %v922_v2, %v606_v6  ;;  %v414_v19 = vrot.slane %v299_v63, 1  ;;  %v576_v57 = vld [vmem:[%s912_s29 + $0xb8] sm:$0xff] }
  0x34   : > { %v703_v21 = vmax.f32 %v671_v10, 0.0  ;;  %v537_v22 = vadd.f32 %v937_v8, %v501_v11  ;;  %v415_v23 = vrot.slane %v300_v7, 1  ;;  %v607_v24 = vmul.f32 %v903_v0, %v571_v9  ;;  %v308_v10 = vld [vmem:[%s927_s12 + $0x138] sm:$0xff]  ;;  %v309_v11 = vld [vmem:[%s927_s12 + $0x140] sm:$0xff] }
  0x35   : > { %v704_v25 = vmax.f32 %v672_v16, 0.0  ;;  %v538_v26 = vadd.f32 %v937_v8, %v502_v17  ;;  %v417_v27 = vrot.slane %v301_v14, 1  ;;  %v608_v28 = vmul.f32 %v903_v0, %v572_v15  ;;  %v577_v16 = vld [vmem:[%s912_s29 + $0xc0] sm:$0xff]  ;;  %v310_v17 = vld [vmem:[%s927_s12 + $0x148] sm:$0xff] }
  0x36   : > { %735 = vst [vmem:[%s978_s17 + $0x70] sm:$0xff] %v703_v21  ;;  %v673_v31 = vadd.f32 %v641_v12, %v537_v22  ;;  %v416_v32 = vsel %vm368_vm0, %v414_v19, %v415_v23  ;;  %v643_v33 = vadd.f32 %v922_v2, %v607_v24  ;;  %v419_v34 = vrot.slane %v302_v20, 1  ;;  %v578_v22 = vld [vmem:[%s912_s29 + $0xc8] sm:$0xff] }
  0x37   : > { %736 = vst [vmem:[%s978_s17 + $0x78] sm:$0xff] %v704_v25  ;;  %v674_v37 = vadd.f32 %v642_v18, %v538_v26  ;;  %v503_v38 = vmul.f32 %v917_v1, %v416_v32  ;;  %v418_v39 = vsel %vm368_vm0, %v415_v23, %v417_v27  ;;  %v644_v40 = vadd.f32 %v922_v2, %v608_v28 }
  0x38   : > { %v705_v42 = vmax.f32 %v673_v31, 0.0  ;;  %v504_v43 = vmul.f32 %v917_v1, %v418_v39  ;;  %v420_v44 = vrot.slane %v303_v29, 1  ;;  %v609_v45 = vmul.f32 %v903_v0, %v573_v30  ;;  %v311_v31 = vld [vmem:[%s927_s12 + $0x150] sm:$0xff] }
  0x39   : > { %v706_v46 = vmax.f32 %v674_v37, 0.0  ;;  %v539_v47 = vadd.f32 %v937_v8, %v503_v38  ;;  %v422_v48 = vrot.slane %v304_v35, 1  ;;  %v610_v49 = vmul.f32 %v903_v0, %v574_v36  ;;  %v312_v36 = vld [vmem:[%s927_s12 + $0x158] sm:$0xff]  ;;  %v579_v37 = vld [vmem:[%s912_s29 + $0xd0] sm:$0xff] }
  0x3a   : > { %737 = vst [vmem:[%s978_s17 + $0x80] sm:$0xff] %v705_v42  ;;  %v540_v52 = vadd.f32 %v937_v8, %v504_v43  ;;  %v421_v53 = vsel %vm368_vm0, %v419_v34, %v420_v44  ;;  %v645_v54 = vadd.f32 %v922_v2, %v609_v45  ;;  %v424_v55 = vrot.slane %v305_v41, 1  ;;  %v313_v42 = vld [vmem:[%s927_s12 + $0x160] sm:$0xff]  ;;  %v580_v43 = vld [vmem:[%s912_s29 + $0xd8] sm:$0xff] }
  0x3b   : > { %738 = vst [vmem:[%s978_s17 + $0x88] sm:$0xff] %v706_v46  ;;  %v675_v58 = vadd.f32 %v643_v33, %v539_v47  ;;  %v505_v59 = vmul.f32 %v917_v1, %v421_v53  ;;  %v423_v60 = vsel %vm368_vm0, %v420_v44, %v422_v48  ;;  %v646_v61 = vadd.f32 %v922_v2, %v610_v49  ;;  %v314_v48 = vld [vmem:[%s927_s12 + $0x168] sm:$0xff] }
  0x3c   : > { %v676_v62 = vadd.f32 %v644_v40, %v540_v52  ;;  %v506_v63 = vmul.f32 %v917_v1, %v423_v60  ;;  %v425_v3 = vrot.slane %v306_v50, 1  ;;  %v611_v4 = vmul.f32 %v903_v0, %v575_v51 }
  0x3d   : > { %v707_v5 = vmax.f32 %v675_v58, 0.0  ;;  %v541_v6 = vadd.f32 %v937_v8, %v505_v59  ;;  %v427_v7 = vrot.slane %v307_v56, 1  ;;  %v612_v9 = vmul.f32 %v903_v0, %v576_v57  ;;  %v315_v57 = vld [vmem:[%s927_s12 + $0x170] sm:$0xff]  ;;  %v581_v58 = vld [vmem:[%s912_s29 + $0xe0] sm:$0xff] }
  0x3e   : > { %v708_v12 = vmax.f32 %v676_v62, 0.0  ;;  %v542_v13 = vadd.f32 %v937_v8, %v506_v63  ;;  %v426_v14 = vsel %vm368_vm0, %v424_v55, %v425_v3  ;;  %v647_v15 = vadd.f32 %v922_v2, %v611_v4  ;;  %v316_v63 = vld [vmem:[%s927_s12 + $0x178] sm:$0xff] }
  0x3f   : > { %739 = vst [vmem:[%s978_s17 + $0x90] sm:$0xff] %v707_v5  ;;  %v677_v18 = vadd.f32 %v645_v54, %v541_v6  ;;  %v507_v19 = vmul.f32 %v917_v1, %v426_v14  ;;  %v428_v20 = vsel %vm368_vm0, %v425_v3, %v427_v7  ;;  %v648_v21 = vadd.f32 %v922_v2, %v612_v9  ;;  %v582_v3 = vld [vmem:[%s912_s29 + $0xe8] sm:$0xff]  ;;  %v317_v9 = vld [vmem:[%s927_s12 + $0x180] sm:$0xff] }
  0x40   : > { %740 = vst [vmem:[%s978_s17 + $0x98] sm:$0xff] %v708_v12  ;;  %v678_v23 = vadd.f32 %v646_v61, %v542_v13  ;;  %v508_v24 = vmul.f32 %v917_v1, %v428_v20  ;;  %v429_v25 = vrot.slane %v308_v10, 1  ;;  %v430_v26 = vrot.slane %v309_v11, 1 }
  0x41   : > { %v709_v27 = vmax.f32 %v677_v18, 0.0  ;;  %v543_v28 = vadd.f32 %v937_v8, %v507_v19  ;;  %v613_v29 = vmul.f32 %v903_v0, %v577_v16  ;;  %v432_v30 = vrot.slane %v310_v17, 1  ;;  %v318_v18 = vld [vmem:[%s927_s12 + $0x188] sm:$0xff]  ;;  %v583_v19 = vld [vmem:[%s912_s29 + $0xf0] sm:$0xff] }
  0x42   : > { %v710_v32 = vmax.f32 %v678_v23, 0.0  ;;  %v544_v33 = vadd.f32 %v937_v8, %v508_v24  ;;  %v431_v34 = vsel %vm368_vm0, %v429_v25, %v430_v26  ;;  %v614_v35 = vmul.f32 %v903_v0, %v578_v22  ;;  %v319_v24 = vld [vmem:[%s927_s12 + $0x190] sm:$0xff]  ;;  %v584_v25 = vld [vmem:[%s912_s29 + $0xf8] sm:$0xff] }
  0x43   : > { %741 = vst [vmem:[%s978_s17 + $0xa0] sm:$0xff] %v709_v27  ;;  %v679_v38 = vadd.f32 %v647_v15, %v543_v28  ;;  %v509_v39 = vmul.f32 %v917_v1, %v431_v34  ;;  %v649_v40 = vadd.f32 %v922_v2, %v613_v29  ;;  %v433_v41 = vsel %vm368_vm0, %v430_v26, %v432_v30 }
  0x44   : > { %742 = vst [vmem:[%s978_s17 + $0xa8] sm:$0xff] %v710_v32  ;;  %v680_v44 = vadd.f32 %v648_v21, %v544_v33  ;;  %v510_v45 = vmul.f32 %v917_v1, %v433_v41  ;;  %v650_v46 = vadd.f32 %v922_v2, %v614_v35  ;;  %v434_v47 = vrot.slane %v311_v31, 1 }
  0x45   : > { %v711_v49 = vmax.f32 %v679_v38, 0.0  ;;  %v545_v50 = vadd.f32 %v937_v8, %v509_v39  ;;  %v435_v51 = vrot.slane %v312_v36, 1  ;;  %v615_v52 = vmul.f32 %v903_v0, %v579_v37 }
  0x46   : > { %v712_v53 = vmax.f32 %v680_v44, 0.0  ;;  %v546_v54 = vadd.f32 %v937_v8, %v510_v45  ;;  %v437_v55 = vrot.slane %v313_v42, 1  ;;  %v616_v56 = vmul.f32 %v903_v0, %v580_v43 }
  0x47   : > { %743 = vst [vmem:[%s978_s17 + $0xb0] sm:$0xff] %v711_v49  ;;  %v681_v59 = vadd.f32 %v649_v40, %v545_v50  ;;  %v436_v60 = vsel %vm368_vm0, %v434_v47, %v435_v51  ;;  %v651_v61 = vadd.f32 %v922_v2, %v615_v52  ;;  %v439_v62 = vrot.slane %v314_v48, 1 }
  0x48   : > { %744 = vst [vmem:[%s978_s17 + $0xb8] sm:$0xff] %v712_v53  ;;  %v682_v4 = vadd.f32 %v650_v46, %v546_v54  ;;  %v511_v5 = vmul.f32 %v917_v1, %v436_v60  ;;  %v438_v6 = vsel %vm368_vm0, %v435_v51, %v437_v55  ;;  %v652_v7 = vadd.f32 %v922_v2, %v616_v56 }
  0x49   : > { %v713_v10 = vmax.f32 %v681_v59, 0.0  ;;  %v512_v11 = vmul.f32 %v917_v1, %v438_v6  ;;  %v440_v12 = vrot.slane %v315_v57, 1  ;;  %v617_v13 = vmul.f32 %v903_v0, %v581_v58 }
  0x4a   : > { %v714_v14 = vmax.f32 %v682_v4, 0.0  ;;  %v547_v15 = vadd.f32 %v937_v8, %v511_v5  ;;  %v442_v16 = vrot.slane %v316_v63, 1  ;;  %v618_v17 = vmul.f32 %v903_v0, %v582_v3 }
  0x4b   : > { %745 = vst [vmem:[%s978_s17 + $0xc0] sm:$0xff] %v713_v10  ;;  %v548_v20 = vadd.f32 %v937_v8, %v512_v11  ;;  %v441_v21 = vsel %vm368_vm0, %v439_v62, %v440_v12  ;;  %v653_v22 = vadd.f32 %v922_v2, %v617_v13  ;;  %v444_v23 = vrot.slane %v317_v9, 1 }
  0x4c   : > { %746 = vst [vmem:[%s978_s17 + $0xc8] sm:$0xff] %v714_v14  ;;  %v683_v26 = vadd.f32 %v651_v61, %v547_v15  ;;  %v513_v27 = vmul.f32 %v917_v1, %v441_v21  ;;  %v443_v28 = vsel %vm368_vm0, %v440_v12, %v442_v16  ;;  %v654_v29 = vadd.f32 %v922_v2, %v618_v17 }
  0x4d   : > { %v684_v30 = vadd.f32 %v652_v7, %v548_v20  ;;  %v514_v31 = vmul.f32 %v917_v1, %v443_v28  ;;  %v445_v32 = vrot.slane %v318_v18, 1  ;;  %v619_v33 = vmul.f32 %v903_v0, %v583_v19 }
  0x4e   : > { %v715_v34 = vmax.f32 %v683_v26, 0.0  ;;  %v549_v35 = vadd.f32 %v937_v8, %v513_v27  ;;  %v447_v36 = vrot.slane %v319_v24, 1  ;;  %v620_v37 = vmul.f32 %v903_v0, %v584_v25 }
  0x4f   : > { %v716_v38 = vmax.f32 %v684_v30, 0.0  ;;  %v550_v39 = vadd.f32 %v937_v8, %v514_v31  ;;  %v446_v40 = vsel %vm368_vm0, %v444_v23, %v445_v32  ;;  %v655_v43 = vadd.f32 %v922_v2, %v619_v33 }
  0x50   : > { %747 = vst [vmem:[%s978_s17 + $0xd0] sm:$0xff] %v715_v34  ;;  %v685_v41 = vadd.f32 %v653_v22, %v549_v35  ;;  %v515_v42 = vmul.f32 %v917_v1, %v446_v40  ;;  %v448_v44 = vsel %vm368_vm0, %v445_v32, %v447_v36  ;;  %v656_v46 = vadd.f32 %v922_v2, %v620_v37 }
  0x51   : > { %748 = vst [vmem:[%s978_s17 + $0xd8] sm:$0xff] %v716_v38  ;;  %v686_v45 = vadd.f32 %v654_v29, %v550_v39  ;;  %v516_v0 = vmul.f32 %v917_v1, %v448_v44 }
  0x52   : > { %v717_v47 = vmax.f32 %v685_v41, 0.0  ;;  %v551_v48 = vadd.f32 %v937_v8, %v515_v42 }
  0x53   : > { %v718_v49 = vmax.f32 %v686_v45, 0.0  ;;  %v552_v50 = vadd.f32 %v937_v8, %v516_v0 }
  0x54   : > { %749 = vst [vmem:[%s978_s17 + $0xe0] sm:$0xff] %v717_v47  ;;  %v687_v51 = vadd.f32 %v655_v43, %v551_v48 }
  0x55   : > { %750 = vst [vmem:[%s978_s17 + $0xe8] sm:$0xff] %v718_v49  ;;  %v688_v52 = vadd.f32 %v656_v46, %v552_v50 }
  0x56   : > { %v719_v53 = vmax.f32 %v687_v51, 0.0 }
  0x57   : > { %v720_v54 = vmax.f32 %v688_v52, 0.0 }
  0x58   : > { %751 = vst [vmem:[%s978_s17 + $0xf0] sm:$0xff] %v719_v53 }
  0x59   : > { %752 = vst [vmem:[%s978_s17 + $0xf8] sm:$0xff] %v720_v54 }
  0x5a PF: > { %s16_s21 = sadd.s32 1, %s853_s21  }
  0x5b   : > { %p13_p4 = scmp.ge.s32.totalorder %s16_s21, 4  }
  0x5d   :  { %15 = sbr.rel (!%p13_p4) target bundleno = 1 (0x1), region = 77 }

// kernel: basic_block_forward.3
= control target key start
LH: loop header
LB: loop body
LE: loop exit
PB: predicated region body
PF: predicated region fallthrough
CT: control target
= control target key end

     0   :  { %s3088_s24 = smov 0   ;;  %s3750_s0 = inlined_call_operand.vmem [shape: bf16[2,20,24,12], index: 0, kind: input, shape index: {}]   ;;  %s3751_s1 = inlined_call_operand.vmem [shape: bf16[3,12,128], index: 1, kind: input, shape index: {}]   ;;  %s3752_s2 = inlined_call_operand.vmem [shape: bf16[12,128], index: 2, kind: input, shape index: {}]   ;;  %s3753_s3 = inlined_call_operand.vmem [shape: f32[432,1], index: 3, kind: input, shape index: {}]   ;;  %s3754_s4 = inlined_call_operand.vmem [shape: f32[2,432,128], index: 4, kind: output, shape index: {0}]   ;;  %s3755_s5 = inlined_call_operand.vmem [shape: f32[2,2,128], index: 5, kind: output, shape index: {1}]   ;;  %s3756_s6 = inlined_call_operand.vmem [shape: f32[2,432,128], index: 6, kind: output, shape index: {2}]   ;;  %s3757_s7 = inlined_call_operand.vmem [shape: f32[2,2,128], index: 7, kind: output, shape index: {3}]  }
   0x1 LB: > { %s2542_s25 = sadd.s32 4294967295, %s3045_s24   ;;  %p2546_p0 = scmp.ge.s32.totalorder %s3045_s24, 1  ;;  %s3045_s24 = sphi %s3088_s24, %s18_s24  }
   0x2   : > { %p244_p1 = scmp.lt.s32.totalorder %s3045_s24, 3 }
   0x4   : > { %p245_p2 = pnand %p2546_p0, %p244_p1 }
   0x5   : > { %p289_p3 = scmp.lt.s32.totalorder (!%p245_p2), %s2542_s25, 1 }
   0x6   : > { %248 = sbr.rel (%p245_p2) target bundleno = 597 (0x255), region = 36 }
   0xb   : > { %vm600_vm0 = vcmask 1045504   ;;  %v2659_v0 = vld [vmem:[%s3751_s1 + $0x10] sm:$0xf]  ;;  %v2695_v1 = vld [vmem:[%s3751_s1 + $0x10] sm:$0x30]  ;;  %s3759_s25 = smov (!%p289_p3, %s2542_s25), 1 }
   0xc   : > { %v2660_v2 = vor.u32 %v2695_v1, %v2659_v0  ;;  %v2556_v3 = vld [vmem:[%s3751_s1 + $0x8] sm:$0xf]  ;;  %v2693_v4 = vld [vmem:[%s3751_s1 + $0x8] sm:$0x30]  ;;  %v2591_v5 = vld [vmem:[%s3751_s1] sm:$0xf] }
   0xd   : > { %v2557_v6 = vor.u32 %v2693_v4, %v2556_v3  ;;  %v2692_v7 = vld [vmem:[%s3751_s1] sm:$0x30]  ;;  %v2622_v8 = vld [vmem:[%s3752_s2] sm:$0xf]  ;;  %s3025_s21 = smul.u32 240, %s3759_s25  ;;  %v3047_v17 = vmov 0  }
   0xe   : > { %v2694_v9 = vld [vmem:[%s3752_s2] sm:$0x30]  ;;  %v1195_v10 = vsel %vm600_vm0, %v2660_v2, 0  ;;  %v2592_v11 = vor.u32 %v2692_v7, %v2591_v5  ;;  %3036 = vset.pattern.permute.xlu0 %v3047_v17  ;;  %vm518_vm1 = vcmask 97280   ;;  %3037 = vset.pattern.permute.xlu1 %v3047_v17  ;;  %v1451_v21 = vld [vmem:[%s3753_s3 + $0x10] sm:$0xff]  ;;  %v1450_v22 = vld [vmem:[%s3753_s3 + $0x8] sm:$0xff] }
   0xf   : > { %v2623_v12 = vor.u32 %v2694_v9, %v2622_v8  ;;  %1204 = vmatpush.bf16.msra.mxu3 %v1195_v10  ;;  %v602_v13 = vsel %vm600_vm0, %v2557_v6, 0  ;;  %v1449_v14 = vld [vmem:[%s3753_s3] sm:$0xff]  ;;  %s3133_s26 = scalar_lea.vmem %s3750_s0, %s3025_s21  ;;  %3038 = vset.pattern.permute.xlu2 %v3047_v17  ;;  %v1452_v23 = vld [vmem:[%s3753_s3 + $0x18] sm:$0xff]  ;;  %v1455_v30 = vld [vmem:[%s3753_s3 + $0x30] sm:$0xff]  ;;  %s3026_s16 = smul.u32 432, %s3759_s25  ;;  %vm2053_vm2 = vcmask 1040384  }
  0x10   : > { %611 = vmatpush.bf16.msra.mxu0 %v602_v13  ;;  %v868_v15 = vsel %vm600_vm0, %v2592_v11, 0  ;;  %1505 = vperm.xlu0 %3036, %v1449_v14   ;;  %v2810_v18 = vld [vmem:[%s3133_s26 + $0x18] sm:$0xff]   ;;  %v2973_v19 = vld [vmem:[%s3133_s26 + $0xc] sm:$0xff]   ;;  %v2690_v20 = vld [vmem:[%s3133_s26] sm:$0xff] }
  0x11   : > { %v1022_v16 = vsel %vm600_vm0, %v2623_v12, 0  ;;  %877 = vmatpush.bf16.msra.mxu1 %v868_v15  ;;  %1515 = vperm.xlu1 %3037, %v1451_v21   ;;  %v2811_v24 = vld [vmem:[%s3133_s26 + $0x20] sm:$0xff]   ;;  %v2975_v25 = vld [vmem:[%s3133_s26 + $0x14] sm:$0xff]   ;;  %v2808_v26 = vld [vmem:[%s3133_s26 + $0x8] sm:$0xff]   ;;  %s3256_s21 = scalar_lea.vmem %s3754_s4, %s3026_s16  ;;  %s3261_s27 = scalar_lea.vmem %s3756_s6, %s3026_s16 }
  0x12   : > { %1031 = vmatpush.bf16.msra.mxu2 %v1022_v16  ;;  %2661 = vmatmul.msk.bf16.vlgmr.msra.gmra.mxu3 %vm518_vm1, %v2810_v18  ;;  %v2812_v27 = vld [vmem:[%s3133_s26 + $0x28] sm:$0xff]   ;;  %v2977_v28 = vld [vmem:[%s3133_s26 + $0x1c] sm:$0xff]   ;;  %v2809_v29 = vld [vmem:[%s3133_s26 + $0x10] sm:$0xff]  }
  0x13   : > { %2558 = vmatmul.msk.bf16.vlgmr.msra.gmra.mxu0 %vm518_vm1, %v2973_v19  ;;  %v1453_v31 = vld [vmem:[%s3753_s3 + $0x20] sm:$0xff]  ;;  %v1456_v32 = vld [vmem:[%s3753_s3 + $0x38] sm:$0xff]  ;;  %v2813_v33 = vld [vmem:[%s3133_s26 + $0x30] sm:$0xff]  }
  0x14   : > { %2593 = vmatmul.msk.bf16.vlgmr.msra.gmra.mxu1 %vm518_vm1, %v2690_v20  ;;  %1525 = vperm.xlu2 %3038, %v1453_v31   ;;  %v2979_v34 = vld [vmem:[%s3133_s26 + $0x24] sm:$0xff]   ;;  %v2814_v37 = vld [vmem:[%s3133_s26 + $0x38] sm:$0xff]   ;;  %v2981_v38 = vld [vmem:[%s3133_s26 + $0x2c] sm:$0xff]  }
  0x15   : > { %2624 = vmatmul.msk.bf16.vlgmr.msra.gmra.mxu2 %vm518_vm1, %v2973_v19  ;;  %v1454_v35 = vld [vmem:[%s3753_s3 + $0x28] sm:$0xff]  ;;  %v1459_v39 = vld [vmem:[%s3753_s3 + $0x50] sm:$0xff]  ;;  %v1457_v40 = vld [vmem:[%s3753_s3 + $0x40] sm:$0xff] }
  0x16   : > { %v1458_v36 = vld [vmem:[%s3753_s3 + $0x48] sm:$0xff]  ;;  %v2815_v41 = vld [vmem:[%s3133_s26 + $0x40] sm:$0xff]   ;;  %v2983_v42 = vld [vmem:[%s3133_s26 + $0x34] sm:$0xff]  }
  0x17   : > { %v1461_v43 = vld [vmem:[%s3753_s3 + $0x60] sm:$0xff]  ;;  %v1462_v44 = vld [vmem:[%s3753_s3 + $0x68] sm:$0xff]  ;;  %v1460_v47 = vld [vmem:[%s3753_s3 + $0x58] sm:$0xff] }
  0x18   : > { %1510 = vperm.xlu0 %3036, %v1450_v22   ;;  %v3211_v45 = vld [vmem:[%s3133_s26 + $0x48] sm:$0xff]   ;;  %v2985_v46 = vld [vmem:[%s3133_s26 + $0x3c] sm:$0xff]   ;;  %v3226_v49 = vld [vmem:[%s3133_s26 + $0x50] sm:$0xff]  }
  0x19   : > { %1520 = vperm.xlu1 %3037, %v1452_v23   ;;  %v1464_v48 = vld [vmem:[%s3753_s3 + $0x78] sm:$0xff]  ;;  %v2987_v50 = vld [vmem:[%s3133_s26 + $0x44] sm:$0xff]   ;;  %v1463_v52 = vld [vmem:[%s3753_s3 + $0x70] sm:$0xff] }
  0x1a   : > { %v1465_v51 = vld [vmem:[%s3753_s3 + $0x80] sm:$0xff]  ;;  %v3241_v53 = vld [vmem:[%s3133_s26 + $0x58] sm:$0xff]   ;;  %v2989_v54 = vld [vmem:[%s3133_s26 + $0x4c] sm:$0xff]  }
  0x1b   : > { %v1467_v59 = vld [vmem:[%s3753_s3 + $0x90] sm:$0xff]  ;;  %v1468_v2 = vld [vmem:[%s3753_s3 + $0x98] sm:$0xff]  ;;  %v3269_v11 = vld [vmem:[%s3133_s26 + $0x60] sm:$0xff]  }
  0x1c   : > { %1530 = vperm.xlu2 %3038, %v1454_v35   ;;  %v2991_v12 = vld [vmem:[%s3133_s26 + $0x54] sm:$0xff]  }
  0x20   : > { %1535 = vperm.xlu0 %3036, %v1455_v30  }
  0x21   : > { %1540 = vperm.xlu1 %3037, %v1456_v32  }
  0x22   : > { %2662 = vmatmul.msk.bf16.gmra.mxu3 %vm518_vm1, %v2811_v24 }
  0x23   : > { %2559 = vmatmul.msk.bf16.gmra.mxu0 %vm518_vm1, %v2975_v25 }
  0x24   : > { %2594 = vmatmul.msk.bf16.gmra.mxu1 %vm518_vm1, %v2808_v26  ;;  %1545 = vperm.xlu2 %3038, %v1457_v40  }
  0x25   : > { %2625 = vmatmul.msk.bf16.gmra.mxu2 %vm518_vm1, %v2975_v25 }
  0x28   : > { %1550 = vperm.xlu0 %3036, %v1458_v36  }
  0x29   : > { %1555 = vperm.xlu1 %3037, %v1459_v39  }
  0x2c   : > { %1560 = vperm.xlu2 %3038, %v1460_v47  }
  0x30   : > { %1565 = vperm.xlu0 %3036, %v1461_v43  }
  0x31   : > { %1570 = vperm.xlu1 %3037, %v1462_v44  }
  0x32   : > { %2663 = vmatmul.msk.bf16.gmra.mxu3 %vm518_vm1, %v2812_v27 }
  0x33   : > { %2560 = vmatmul.msk.bf16.gmra.mxu0 %vm518_vm1, %v2977_v28 }
  0x34   : > { %2595 = vmatmul.msk.bf16.gmra.mxu1 %vm518_vm1, %v2809_v29  ;;  %1575 = vperm.xlu2 %3038, %v1463_v52   ;;  %v1466_v29 = vld [vmem:[%s3753_s3 + $0x88] sm:$0xff] }
  0x35   : > { %2626 = vmatmul.msk.bf16.gmra.mxu2 %vm518_vm1, %v2977_v28  ;;  %v3289_v52 = vld [vmem:[%s3133_s26 + $0x68] sm:$0xff]  }
  0x38   : > { %1580 = vperm.xlu0 %3036, %v1464_v48  }
  0x39   : > { %1585 = vperm.xlu1 %3037, %v1465_v51  }
  0x3c   : > { %1590 = vperm.xlu2 %3038, %v1466_v29  }
  0x40   : > { %1595 = vperm.xlu0 %3036, %v1467_v59  }
  0x41   : > { %1600 = vperm.xlu1 %3037, %v1468_v2  }
  0x42   : > { %2664 = vmatmul.msk.bf16.gmra.mxu3 %vm518_vm1, %v2813_v33 }
  0x43   : > { %2561 = vmatmul.msk.bf16.gmra.mxu0 %vm518_vm1, %v2979_v34 }
  0x44   : > { %2596 = vmatmul.msk.bf16.gmra.mxu1 %vm518_vm1, %v2810_v18 }
  0x45   : > { %2627 = vmatmul.msk.bf16.gmra.mxu2 %vm518_vm1, %v2979_v34 }
  0x52   : > { %2665 = vmatmul.msk.bf16.gmra.mxu3 %vm518_vm1, %v2814_v37 }
  0x53   : > { %2562 = vmatmul.msk.bf16.gmra.mxu0 %vm518_vm1, %v2981_v38 }
  0x54   : > { %2597 = vmatmul.msk.bf16.gmra.mxu1 %vm518_vm1, %v2811_v24 }
  0x55   : > { %2628 = vmatmul.msk.bf16.gmra.mxu2 %vm518_vm1, %v2981_v38 }
  0x62   : > { %2666 = vmatmul.msk.bf16.gmra.mxu3 %vm518_vm1, %v2815_v41 }
  0x63   : > { %2563 = vmatmul.msk.bf16.gmra.mxu0 %vm518_vm1, %v2983_v42 }
  0x64   : > { %2598 = vmatmul.msk.bf16.gmra.mxu1 %vm518_vm1, %v2812_v27 }
  0x65   : > { %2629 = vmatmul.msk.bf16.gmra.mxu2 %vm518_vm1, %v2983_v42 }
  0x6e   : > { %v1526_v2 = vpop.permute.xlu2 %1525 }
  0x72   : > { %2667 = vmatmul.msk.bf16.gmra.mxu3 %vm518_vm1, %v3211_v45 }
  0x73   : > { %2564 = vmatmul.msk.bf16.gmra.mxu0 %vm518_vm1, %v2985_v46 }
  0x74   : > { %2599 = vmatmul.msk.bf16.gmra.mxu1 %vm518_vm1, %v2813_v33 }
  0x75   : > { %2630 = vmatmul.msk.bf16.gmra.mxu2 %vm518_vm1, %v2985_v46  ;;  %v1470_v46 = vld [vmem:[%s3753_s3 + $0xa8] sm:$0xff] }
  0x76   : > { %1610 = vperm.xlu0 %3036, %v1470_v46  }
  0x82   : > { %2668 = vmatmul.msk.bf16.gmra.mxu3 %vm518_vm1, %v3226_v49  ;;  %v1506_v58 = vpop.permute.xlu0 %1505 }
  0x83   : > { %2565 = vmatmul.msk.bf16.gmra.mxu0 %vm518_vm1, %v2987_v50  ;;  %v1516_v26 = vpop.permute.xlu1 %1515 }
  0x84   : > { %2600 = vmatmul.msk.bf16.gmra.mxu1 %vm518_vm1, %v2814_v37 }
  0x85   : > { %2631 = vmatmul.msk.bf16.gmra.mxu2 %vm518_vm1, %v2987_v50 }
  0x8a   : > { %v1511_v6 = vpop.permute.xlu0 %1510 }
  0x8b   : > { %v1521_v48 = vpop.permute.xlu1 %1520 }
  0x90   : > { %v613_v55 = vpop.f32.mrf.mxu0 }
  0x91   : > { %v879_v56 = vpop.f32.mrf.mxu1 }
  0x92   : > { %v880_v57 = vadd.f32 %v879_v56, %v613_v55  ;;  %2669 = vmatmul.msk.bf16.gmra.mxu3 %vm518_vm1, %v3241_v53 }
  0x93   : > { %2566 = vmatmul.msk.bf16.gmra.mxu0 %vm518_vm1, %v2989_v54 }
  0x94   : > { %2601 = vmatmul.msk.bf16.gmra.mxu1 %vm518_vm1, %v2815_v41 }
  0x95   : > { %2632 = vmatmul.msk.bf16.gmra.mxu2 %vm518_vm1, %v2989_v54  ;;  %v1206_v60 = vpop.f32.mrf.mxu3  ;;  %v2993_v54 = vld [vmem:[%s3133_s26 + $0x5c] sm:$0xff]  }
  0x96   : > { %v1341_v61 = vadd.f32 %v1206_v60, %v880_v57 }
  0x98   : > { %v1033_v62 = vpop.f32.mrf.mxu2  ;;  %1395 = vst [vmem:[%s3256_s21] sm:$0xff] %v1341_v61  ;;  %v615_v63 = vpop.f32.mrf.mxu0  ;;  %v1886_v3 = vmul.f32 %v1341_v61, %v1341_v61  ;;  %v1773_v8 = vmul.f32 %v1506_v58, %v1341_v61 }
  0x99   : > { %v881_v0 = vpop.f32.mrf.mxu1  ;;  %2056 = vst [vmem:[%s3261_s27] sm:$0xff] %v1033_v62  ;;  %v2223_v4 = vmul.f32 %v1033_v62, %v1033_v62  ;;  %v2110_v9 = vmul.f32 %v1506_v58, %v1033_v62 }
  0x9a   : > { %v882_v1 = vadd.f32 %v881_v0, %v615_v63  ;;  %v1940_v19 = vmul.f32 %v1886_v3, %v1506_v58 }
  0x9b   : > { %v2277_v20 = vmul.f32 %v2223_v4, %v1506_v58 }
  0x9d   : > { %v1208_v5 = vpop.f32.mrf.mxu3 }
  0x9e   : > { %v1342_v7 = vadd.f32 %v1208_v5, %v882_v1  ;;  %v1471_v5 = vld [vmem:[%s3753_s3 + $0xb0] sm:$0xff] }
  0x9f   : > { %1615 = vperm.xlu1 %3037, %v1471_v5  }
  0xa0   : > { %v1035_v10 = vpop.f32.mrf.mxu2  ;;  %1396 = vst [vmem:[%s3256_s21 + $0x8] sm:$0xff] %v1342_v7  ;;  %v1887_v13 = vmul.f32 %v1342_v7, %v1342_v7  ;;  %v1774_v14 = vmul.f32 %v1511_v6, %v1342_v7  ;;  %v618_v17 = vpop.f32.mrf.mxu0 }
  0xa1   : > { %v2111_v15 = vmul.f32 %v1511_v6, %v1035_v10  ;;  %v2224_v16 = vmul.f32 %v1035_v10, %v1035_v10  ;;  %v884_v18 = vpop.f32.mrf.mxu1  ;;  %2057 = vst [vmem:[%s3261_s27 + $0x8] sm:$0xff] %v1035_v10 }
  0xa2   : > { %v885_v21 = vadd.f32 %v884_v18, %v618_v17  ;;  %v1827_v22 = vadd.f32 %v1774_v14, %v1773_v8  ;;  %v1941_v23 = vmul.f32 %v1887_v13, %v1511_v6  ;;  %2670 = vmatmul.msk.bf16.gmra.mxu3 %vm518_vm1, %v3269_v11 }
  0xa3   : > { %v2164_v24 = vadd.f32 %v2111_v15, %v2110_v9  ;;  %v2278_v25 = vmul.f32 %v2224_v16, %v1511_v6  ;;  %2567 = vmatmul.msk.bf16.gmra.mxu0 %vm518_vm1, %v2991_v12 }
  0xa4   : > { %2602 = vmatmul.msk.bf16.gmra.mxu1 %vm518_vm1, %v3211_v45  ;;  %v1994_v27 = vadd.f32 %v1941_v23, %v1940_v19 }
  0xa5   : > { %v2331_v28 = vadd.f32 %v2278_v25, %v2277_v20  ;;  %2633 = vmatmul.msk.bf16.gmra.mxu2 %vm518_vm1, %v2991_v12  ;;  %v1211_v30 = vpop.f32.mrf.mxu3 }
  0xa6   : > { %v1343_v31 = vadd.f32 %v1211_v30, %v885_v21 }
  0xa8   : > { %v1038_v32 = vpop.f32.mrf.mxu2  ;;  %1397 = vst [vmem:[%s3256_s21 + $0x10] sm:$0xff] %v1343_v31  ;;  %v1888_v33 = vmul.f32 %v1343_v31, %v1343_v31  ;;  %v1775_v34 = vmul.f32 %v1516_v26, %v1343_v31  ;;  %v620_v37 = vpop.f32.mrf.mxu0 }
  0xa9   : > { %v2112_v35 = vmul.f32 %v1516_v26, %v1038_v32  ;;  %v2225_v36 = vmul.f32 %v1038_v32, %v1038_v32  ;;  %v886_v38 = vpop.f32.mrf.mxu1  ;;  %2058 = vst [vmem:[%s3261_s27 + $0x10] sm:$0xff] %v1038_v32 }
  0xaa   : > { %v1828_v39 = vadd.f32 %v1827_v22, %v1775_v34  ;;  %v1942_v40 = vmul.f32 %v1888_v33, %v1516_v26  ;;  %v887_v45 = vadd.f32 %v886_v38, %v620_v37  ;;  %v1469_v22 = vld [vmem:[%s3753_s3 + $0xa0] sm:$0xff] }
  0xab   : > { %v2165_v41 = vadd.f32 %v2164_v24, %v2112_v35  ;;  %v2279_v42 = vmul.f32 %v2225_v36, %v1516_v26  ;;  %v1531_v24 = vpop.permute.xlu2 %1530  ;;  %1605 = vperm.xlu2 %3038, %v1469_v22  }
  0xac   : > { %v1995_v43 = vadd.f32 %v1994_v27, %v1942_v40  ;;  %v3309_v27 = vld [vmem:[%s3133_s26 + $0x70] sm:$0xff]  }
  0xad   : > { %v2332_v44 = vadd.f32 %v2331_v28, %v2279_v42  ;;  %v1213_v47 = vpop.f32.mrf.mxu3  ;;  %v2995_v28 = vld [vmem:[%s3133_s26 + $0x64] sm:$0xff]  }
  0xae   : > { %v1344_v50 = vadd.f32 %v1213_v47, %v887_v45  ;;  %v1473_v42 = vld [vmem:[%s3753_s3 + $0xc0] sm:$0xff] }
  0xaf   : > { %1625 = vperm.xlu0 %3036, %v1473_v42   ;;  %v2999_v42 = vld [vmem:[%s3133_s26 + $0x74] sm:$0xff]  }
  0xb0   : > { %v1040_v51 = vpop.f32.mrf.mxu2  ;;  %1398 = vst [vmem:[%s3256_s21 + $0x18] sm:$0xff] %v1344_v50  ;;  %v1889_v55 = vmul.f32 %v1344_v50, %v1344_v50  ;;  %v1776_v56 = vmul.f32 %v1521_v48, %v1344_v50  ;;  %v623_v59 = vpop.f32.mrf.mxu0 }
  0xb1   : > { %v2113_v57 = vmul.f32 %v1521_v48, %v1040_v51  ;;  %v2226_v58 = vmul.f32 %v1040_v51, %v1040_v51  ;;  %v889_v60 = vpop.f32.mrf.mxu1  ;;  %2059 = vst [vmem:[%s3261_s27 + $0x18] sm:$0xff] %v1040_v51 }
  0xb2   : > { %v890_v61 = vadd.f32 %v889_v60, %v623_v59  ;;  %v1829_v62 = vadd.f32 %v1828_v39, %v1776_v56  ;;  %v1943_v63 = vmul.f32 %v1889_v55, %v1521_v48  ;;  %2671 = vmatmul.msk.bf16.gmra.mxu3 %vm518_vm1, %v3289_v52 }
  0xb3   : > { %v2166_v0 = vadd.f32 %v2165_v41, %v2113_v57  ;;  %v2280_v1 = vmul.f32 %v2226_v58, %v1521_v48  ;;  %2568 = vmatmul.msk.bf16.gmra.mxu0 %vm518_vm1, %v2993_v54 }
  0xb4   : > { %2603 = vmatmul.msk.bf16.gmra.mxu1 %vm518_vm1, %v3226_v49  ;;  %v1996_v3 = vadd.f32 %v1995_v43, %v1943_v63 }
  0xb5   : > { %v2333_v4 = vadd.f32 %v2332_v44, %v2280_v1  ;;  %2634 = vmatmul.msk.bf16.gmra.mxu2 %vm518_vm1, %v2993_v54  ;;  %v1216_v6 = vpop.f32.mrf.mxu3  ;;  %v1536_v44 = vpop.permute.xlu0 %1535 }
  0xb6   : > { %v1345_v7 = vadd.f32 %v1216_v6, %v890_v61 }
  0xb8   : > { %v1043_v8 = vpop.f32.mrf.mxu2  ;;  %1399 = vst [vmem:[%s3256_s21 + $0x20] sm:$0xff] %v1345_v7  ;;  %v1890_v9 = vmul.f32 %v1345_v7, %v1345_v7  ;;  %v1777_v10 = vmul.f32 %v1526_v2, %v1345_v7  ;;  %v625_v49 = vpop.f32.mrf.mxu0 }
  0xb9   : > { %v2114_v12 = vmul.f32 %v1526_v2, %v1043_v8  ;;  %v2227_v13 = vmul.f32 %v1043_v8, %v1043_v8  ;;  %v891_v14 = vpop.f32.mrf.mxu1  ;;  %2060 = vst [vmem:[%s3261_s27 + $0x20] sm:$0xff] %v1043_v8 }
  0xba   : > { %v1830_v15 = vadd.f32 %v1829_v62, %v1777_v10  ;;  %v1944_v16 = vmul.f32 %v1890_v9, %v1526_v2  ;;  %v892_v21 = vadd.f32 %v891_v14, %v625_v49  ;;  %v1474_v62 = vld [vmem:[%s3753_s3 + $0xc8] sm:$0xff] }
  0xbb   : > { %v2167_v17 = vadd.f32 %v2166_v0, %v2114_v12  ;;  %v2281_v18 = vmul.f32 %v2227_v13, %v1526_v2  ;;  %v1541_v0 = vpop.permute.xlu1 %1540  ;;  %1630 = vperm.xlu1 %3037, %v1474_v62  }
  0xbc   : > { %v1997_v19 = vadd.f32 %v1996_v3, %v1944_v16  ;;  %v3329_v3 = vld [vmem:[%s3133_s26 + $0x78] sm:$0xff]  }
  0xbd   : > { %v2334_v20 = vadd.f32 %v2333_v4, %v2281_v18  ;;  %v1218_v23 = vpop.f32.mrf.mxu3  ;;  %v2997_v4 = vld [vmem:[%s3133_s26 + $0x6c] sm:$0xff]   ;;  %v1472_v18 = vld [vmem:[%s3753_s3 + $0xb8] sm:$0xff] }
  0xbe   : > { %v1346_v25 = vadd.f32 %v1218_v23, %v892_v21  ;;  %1620 = vperm.xlu2 %3038, %v1472_v18  }
  0xc0   : > { %v1045_v26 = vpop.f32.mrf.mxu2  ;;  %1400 = vst [vmem:[%s3256_s21 + $0x28] sm:$0xff] %v1346_v25  ;;  %v1891_v29 = vmul.f32 %v1346_v25, %v1346_v25  ;;  %v1778_v30 = vmul.f32 %v1531_v24, %v1346_v25  ;;  %v628_v33 = vpop.f32.mrf.mxu0 }
  0xc1   : > { %v2115_v31 = vmul.f32 %v1531_v24, %v1045_v26  ;;  %v2228_v32 = vmul.f32 %v1045_v26, %v1045_v26  ;;  %v894_v34 = vpop.f32.mrf.mxu1  ;;  %2061 = vst [vmem:[%s3261_s27 + $0x28] sm:$0xff] %v1045_v26 }
  0xc2   : > { %v895_v35 = vadd.f32 %v894_v34, %v628_v33  ;;  %v1831_v36 = vadd.f32 %v1830_v15, %v1778_v30  ;;  %v1945_v37 = vmul.f32 %v1891_v29, %v1531_v24  ;;  %2672 = vmatmul.msk.bf16.gmra.mxu3 %vm518_vm1, %v3309_v27 }
  0xc3   : > { %v2168_v38 = vadd.f32 %v2167_v17, %v2115_v31  ;;  %v2282_v39 = vmul.f32 %v2228_v32, %v1531_v24  ;;  %2569 = vmatmul.msk.bf16.gmra.mxu0 %vm518_vm1, %v2995_v28 }
  0xc4   : > { %2604 = vmatmul.msk.bf16.gmra.mxu1 %vm518_vm1, %v3241_v53  ;;  %v1998_v40 = vadd.f32 %v1997_v19, %v1945_v37 }
  0xc5   : > { %v2335_v41 = vadd.f32 %v2334_v20, %v2282_v39  ;;  %2635 = vmatmul.msk.bf16.gmra.mxu2 %vm518_vm1, %v2995_v28  ;;  %v1221_v43 = vpop.f32.mrf.mxu3  ;;  %v1546_v20 = vpop.permute.xlu2 %1545 }
  0xc6   : > { %v1347_v45 = vadd.f32 %v1221_v43, %v895_v35 }
  0xc8   : > { %v1048_v46 = vpop.f32.mrf.mxu2  ;;  %1401 = vst [vmem:[%s3256_s21 + $0x30] sm:$0xff] %v1347_v45  ;;  %v1892_v47 = vmul.f32 %v1347_v45, %v1347_v45  ;;  %v1779_v48 = vmul.f32 %v1536_v44, %v1347_v45  ;;  %v630_v53 = vpop.f32.mrf.mxu0 }
  0xc9   : > { %v2116_v50 = vmul.f32 %v1536_v44, %v1048_v46  ;;  %v2229_v51 = vmul.f32 %v1048_v46, %v1048_v46  ;;  %v896_v54 = vpop.f32.mrf.mxu1  ;;  %2062 = vst [vmem:[%s3261_s27 + $0x30] sm:$0xff] %v1048_v46 }
  0xca   : > { %v1832_v55 = vadd.f32 %v1831_v36, %v1779_v48  ;;  %v1946_v56 = vmul.f32 %v1892_v47, %v1536_v44  ;;  %v897_v61 = vadd.f32 %v896_v54, %v630_v53  ;;  %v1476_v36 = vld [vmem:[%s3753_s3 + $0xd8] sm:$0xff] }
  0xcb   : > { %v2169_v57 = vadd.f32 %v2168_v38, %v2116_v50  ;;  %v2283_v58 = vmul.f32 %v2229_v51, %v1536_v44  ;;  %v1551_v38 = vpop.permute.xlu0 %1550  ;;  %1640 = vperm.xlu0 %3036, %v1476_v36  }
  0xcc   : > { %v1999_v59 = vadd.f32 %v1998_v40, %v1946_v56 }
  0xcd   : > { %v2336_v60 = vadd.f32 %v2335_v41, %v2283_v58  ;;  %v1223_v63 = vpop.f32.mrf.mxu3  ;;  %v3349_v41 = vld [vmem:[%s3133_s26 + $0x80] sm:$0xff]  }
  0xce   : > { %v1348_v1 = vadd.f32 %v1223_v63, %v897_v61  ;;  %v1477_v58 = vld [vmem:[%s3753_s3 + $0xe0] sm:$0xff] }
  0xcf   : > { %1645 = vperm.xlu1 %3037, %v1477_v58  }
  0xd0   : > { %v1050_v2 = vpop.f32.mrf.mxu2  ;;  %1402 = vst [vmem:[%s3256_s21 + $0x38] sm:$0xff] %v1348_v1  ;;  %v1893_v5 = vmul.f32 %v1348_v1, %v1348_v1  ;;  %v1780_v6 = vmul.f32 %v1541_v0, %v1348_v1  ;;  %v633_v9 = vpop.f32.mrf.mxu0 }
  0xd1   : > { %v2117_v7 = vmul.f32 %v1541_v0, %v1050_v2  ;;  %v2230_v8 = vmul.f32 %v1050_v2, %v1050_v2  ;;  %v899_v10 = vpop.f32.mrf.mxu1  ;;  %2063 = vst [vmem:[%s3261_s27 + $0x38] sm:$0xff] %v1050_v2 }
  0xd2   : > { %v900_v12 = vadd.f32 %v899_v10, %v633_v9  ;;  %v1833_v13 = vadd.f32 %v1832_v55, %v1780_v6  ;;  %v1947_v49 = vmul.f32 %v1893_v5, %v1541_v0  ;;  %2673 = vmatmul.msk.bf16.gmra.mxu3 %vm518_vm1, %v3329_v3 }
  0xd3   : > { %v2170_v14 = vadd.f32 %v2169_v57, %v2117_v7  ;;  %v2284_v15 = vmul.f32 %v2230_v8, %v1541_v0  ;;  %2570 = vmatmul.msk.bf16.gmra.mxu0 %vm518_vm1, %v2997_v4 }
  0xd4   : > { %2605 = vmatmul.msk.bf16.gmra.mxu1 %vm518_vm1, %v3269_v11  ;;  %v2000_v16 = vadd.f32 %v1999_v59, %v1947_v49  ;;  %v1475_v49 = vld [vmem:[%s3753_s3 + $0xd0] sm:$0xff] }
  0xd5   : > { %v2337_v17 = vadd.f32 %v2336_v60, %v2284_v15  ;;  %2636 = vmatmul.msk.bf16.gmra.mxu2 %vm518_vm1, %v2997_v4  ;;  %v1226_v19 = vpop.f32.mrf.mxu3  ;;  %v1556_v60 = vpop.permute.xlu1 %1555  ;;  %1635 = vperm.xlu2 %3038, %v1475_v49   ;;  %v1488_v49 = vld [vmem:[%s3753_s3 + $0x138] sm:$0xff] }
  0xd6   : > { %v1349_v21 = vadd.f32 %v1226_v19, %v900_v12  ;;  %v3375_v19 = vld [vmem:[%s3133_s26 + $0x88] sm:$0xff]  }
  0xd8   : > { %v1053_v22 = vpop.f32.mrf.mxu2  ;;  %1403 = vst [vmem:[%s3256_s21 + $0x40] sm:$0xff] %v1349_v21  ;;  %v1894_v23 = vmul.f32 %v1349_v21, %v1349_v21  ;;  %v1781_v24 = vmul.f32 %v1546_v20, %v1349_v21  ;;  %v635_v11 = vpop.f32.mrf.mxu0 }
  0xd9   : > { %v2118_v25 = vmul.f32 %v1546_v20, %v1053_v22  ;;  %v2231_v26 = vmul.f32 %v1053_v22, %v1053_v22  ;;  %v901_v28 = vpop.f32.mrf.mxu1  ;;  %2064 = vst [vmem:[%s3261_s27 + $0x40] sm:$0xff] %v1053_v22 }
  0xda   : > { %v1834_v29 = vadd.f32 %v1833_v13, %v1781_v24  ;;  %v1948_v30 = vmul.f32 %v1894_v23, %v1546_v20  ;;  %v902_v35 = vadd.f32 %v901_v28, %v635_v11  ;;  %v1479_v13 = vld [vmem:[%s3753_s3 + $0xf0] sm:$0xff] }
  0xdb   : > { %v2171_v31 = vadd.f32 %v2170_v14, %v2118_v25  ;;  %v2285_v32 = vmul.f32 %v2231_v26, %v1546_v20  ;;  %v1480_v14 = vld [vmem:[%s3753_s3 + $0xf8] sm:$0xff]  ;;  %1655 = vperm.xlu0 %3036, %v1479_v13  }
  0xdc   : > { %v2001_v33 = vadd.f32 %v2000_v16, %v1948_v30  ;;  %v1561_v16 = vpop.permute.xlu2 %1560  ;;  %1660 = vperm.xlu1 %3037, %v1480_v14   ;;  %v3001_v20 = vld [vmem:[%s3133_s26 + $0x7c] sm:$0xff]  }
  0xdd   : > { %v2338_v34 = vadd.f32 %v2337_v17, %v2285_v32  ;;  %v1228_v37 = vpop.f32.mrf.mxu3  ;;  %v1571_v58 = vpop.permute.xlu1 %1570  ;;  %v1489_v14 = vld [vmem:[%s3753_s3 + $0x140] sm:$0xff] }
  0xde   : > { %v1350_v39 = vadd.f32 %v1228_v37, %v902_v35  ;;  %v1483_v35 = vld [vmem:[%s3753_s3 + $0x110] sm:$0xff]  ;;  %v1566_v37 = vpop.permute.xlu0 %1565 }
  0xe0   : > { %v1055_v40 = vpop.f32.mrf.mxu2  ;;  %1404 = vst [vmem:[%s3256_s21 + $0x48] sm:$0xff] %v1350_v39  ;;  %v1895_v43 = vmul.f32 %v1350_v39, %v1350_v39  ;;  %v1782_v44 = vmul.f32 %v1551_v38, %v1350_v39  ;;  %v638_v47 = vpop.f32.mrf.mxu0 }
  0xe1   : > { %v2119_v45 = vmul.f32 %v1551_v38, %v1055_v40  ;;  %v2232_v46 = vmul.f32 %v1055_v40, %v1055_v40  ;;  %v904_v48 = vpop.f32.mrf.mxu1  ;;  %2065 = vst [vmem:[%s3261_s27 + $0x48] sm:$0xff] %v1055_v40 }
  0xe2   : > { %v905_v50 = vadd.f32 %v904_v48, %v638_v47  ;;  %v1835_v51 = vadd.f32 %v1834_v29, %v1782_v44  ;;  %v1949_v53 = vmul.f32 %v1895_v43, %v1551_v38  ;;  %2674 = vmatmul.msk.bf16.gmra.mxu3 %vm518_vm1, %v3349_v41 }
  0xe3   : > { %v2172_v54 = vadd.f32 %v2171_v31, %v2119_v45  ;;  %v2286_v55 = vmul.f32 %v2232_v46, %v1551_v38  ;;  %2571 = vmatmul.msk.bf16.gmra.mxu0 %vm518_vm1, %v2999_v42 }
  0xe4   : > { %2606 = vmatmul.msk.bf16.gmra.mxu1 %vm518_vm1, %v3289_v52  ;;  %v2002_v56 = vadd.f32 %v2001_v33, %v1949_v53  ;;  %1675 = vperm.xlu1 %3037, %v1483_v35  }
  0xe5   : > { %v2339_v57 = vadd.f32 %v2338_v34, %v2286_v55  ;;  %2637 = vmatmul.msk.bf16.gmra.mxu2 %vm518_vm1, %v2999_v42  ;;  %v1231_v59 = vpop.f32.mrf.mxu3  ;;  %v1482_v34 = vld [vmem:[%s3753_s3 + $0x108] sm:$0xff]  ;;  %v1485_v55 = vld [vmem:[%s3753_s3 + $0x120] sm:$0xff] }
  0xe6   : > { %v1351_v61 = vadd.f32 %v1231_v59, %v905_v50  ;;  %1670 = vperm.xlu0 %3036, %v1482_v34   ;;  %v1492_v34 = vld [vmem:[%s3753_s3 + $0x158] sm:$0xff] }
  0xe8   : > { %v1058_v62 = vpop.f32.mrf.mxu2  ;;  %1405 = vst [vmem:[%s3256_s21 + $0x50] sm:$0xff] %v1351_v61  ;;  %v1896_v63 = vmul.f32 %v1351_v61, %v1351_v61  ;;  %v1783_v0 = vmul.f32 %v1556_v60, %v1351_v61  ;;  %v640_v52 = vpop.f32.mrf.mxu0  ;;  %v3401_v61 = vld [vmem:[%s3133_s26 + $0x90] sm:$0xff]  }
  0xe9   : > { %v2120_v1 = vmul.f32 %v1556_v60, %v1058_v62  ;;  %v2233_v2 = vmul.f32 %v1058_v62, %v1058_v62  ;;  %v906_v4 = vpop.f32.mrf.mxu1  ;;  %2066 = vst [vmem:[%s3261_s27 + $0x50] sm:$0xff] %v1058_v62  ;;  %v3003_v62 = vld [vmem:[%s3133_s26 + $0x84] sm:$0xff]  }
  0xea   : > { %v1836_v5 = vadd.f32 %v1835_v51, %v1783_v0  ;;  %v1950_v6 = vmul.f32 %v1896_v63, %v1556_v60  ;;  %v907_v12 = vadd.f32 %v906_v4, %v640_v52 }
  0xeb   : > { %v2173_v7 = vadd.f32 %v2172_v54, %v2120_v1  ;;  %v2287_v8 = vmul.f32 %v2233_v2, %v1556_v60 }
  0xec   : > { %v2003_v9 = vadd.f32 %v2002_v56, %v1950_v6  ;;  %v1486_v56 = vld [vmem:[%s3753_s3 + $0x128] sm:$0xff] }
  0xed   : > { %v2340_v10 = vadd.f32 %v2339_v57, %v2287_v8  ;;  %v1233_v15 = vpop.f32.mrf.mxu3  ;;  %1690 = vperm.xlu1 %3037, %v1486_v56  }
  0xee   : > { %v1352_v17 = vadd.f32 %v1233_v15, %v907_v12  ;;  %1685 = vperm.xlu0 %3036, %v1485_v55  }
  0xf0   : > { %v1060_v18 = vpop.f32.mrf.mxu2  ;;  %1406 = vst [vmem:[%s3256_s21 + $0x58] sm:$0xff] %v1352_v17  ;;  %v1897_v21 = vmul.f32 %v1352_v17, %v1352_v17  ;;  %v1784_v22 = vmul.f32 %v1561_v16, %v1352_v17  ;;  %v643_v25 = vpop.f32.mrf.mxu0 }
  0xf1   : > { %v2121_v23 = vmul.f32 %v1561_v16, %v1060_v18  ;;  %v2234_v24 = vmul.f32 %v1060_v18, %v1060_v18  ;;  %v909_v26 = vpop.f32.mrf.mxu1  ;;  %2067 = vst [vmem:[%s3261_s27 + $0x58] sm:$0xff] %v1060_v18 }
  0xf2   : > { %v910_v11 = vadd.f32 %v909_v26, %v643_v25  ;;  %v1837_v28 = vadd.f32 %v1836_v5, %v1784_v22  ;;  %v1951_v29 = vmul.f32 %v1897_v21, %v1561_v16  ;;  %2675 = vmatmul.msk.bf16.gmra.mxu3 %vm518_vm1, %v3375_v19  ;;  %v1478_v5 = vld [vmem:[%s3753_s3 + $0xe8] sm:$0xff]  ;;  %v1481_v25 = vld [vmem:[%s3753_s3 + $0x100] sm:$0xff] }
  0xf3   : > { %v2174_v30 = vadd.f32 %v2173_v7, %v2121_v23  ;;  %v2288_v31 = vmul.f32 %v2234_v24, %v1561_v16  ;;  %2572 = vmatmul.msk.bf16.gmra.mxu0 %vm518_vm1, %v3001_v20  ;;  %1650 = vperm.xlu2 %3038, %v1478_v5   ;;  %v1576_v16 = vpop.permute.xlu2 %1575  ;;  %v1487_v5 = vld [vmem:[%s3753_s3 + $0x130] sm:$0xff] }
  0xf4   : > { %2607 = vmatmul.msk.bf16.gmra.mxu1 %vm518_vm1, %v3309_v27  ;;  %v2004_v32 = vadd.f32 %v2003_v9, %v1951_v29 }
  0xf5   : > { %v2341_v33 = vadd.f32 %v2340_v10, %v2288_v31  ;;  %2638 = vmatmul.msk.bf16.gmra.mxu2 %vm518_vm1, %v3001_v20  ;;  %v1236_v36 = vpop.f32.mrf.mxu3  ;;  %1705 = vperm.xlu1 %3037, %v1489_v14   ;;  %v1498_v14 = vld [vmem:[%s3753_s3 + $0x188] sm:$0xff] }
  0xf6   : > { %v1353_v38 = vadd.f32 %v1236_v36, %v910_v11  ;;  %1700 = vperm.xlu0 %3036, %v1488_v49   ;;  %v1581_v36 = vpop.permute.xlu0 %1580  ;;  %v1497_v49 = vld [vmem:[%s3753_s3 + $0x180] sm:$0xff] }
  0xf8   : > { %v1063_v39 = vpop.f32.mrf.mxu2  ;;  %1407 = vst [vmem:[%s3256_s21 + $0x60] sm:$0xff] %v1353_v38  ;;  %v1898_v27 = vmul.f32 %v1353_v38, %v1353_v38  ;;  %v1785_v40 = vmul.f32 %v1566_v37, %v1353_v38  ;;  %v645_v44 = vpop.f32.mrf.mxu0 }
  0xf9   : > { %v2122_v42 = vmul.f32 %v1566_v37, %v1063_v39  ;;  %v2235_v43 = vmul.f32 %v1063_v39, %v1063_v39  ;;  %v911_v45 = vpop.f32.mrf.mxu1  ;;  %2068 = vst [vmem:[%s3261_s27 + $0x60] sm:$0xff] %v1063_v39  ;;  %v3433_v39 = vld [vmem:[%s3133_s26 + $0x98] sm:$0xff]  }
  0xfa   : > { %v1838_v46 = vadd.f32 %v1837_v28, %v1785_v40  ;;  %v1952_v47 = vmul.f32 %v1898_v27, %v1566_v37  ;;  %v912_v54 = vadd.f32 %v911_v45, %v645_v44  ;;  %v3005_v27 = vld [vmem:[%s3133_s26 + $0x8c] sm:$0xff]  }
  0xfb   : > { %v2175_v48 = vadd.f32 %v2174_v30, %v2122_v42  ;;  %v2289_v50 = vmul.f32 %v2235_v43, %v1566_v37  ;;  %1665 = vperm.xlu2 %3038, %v1481_v25  }
  0xfc   : > { %v2005_v51 = vadd.f32 %v2004_v32, %v1952_v47  ;;  %v1484_v47 = vld [vmem:[%s3753_s3 + $0x118] sm:$0xff] }
  0xfd   : > { %v2342_v53 = vadd.f32 %v2341_v33, %v2289_v50  ;;  %v1238_v57 = vpop.f32.mrf.mxu3  ;;  %v1491_v33 = vld [vmem:[%s3753_s3 + $0x150] sm:$0xff]  ;;  %1720 = vperm.xlu1 %3037, %v1492_v34  }
  0xfe   : > { %v1354_v59 = vadd.f32 %v1238_v57, %v912_v54  ;;  %1715 = vperm.xlu0 %3036, %v1491_v33   ;;  %v1494_v57 = vld [vmem:[%s3753_s3 + $0x168] sm:$0xff] }
 0x100   : > { %v1065_v60 = vpop.f32.mrf.mxu2  ;;  %1408 = vst [vmem:[%s3256_s21 + $0x68] sm:$0xff] %v1354_v59  ;;  %v1899_v63 = vmul.f32 %v1354_v59, %v1354_v59  ;;  %v1786_v0 = vmul.f32 %v1571_v58, %v1354_v59  ;;  %v648_v52 = vpop.f32.mrf.mxu0 }
 0x101   : > { %v2123_v1 = vmul.f32 %v1571_v58, %v1065_v60  ;;  %v2236_v2 = vmul.f32 %v1065_v60, %v1065_v60  ;;  %v914_v4 = vpop.f32.mrf.mxu1  ;;  %2069 = vst [vmem:[%s3261_s27 + $0x68] sm:$0xff] %v1065_v60  ;;  %v1586_v60 = vpop.permute.xlu1 %1585 }
 0x102   : > { %v915_v6 = vadd.f32 %v914_v4, %v648_v52  ;;  %v1839_v7 = vadd.f32 %v1838_v46, %v1786_v0  ;;  %v1953_v8 = vmul.f32 %v1899_v63, %v1571_v58  ;;  %2676 = vmatmul.msk.bf16.gmra.mxu3 %vm518_vm1, %v3401_v61 }
 0x103   : > { %v2176_v9 = vadd.f32 %v2175_v48, %v2123_v1  ;;  %v2290_v10 = vmul.f32 %v2236_v2, %v1571_v58  ;;  %2573 = vmatmul.msk.bf16.gmra.mxu0 %vm518_vm1, %v3003_v62  ;;  %1680 = vperm.xlu2 %3038, %v1484_v47   ;;  %v1495_v58 = vld [vmem:[%s3753_s3 + $0x170] sm:$0xff]  ;;  %v1493_v47 = vld [vmem:[%s3753_s3 + $0x160] sm:$0xff] }
 0x104   : > { %2608 = vmatmul.msk.bf16.gmra.mxu1 %vm518_vm1, %v3329_v3  ;;  %v2006_v12 = vadd.f32 %v2005_v51, %v1953_v8 }
 0x105   : > { %v2343_v13 = vadd.f32 %v2342_v53, %v2290_v10  ;;  %2639 = vmatmul.msk.bf16.gmra.mxu2 %vm518_vm1, %v3003_v62  ;;  %v1241_v15 = vpop.f32.mrf.mxu3  ;;  %1735 = vperm.xlu1 %3037, %v1495_v58  }
 0x106   : > { %v1355_v17 = vadd.f32 %v1241_v15, %v915_v6  ;;  %1730 = vperm.xlu0 %3036, %v1494_v57  }
 0x108   : > { %v1068_v18 = vpop.f32.mrf.mxu2  ;;  %1409 = vst [vmem:[%s3256_s21 + $0x70] sm:$0xff] %v1355_v17  ;;  %v1900_v3 = vmul.f32 %v1355_v17, %v1355_v17  ;;  %v1787_v20 = vmul.f32 %v1576_v16, %v1355_v17  ;;  %v650_v23 = vpop.f32.mrf.mxu0 }
 0x109   : > { %v2124_v21 = vmul.f32 %v1576_v16, %v1068_v18  ;;  %v2237_v22 = vmul.f32 %v1068_v18, %v1068_v18  ;;  %v916_v24 = vpop.f32.mrf.mxu1  ;;  %2070 = vst [vmem:[%s3261_s27 + $0x70] sm:$0xff] %v1068_v18  ;;  %v1601_v58 = vpop.permute.xlu1 %1600 }
 0x10a   : > { %v1840_v26 = vadd.f32 %v1839_v7, %v1787_v20  ;;  %v1954_v11 = vmul.f32 %v1900_v3, %v1576_v16  ;;  %v917_v32 = vadd.f32 %v916_v24, %v650_v23  ;;  %v3465_v3 = vld [vmem:[%s3133_s26 + $0xa0] sm:$0xff]   ;;  %v3007_v20 = vld [vmem:[%s3133_s26 + $0x94] sm:$0xff]  }
 0x10b   : > { %v2177_v28 = vadd.f32 %v2176_v9, %v2124_v21  ;;  %v2291_v29 = vmul.f32 %v2237_v22, %v1576_v16  ;;  %1695 = vperm.xlu2 %3038, %v1487_v5   ;;  %v1591_v16 = vpop.permute.xlu2 %1590  ;;  %v1496_v5 = vld [vmem:[%s3753_s3 + $0x178] sm:$0xff] }
 0x10c   : > { %v2007_v30 = vadd.f32 %v2006_v12, %v1954_v11  ;;  %v1490_v11 = vld [vmem:[%s3753_s3 + $0x148] sm:$0xff] }
 0x10d   : > { %v2344_v31 = vadd.f32 %v2343_v13, %v2291_v29  ;;  %v1243_v35 = vpop.f32.mrf.mxu3  ;;  %1750 = vperm.xlu1 %3037, %v1498_v14  }
 0x10e   : > { %v1356_v37 = vadd.f32 %v1243_v35, %v917_v32  ;;  %1745 = vperm.xlu0 %3036, %v1497_v49   ;;  %v1500_v35 = vld [vmem:[%s3753_s3 + $0x198] sm:$0xff] }
 0x110   : > { %v1070_v38 = vpop.f32.mrf.mxu2  ;;  %1410 = vst [vmem:[%s3256_s21 + $0x78] sm:$0xff] %v1356_v37  ;;  %v1901_v40 = vmul.f32 %v1356_v37, %v1356_v37  ;;  %v1788_v42 = vmul.f32 %v1581_v36, %v1356_v37  ;;  %v653_v45 = vpop.f32.mrf.mxu0 }
 0x111   : > { %v2125_v43 = vmul.f32 %v1581_v36, %v1070_v38  ;;  %v2238_v44 = vmul.f32 %v1070_v38, %v1070_v38  ;;  %v919_v46 = vpop.f32.mrf.mxu1  ;;  %2071 = vst [vmem:[%s3261_s27 + $0x78] sm:$0xff] %v1070_v38  ;;  %v1596_v38 = vpop.permute.xlu0 %1595 }
 0x112   : > { %v920_v48 = vadd.f32 %v919_v46, %v653_v45  ;;  %v1841_v50 = vadd.f32 %v1840_v26, %v1788_v42  ;;  %v1955_v51 = vmul.f32 %v1901_v40, %v1581_v36  ;;  %2677 = vmatmul.msk.bf16.gmra.mxu3 %vm518_vm1, %v3433_v39 }
 0x113   : > { %v2178_v53 = vadd.f32 %v2177_v28, %v2125_v43  ;;  %v2292_v54 = vmul.f32 %v2238_v44, %v1581_v36  ;;  %2574 = vmatmul.msk.bf16.gmra.mxu0 %vm518_vm1, %v3005_v27  ;;  %1710 = vperm.xlu2 %3038, %v1490_v11   ;;  %v1501_v36 = vld [vmem:[%s3753_s3 + $0x1a0] sm:$0xff]  ;;  %v1606_v14 = vpop.permute.xlu2 %1605 }
 0x114   : > { %2609 = vmatmul.msk.bf16.gmra.mxu1 %vm518_vm1, %v3349_v41  ;;  %v2008_v55 = vadd.f32 %v2007_v30, %v1955_v51 }
 0x115   : > { %v2345_v56 = vadd.f32 %v2344_v31, %v2292_v54  ;;  %2640 = vmatmul.msk.bf16.gmra.mxu2 %vm518_vm1, %v3005_v27  ;;  %v1246_v59 = vpop.f32.mrf.mxu3  ;;  %1765 = vperm.xlu1 %3037, %v1501_v36   ;;  %v3011_v36 = vld [vmem:[%s3133_s26 + $0xa4] sm:$0xff]  }
 0x116   : > { %v1357_v62 = vadd.f32 %v1246_v59, %v920_v48  ;;  %1760 = vperm.xlu0 %3036, %v1500_v35   ;;  %v3511_v35 = vld [vmem:[%s3133_s26 + $0xb0] sm:$0xff]  }
 0x118   : > { %v1073_v63 = vpop.f32.mrf.mxu2  ;;  %1411 = vst [vmem:[%s3256_s21 + $0x80] sm:$0xff] %v1357_v62  ;;  %v1902_v41 = vmul.f32 %v1357_v62, %v1357_v62  ;;  %v1789_v0 = vmul.f32 %v1586_v60, %v1357_v62  ;;  %v655_v52 = vpop.f32.mrf.mxu0  ;;  %v3491_v62 = vld [vmem:[%s3133_s26 + $0xa8] sm:$0xff]  }
 0x119   : > { %v2126_v1 = vmul.f32 %v1586_v60, %v1073_v63  ;;  %v2239_v2 = vmul.f32 %v1073_v63, %v1073_v63  ;;  %v921_v4 = vpop.f32.mrf.mxu1  ;;  %2072 = vst [vmem:[%s3261_s27 + $0x80] sm:$0xff] %v1073_v63  ;;  %v3009_v63 = vld [vmem:[%s3133_s26 + $0x9c] sm:$0xff]  }
 0x11a   : > { %v1842_v6 = vadd.f32 %v1841_v50, %v1789_v0  ;;  %v1956_v7 = vmul.f32 %v1902_v41, %v1586_v60  ;;  %v922_v13 = vadd.f32 %v921_v4, %v655_v52 }
 0x11b   : > { %v2179_v8 = vadd.f32 %v2178_v53, %v2126_v1  ;;  %v2293_v9 = vmul.f32 %v2239_v2, %v1586_v60  ;;  %1725 = vperm.xlu2 %3038, %v1493_v47  }
 0x11c   : > { %v2009_v10 = vadd.f32 %v2008_v55, %v1956_v7 }
 0x11d   : > { %v2346_v12 = vadd.f32 %v2345_v56, %v2293_v9  ;;  %v1248_v15 = vpop.f32.mrf.mxu3 }
 0x11e   : > { %v1358_v17 = vadd.f32 %v1248_v15, %v922_v13 }
 0x120   : > { %v1075_v18 = vpop.f32.mrf.mxu2  ;;  %1412 = vst [vmem:[%s3256_s21 + $0x88] sm:$0xff] %v1358_v17  ;;  %v1903_v21 = vmul.f32 %v1358_v17, %v1358_v17  ;;  %v1790_v22 = vmul.f32 %v1591_v16, %v1358_v17  ;;  %v658_v25 = vpop.f32.mrf.mxu0 }
 0x121   : > { %v2127_v23 = vmul.f32 %v1591_v16, %v1075_v18  ;;  %v2240_v24 = vmul.f32 %v1075_v18, %v1075_v18  ;;  %v924_v26 = vpop.f32.mrf.mxu1  ;;  %2073 = vst [vmem:[%s3261_s27 + $0x88] sm:$0xff] %v1075_v18 }
 0x122   : > { %v925_v28 = vadd.f32 %v924_v26, %v658_v25  ;;  %v1843_v29 = vadd.f32 %v1842_v6, %v1790_v22  ;;  %v1957_v30 = vmul.f32 %v1903_v21, %v1591_v16  ;;  %2678 = vmatmul.msk.bf16.gmra.mxu3 %vm518_vm1, %v3465_v3 }
 0x123   : > { %v2294_v31 = vmul.f32 %v2240_v24, %v1591_v16  ;;  %v2180_v32 = vadd.f32 %v2179_v8, %v2127_v23  ;;  %2575 = vmatmul.msk.bf16.gmra.mxu0 %vm518_vm1, %v3007_v20  ;;  %1740 = vperm.xlu2 %3038, %v1496_v5  }
 0x124   : > { %2610 = vmatmul.msk.bf16.gmra.mxu1 %vm518_vm1, %v3375_v19  ;;  %v2010_v33 = vadd.f32 %v2009_v10, %v1957_v30 }
 0x125   : > { %2641 = vmatmul.msk.bf16.gmra.mxu2 %vm518_vm1, %v3007_v20  ;;  %v2347_v34 = vadd.f32 %v2346_v12, %v2294_v31  ;;  %v1251_v37 = vpop.f32.mrf.mxu3 }
 0x126   : > { %v1359_v27 = vadd.f32 %v1251_v37, %v925_v28 }
 0x128   : > { %v1078_v40 = vpop.f32.mrf.mxu2  ;;  %1413 = vst [vmem:[%s3256_s21 + $0x90] sm:$0xff] %v1359_v27  ;;  %v1904_v19 = vmul.f32 %v1359_v27, %v1359_v27  ;;  %v1791_v42 = vmul.f32 %v1596_v38, %v1359_v27  ;;  %v660_v45 = vpop.f32.mrf.mxu0 }
 0x129   : > { %v2128_v43 = vmul.f32 %v1596_v38, %v1078_v40  ;;  %v2241_v44 = vmul.f32 %v1078_v40, %v1078_v40  ;;  %v926_v46 = vpop.f32.mrf.mxu1  ;;  %2074 = vst [vmem:[%s3261_s27 + $0x90] sm:$0xff] %v1078_v40 }
 0x12a   : > { %v1844_v48 = vadd.f32 %v1843_v29, %v1791_v42  ;;  %v1958_v50 = vmul.f32 %v1904_v19, %v1596_v38  ;;  %v927_v56 = vadd.f32 %v926_v46, %v660_v45 }
 0x12b   : > { %v2181_v51 = vadd.f32 %v2180_v32, %v2128_v43  ;;  %v2295_v53 = vmul.f32 %v2241_v44, %v1596_v38  ;;  %v1611_v32 = vpop.permute.xlu0 %1610  ;;  %v1502_v43 = vld [vmem:[%s3753_s3 + $0x1a8] sm:$0xff] }
 0x12c   : > { %v2011_v54 = vadd.f32 %v2010_v33, %v1958_v50 }
 0x12d   : > { %v2348_v55 = vadd.f32 %v2347_v34, %v2295_v53  ;;  %v1253_v57 = vpop.f32.mrf.mxu3 }
 0x12e   : > { %v1360_v59 = vadd.f32 %v1253_v57, %v927_v56 }
 0x130   : > { %v1080_v60 = vpop.f32.mrf.mxu2  ;;  %1414 = vst [vmem:[%s3256_s21 + $0x98] sm:$0xff] %v1360_v59  ;;  %v1905_v41 = vmul.f32 %v1360_v59, %v1360_v59  ;;  %v1792_v0 = vmul.f32 %v1601_v58, %v1360_v59  ;;  %v663_v52 = vpop.f32.mrf.mxu0 }
 0x131   : > { %v2129_v1 = vmul.f32 %v1601_v58, %v1080_v60  ;;  %v2242_v2 = vmul.f32 %v1080_v60, %v1080_v60  ;;  %v929_v4 = vpop.f32.mrf.mxu1  ;;  %2075 = vst [vmem:[%s3261_s27 + $0x98] sm:$0xff] %v1080_v60 }
 0x132   : > { %v930_v6 = vadd.f32 %v929_v4, %v663_v52  ;;  %v1845_v7 = vadd.f32 %v1844_v48, %v1792_v0  ;;  %v1959_v8 = vmul.f32 %v1905_v41, %v1601_v58  ;;  %2679 = vmatmul.msk.bf16.gmra.mxu3 %vm518_vm1, %v3491_v62 }
 0x133   : > { %v2296_v9 = vmul.f32 %v2242_v2, %v1601_v58  ;;  %v2182_v10 = vadd.f32 %v2181_v51, %v2129_v1  ;;  %2576 = vmatmul.msk.bf16.gmra.mxu0 %vm518_vm1, %v3009_v63 }
 0x134   : > { %2611 = vmatmul.msk.bf16.gmra.mxu1 %vm518_vm1, %v3401_v61  ;;  %v2012_v12 = vadd.f32 %v2011_v54, %v1959_v8  ;;  %v1499_v61 = vld [vmem:[%s3753_s3 + $0x190] sm:$0xff]  ;;  %v1616_v54 = vpop.permute.xlu1 %1615 }
 0x135   : > { %2642 = vmatmul.msk.bf16.gmra.mxu2 %vm518_vm1, %v3009_v63  ;;  %v2349_v13 = vadd.f32 %v2348_v55, %v2296_v9  ;;  %v1256_v49 = vpop.f32.mrf.mxu3  ;;  %1755 = vperm.xlu2 %3038, %v1499_v61  }
 0x136   : > { %v1361_v15 = vadd.f32 %v1256_v49, %v930_v6 }
 0x138   : > { %v1083_v16 = vpop.f32.mrf.mxu2  ;;  %1415 = vst [vmem:[%s3256_s21 + $0xa0] sm:$0xff] %v1361_v15  ;;  %v1906_v17 = vmul.f32 %v1361_v15, %v1361_v15  ;;  %v1793_v18 = vmul.f32 %v1606_v14, %v1361_v15  ;;  %v665_v22 = vpop.f32.mrf.mxu0 }
 0x139   : > { %v2130_v20 = vmul.f32 %v1606_v14, %v1083_v16  ;;  %v2243_v21 = vmul.f32 %v1083_v16, %v1083_v16  ;;  %v931_v23 = vpop.f32.mrf.mxu1  ;;  %2076 = vst [vmem:[%s3261_s27 + $0xa0] sm:$0xff] %v1083_v16 }
 0x13a   : > { %v1846_v24 = vadd.f32 %v1845_v7, %v1793_v18  ;;  %v1960_v25 = vmul.f32 %v1906_v17, %v1606_v14  ;;  %v932_v30 = vadd.f32 %v931_v23, %v665_v22  ;;  %v1621_v7 = vpop.permute.xlu2 %1620 }
 0x13b   : > { %v2183_v26 = vadd.f32 %v2182_v10, %v2130_v20  ;;  %v2297_v11 = vmul.f32 %v2243_v21, %v1606_v14  ;;  %v3528_v10 = vld [vmem:[%s3133_s26 + $0xb8] sm:$0xff]  }
 0x13c   : > { %v2013_v28 = vadd.f32 %v2012_v12, %v1960_v25  ;;  %v3013_v12 = vld [vmem:[%s3133_s26 + $0xac] sm:$0xff]  }
 0x13d   : > { %v2350_v29 = vadd.f32 %v2349_v13, %v2297_v11  ;;  %v1258_v31 = vpop.f32.mrf.mxu3  ;;  %1770 = vperm.xlu2 %3038, %v1502_v43   ;;  %v1631_v43 = vpop.permute.xlu1 %1630 }
 0x13e   : > { %v1362_v33 = vadd.f32 %v1258_v31, %v932_v30 }
 0x140   : > { %v1085_v34 = vpop.f32.mrf.mxu2  ;;  %1416 = vst [vmem:[%s3256_s21 + $0xa8] sm:$0xff] %v1362_v33  ;;  %v1907_v37 = vmul.f32 %v1362_v33, %v1362_v33  ;;  %v1794_v38 = vmul.f32 %v1611_v32, %v1362_v33  ;;  %v668_v19 = vpop.f32.mrf.mxu0 }
 0x141   : > { %v2131_v27 = vmul.f32 %v1611_v32, %v1085_v34  ;;  %v2244_v40 = vmul.f32 %v1085_v34, %v1085_v34  ;;  %v934_v42 = vpop.f32.mrf.mxu1  ;;  %2077 = vst [vmem:[%s3261_s27 + $0xa8] sm:$0xff] %v1085_v34 }
 0x142   : > { %v935_v44 = vadd.f32 %v934_v42, %v668_v19  ;;  %v1847_v45 = vadd.f32 %v1846_v24, %v1794_v38  ;;  %v1961_v46 = vmul.f32 %v1907_v37, %v1611_v32  ;;  %2680 = vmatmul.msk.bf16.gmra.mxu3 %vm518_vm1, %v3511_v35 }
 0x143   : > { %v2298_v47 = vmul.f32 %v2244_v40, %v1611_v32  ;;  %v2184_v48 = vadd.f32 %v2183_v26, %v2131_v27  ;;  %2577 = vmatmul.msk.bf16.gmra.mxu0 %vm518_vm1, %v3011_v36  ;;  %v1626_v26 = vpop.permute.xlu0 %1625 }
 0x144   : > { %2612 = vmatmul.msk.bf16.gmra.mxu1 %vm518_vm1, %v3433_v39  ;;  %v2014_v50 = vadd.f32 %v2013_v28, %v1961_v46  ;;  %v3542_v46 = vld [vmem:[%s3133_s26 + $0xc0] sm:$0xff]  }
 0x145   : > { %2643 = vmatmul.msk.bf16.gmra.mxu2 %vm518_vm1, %v3011_v36  ;;  %v2351_v51 = vadd.f32 %v2350_v29, %v2298_v47  ;;  %v1261_v53 = vpop.f32.mrf.mxu3  ;;  %v3015_v47 = vld [vmem:[%s3133_s26 + $0xb4] sm:$0xff]  }
 0x146   : > { %v1363_v55 = vadd.f32 %v1261_v53, %v935_v44 }
 0x148   : > { %v1088_v56 = vpop.f32.mrf.mxu2  ;;  %1417 = vst [vmem:[%s3256_s21 + $0xb0] sm:$0xff] %v1363_v55  ;;  %v1908_v57 = vmul.f32 %v1363_v55, %v1363_v55  ;;  %v1795_v58 = vmul.f32 %v1616_v54, %v1363_v55  ;;  %v670_v63 = vpop.f32.mrf.mxu0 }
 0x149   : > { %v2132_v59 = vmul.f32 %v1616_v54, %v1088_v56  ;;  %v2245_v60 = vmul.f32 %v1088_v56, %v1088_v56  ;;  %v936_v41 = vpop.f32.mrf.mxu1  ;;  %2078 = vst [vmem:[%s3261_s27 + $0xb0] sm:$0xff] %v1088_v56 }
 0x14a   : > { %v1848_v39 = vadd.f32 %v1847_v45, %v1795_v58  ;;  %v1962_v0 = vmul.f32 %v1908_v57, %v1616_v54  ;;  %v937_v5 = vadd.f32 %v936_v41, %v670_v63 }
 0x14b   : > { %v2185_v1 = vadd.f32 %v2184_v48, %v2132_v59  ;;  %v2299_v2 = vmul.f32 %v2245_v60, %v1616_v54 }
 0x14c   : > { %v2015_v52 = vadd.f32 %v2014_v50, %v1962_v0  ;;  %v1636_v0 = vpop.permute.xlu2 %1635 }
 0x14d   : > { %v2352_v4 = vadd.f32 %v2351_v51, %v2299_v2  ;;  %v1263_v6 = vpop.f32.mrf.mxu3 }
 0x14e   : > { %v1364_v8 = vadd.f32 %v1263_v6, %v937_v5 }
 0x150   : > { %v1090_v9 = vpop.f32.mrf.mxu2  ;;  %1418 = vst [vmem:[%s3256_s21 + $0xb8] sm:$0xff] %v1364_v8  ;;  %v1909_v13 = vmul.f32 %v1364_v8, %v1364_v8  ;;  %v1796_v49 = vmul.f32 %v1621_v7, %v1364_v8  ;;  %v673_v16 = vpop.f32.mrf.mxu0 }
 0x151   : > { %v2133_v14 = vmul.f32 %v1621_v7, %v1090_v9  ;;  %v2246_v15 = vmul.f32 %v1090_v9, %v1090_v9  ;;  %v939_v17 = vpop.f32.mrf.mxu1  ;;  %2079 = vst [vmem:[%s3261_s27 + $0xb8] sm:$0xff] %v1090_v9 }
 0x152   : > { %v940_v18 = vadd.f32 %v939_v17, %v673_v16  ;;  %v1849_v20 = vadd.f32 %v1848_v39, %v1796_v49  ;;  %v1963_v21 = vmul.f32 %v1909_v13, %v1621_v7  ;;  %2681 = vmatmul.msk.bf16.gmra.mxu3 %vm518_vm1, %v3528_v10  ;;  %v1641_v17 = vpop.permute.xlu0 %1640 }
 0x153   : > { %v2300_v22 = vmul.f32 %v2246_v15, %v1621_v7  ;;  %v2186_v23 = vadd.f32 %v2185_v1, %v2133_v14  ;;  %2578 = vmatmul.msk.bf16.gmra.mxu0 %vm518_vm1, %v3013_v12 }
 0x154   : > { %2613 = vmatmul.msk.bf16.gmra.mxu1 %vm518_vm1, %v3465_v3  ;;  %v2016_v61 = vadd.f32 %v2015_v52, %v1963_v21  ;;  %v3556_v21 = vld [vmem:[%s3133_s26 + $0xc8] sm:$0xff]  }
 0x155   : > { %2644 = vmatmul.msk.bf16.gmra.mxu2 %vm518_vm1, %v3013_v12  ;;  %v2353_v24 = vadd.f32 %v2352_v4, %v2300_v22  ;;  %v1266_v25 = vpop.f32.mrf.mxu3  ;;  %v3017_v22 = vld [vmem:[%s3133_s26 + $0xbc] sm:$0xff]  }
 0x156   : > { %v1365_v11 = vadd.f32 %v1266_v25, %v940_v18 }
 0x158   : > { %v1093_v28 = vpop.f32.mrf.mxu2  ;;  %1419 = vst [vmem:[%s3256_s21 + $0xc0] sm:$0xff] %v1365_v11  ;;  %v1910_v29 = vmul.f32 %v1365_v11, %v1365_v11  ;;  %v1797_v30 = vmul.f32 %v1626_v26, %v1365_v11  ;;  %v675_v33 = vpop.f32.mrf.mxu0 }
 0x159   : > { %v2134_v31 = vmul.f32 %v1626_v26, %v1093_v28  ;;  %v2247_v32 = vmul.f32 %v1093_v28, %v1093_v28  ;;  %v941_v34 = vpop.f32.mrf.mxu1  ;;  %2080 = vst [vmem:[%s3261_s27 + $0xc0] sm:$0xff] %v1093_v28 }
 0x15a   : > { %v1850_v3 = vadd.f32 %v1849_v20, %v1797_v30  ;;  %v1964_v36 = vmul.f32 %v1910_v29, %v1626_v26  ;;  %v942_v19 = vadd.f32 %v941_v34, %v675_v33 }
 0x15b   : > { %v2187_v37 = vadd.f32 %v2186_v23, %v2134_v31  ;;  %v2301_v38 = vmul.f32 %v2247_v32, %v1626_v26 }
 0x15c   : > { %v2017_v27 = vadd.f32 %v2016_v61, %v1964_v36  ;;  %v1646_v36 = vpop.permute.xlu1 %1645 }
 0x15d   : > { %v2354_v40 = vadd.f32 %v2353_v24, %v2301_v38  ;;  %v1268_v42 = vpop.f32.mrf.mxu3 }
 0x15e   : > { %v1366_v44 = vadd.f32 %v1268_v42, %v942_v19 }
 0x160   : > { %v1095_v45 = vpop.f32.mrf.mxu2  ;;  %1420 = vst [vmem:[%s3256_s21 + $0xc8] sm:$0xff] %v1366_v44  ;;  %v1911_v48 = vmul.f32 %v1366_v44, %v1366_v44  ;;  %v1798_v50 = vmul.f32 %v1631_v43, %v1366_v44  ;;  %v678_v54 = vpop.f32.mrf.mxu0 }
 0x161   : > { %v2135_v51 = vmul.f32 %v1631_v43, %v1095_v45  ;;  %v2248_v53 = vmul.f32 %v1095_v45, %v1095_v45  ;;  %v944_v55 = vpop.f32.mrf.mxu1  ;;  %2081 = vst [vmem:[%s3261_s27 + $0xc8] sm:$0xff] %v1095_v45 }
 0x162   : > { %v945_v56 = vadd.f32 %v944_v55, %v678_v54  ;;  %v1851_v57 = vadd.f32 %v1850_v3, %v1798_v50  ;;  %v1965_v58 = vmul.f32 %v1911_v48, %v1631_v43  ;;  %2682 = vmatmul.msk.bf16.gmra.mxu3 %vm518_vm1, %v3542_v46 }
 0x163   : > { %v2302_v59 = vmul.f32 %v2248_v53, %v1631_v43  ;;  %v2188_v60 = vadd.f32 %v2187_v37, %v2135_v51  ;;  %2579 = vmatmul.msk.bf16.gmra.mxu0 %vm518_vm1, %v3015_v47 }
 0x164   : > { %2614 = vmatmul.msk.bf16.gmra.mxu1 %vm518_vm1, %v3491_v62  ;;  %v2018_v63 = vadd.f32 %v2017_v27, %v1965_v58  ;;  %v3570_v58 = vld [vmem:[%s3133_s26 + $0xd0] sm:$0xff]  }
 0x165   : > { %2645 = vmatmul.msk.bf16.gmra.mxu2 %vm518_vm1, %v3015_v47  ;;  %v2355_v41 = vadd.f32 %v2354_v40, %v2302_v59  ;;  %v1271_v39 = vpop.f32.mrf.mxu3  ;;  %v3019_v59 = vld [vmem:[%s3133_s26 + $0xc4] sm:$0xff]  }
 0x166   : > { %v1367_v1 = vadd.f32 %v1271_v39, %v945_v56  ;;  %v1651_v56 = vpop.permute.xlu2 %1650 }
 0x168   : > { %v1098_v2 = vpop.f32.mrf.mxu2  ;;  %1421 = vst [vmem:[%s3256_s21 + $0xd0] sm:$0xff] %v1367_v1  ;;  %v1912_v52 = vmul.f32 %v1367_v1, %v1367_v1  ;;  %v1799_v4 = vmul.f32 %v1636_v0, %v1367_v1  ;;  %v680_v7 = vpop.f32.mrf.mxu0 }
 0x169   : > { %v2136_v5 = vmul.f32 %v1636_v0, %v1098_v2  ;;  %v2249_v6 = vmul.f32 %v1098_v2, %v1098_v2  ;;  %v946_v8 = vpop.f32.mrf.mxu1  ;;  %2082 = vst [vmem:[%s3261_s27 + $0xd0] sm:$0xff] %v1098_v2 }
 0x16a   : > { %v1852_v62 = vadd.f32 %v1851_v57, %v1799_v4  ;;  %v1966_v9 = vmul.f32 %v1912_v52, %v1636_v0  ;;  %v947_v15 = vadd.f32 %v946_v8, %v680_v7 }
 0x16b   : > { %v2189_v12 = vadd.f32 %v2188_v60, %v2136_v5  ;;  %v2303_v13 = vmul.f32 %v2249_v6, %v1636_v0 }
 0x16c   : > { %v2019_v49 = vadd.f32 %v2018_v63, %v1966_v9 }
 0x16d   : > { %v2356_v14 = vadd.f32 %v2355_v41, %v2303_v13  ;;  %v1273_v16 = vpop.f32.mrf.mxu3 }
 0x16e   : > { %v1368_v18 = vadd.f32 %v1273_v16, %v947_v15 }
 0x170   : > { %v1100_v20 = vpop.f32.mrf.mxu2  ;;  %1422 = vst [vmem:[%s3256_s21 + $0xd8] sm:$0xff] %v1368_v18  ;;  %v1913_v23 = vmul.f32 %v1368_v18, %v1368_v18  ;;  %v1800_v61 = vmul.f32 %v1641_v17, %v1368_v18  ;;  %v683_v26 = vpop.f32.mrf.mxu0 }
 0x171   : > { %v2137_v24 = vmul.f32 %v1641_v17, %v1100_v20  ;;  %v2250_v25 = vmul.f32 %v1100_v20, %v1100_v20  ;;  %v949_v11 = vpop.f32.mrf.mxu1  ;;  %2083 = vst [vmem:[%s3261_s27 + $0xd8] sm:$0xff] %v1100_v20 }
 0x172   : > { %v950_v28 = vadd.f32 %v949_v11, %v683_v26  ;;  %v1853_v29 = vadd.f32 %v1852_v62, %v1800_v61  ;;  %v1967_v30 = vmul.f32 %v1913_v23, %v1641_v17  ;;  %2683 = vmatmul.msk.bf16.gmra.mxu3 %vm518_vm1, %v3556_v21 }
 0x173   : > { %v2304_v31 = vmul.f32 %v2250_v25, %v1641_v17  ;;  %v2190_v32 = vadd.f32 %v2189_v12, %v2137_v24  ;;  %2580 = vmatmul.msk.bf16.gmra.mxu0 %vm518_vm1, %v3017_v22  ;;  %v1656_v12 = vpop.permute.xlu0 %1655 }
 0x174   : > { %2615 = vmatmul.msk.bf16.gmra.mxu1 %vm518_vm1, %v3511_v35  ;;  %v2020_v33 = vadd.f32 %v2019_v49, %v1967_v30  ;;  %v2834_v30 = vld [vmem:[%s3133_s26 + $0xd8] sm:$0xff]  }
 0x175   : > { %2646 = vmatmul.msk.bf16.gmra.mxu2 %vm518_vm1, %v3017_v22  ;;  %v2357_v34 = vadd.f32 %v2356_v14, %v2304_v31  ;;  %v1276_v3 = vpop.f32.mrf.mxu3  ;;  %v3021_v31 = vld [vmem:[%s3133_s26 + $0xcc] sm:$0xff]  }
 0x176   : > { %v1369_v37 = vadd.f32 %v1276_v3, %v950_v28  ;;  %v1661_v28 = vpop.permute.xlu1 %1660 }
 0x178   : > { %v1103_v38 = vpop.f32.mrf.mxu2  ;;  %1423 = vst [vmem:[%s3256_s21 + $0xe0] sm:$0xff] %v1369_v37  ;;  %v1914_v27 = vmul.f32 %v1369_v37, %v1369_v37  ;;  %v1801_v40 = vmul.f32 %v1646_v36, %v1369_v37  ;;  %v685_v43 = vpop.f32.mrf.mxu0 }
 0x179   : > { %v2138_v19 = vmul.f32 %v1646_v36, %v1103_v38  ;;  %v2251_v42 = vmul.f32 %v1103_v38, %v1103_v38  ;;  %v951_v44 = vpop.f32.mrf.mxu1  ;;  %2084 = vst [vmem:[%s3261_s27 + $0xe0] sm:$0xff] %v1103_v38 }
 0x17a   : > { %v1854_v35 = vadd.f32 %v1853_v29, %v1801_v40  ;;  %v1968_v45 = vmul.f32 %v1914_v27, %v1646_v36  ;;  %v952_v53 = vadd.f32 %v951_v44, %v685_v43 }
 0x17b   : > { %v2191_v47 = vadd.f32 %v2190_v32, %v2138_v19  ;;  %v2305_v48 = vmul.f32 %v2251_v42, %v1646_v36 }
 0x17c   : > { %v2021_v50 = vadd.f32 %v2020_v33, %v1968_v45 }
 0x17d   : > { %v2358_v51 = vadd.f32 %v2357_v34, %v2305_v48  ;;  %v1278_v54 = vpop.f32.mrf.mxu3 }
 0x17e   : > { %v1370_v55 = vadd.f32 %v1278_v54, %v952_v53 }
 0x180   : > { %v1105_v57 = vpop.f32.mrf.mxu2  ;;  %1424 = vst [vmem:[%s3256_s21 + $0xe8] sm:$0xff] %v1370_v55  ;;  %v1802_v60 = vmul.f32 %v1651_v56, %v1370_v55  ;;  %v1915_v63 = vmul.f32 %v1370_v55, %v1370_v55  ;;  %v688_v0 = vpop.f32.mrf.mxu0 }
 0x181   : > { %v2139_v41 = vmul.f32 %v1651_v56, %v1105_v57  ;;  %v2252_v39 = vmul.f32 %v1105_v57, %v1105_v57  ;;  %v954_v1 = vpop.f32.mrf.mxu1  ;;  %2085 = vst [vmem:[%s3261_s27 + $0xe8] sm:$0xff] %v1105_v57 }
 0x182   : > { %v955_v2 = vadd.f32 %v954_v1, %v688_v0  ;;  %v1855_v52 = vadd.f32 %v1854_v35, %v1802_v60  ;;  %v1969_v4 = vmul.f32 %v1915_v63, %v1651_v56  ;;  %2684 = vmatmul.msk.bf16.gmra.mxu3 %vm518_vm1, %v3570_v58 }
 0x183   : > { %v2306_v5 = vmul.f32 %v2252_v39, %v1651_v56  ;;  %v2192_v6 = vadd.f32 %v2191_v47, %v2139_v41  ;;  %2581 = vmatmul.msk.bf16.gmra.mxu0 %vm518_vm1, %v3019_v59  ;;  %v1666_v47 = vpop.permute.xlu2 %1665 }
 0x184   : > { %2616 = vmatmul.msk.bf16.gmra.mxu1 %vm518_vm1, %v3528_v10  ;;  %v2022_v7 = vadd.f32 %v2021_v50, %v1969_v4  ;;  %v2835_v4 = vld [vmem:[%s3133_s26 + $0xe0] sm:$0xff]  }
 0x185   : > { %2647 = vmatmul.msk.bf16.gmra.mxu2 %vm518_vm1, %v3019_v59  ;;  %v2359_v8 = vadd.f32 %v2358_v51, %v2306_v5  ;;  %v1281_v62 = vpop.f32.mrf.mxu3  ;;  %v3023_v5 = vld [vmem:[%s3133_s26 + $0xd4] sm:$0xff]  }
 0x186   : > { %v1371_v9 = vadd.f32 %v1281_v62, %v955_v2  ;;  %v1671_v2 = vpop.permute.xlu0 %1670 }
 0x188   : > { %v1108_v13 = vpop.f32.mrf.mxu2  ;;  %1425 = vst [vmem:[%s3256_s21 + $0xf0] sm:$0xff] %v1371_v9  ;;  %v1803_v49 = vmul.f32 %v1656_v12, %v1371_v9  ;;  %v1916_v14 = vmul.f32 %v1371_v9, %v1371_v9  ;;  %v690_v17 = vpop.f32.mrf.mxu0 }
 0x189   : > { %v2140_v15 = vmul.f32 %v1656_v12, %v1108_v13  ;;  %v2253_v16 = vmul.f32 %v1108_v13, %v1108_v13  ;;  %v956_v18 = vpop.f32.mrf.mxu1  ;;  %2086 = vst [vmem:[%s3261_s27 + $0xf0] sm:$0xff] %v1108_v13 }
 0x18a   : > { %v1856_v10 = vadd.f32 %v1855_v52, %v1803_v49  ;;  %v1970_v20 = vmul.f32 %v1916_v14, %v1656_v12  ;;  %v957_v25 = vadd.f32 %v956_v18, %v690_v17 }
 0x18b   : > { %v2193_v22 = vadd.f32 %v2192_v6, %v2140_v15  ;;  %v2307_v23 = vmul.f32 %v2253_v16, %v1656_v12 }
 0x18c   : > { %v2023_v61 = vadd.f32 %v2022_v7, %v1970_v20 }
 0x18d   : > { %v2360_v24 = vadd.f32 %v2359_v8, %v2307_v23  ;;  %v1283_v26 = vpop.f32.mrf.mxu3 }
 0x18e   : > { %v1372_v11 = vadd.f32 %v1283_v26, %v957_v25 }
 0x190   : > { %v1110_v29 = vpop.f32.mrf.mxu2  ;;  %1426 = vst [vmem:[%s3256_s21 + $0xf8] sm:$0xff] %v1372_v11  ;;  %v1804_v32 = vmul.f32 %v1661_v28, %v1372_v11  ;;  %v1917_v33 = vmul.f32 %v1372_v11, %v1372_v11  ;;  %v693_v36 = vpop.f32.mrf.mxu0 }
 0x191   : > { %v2141_v34 = vmul.f32 %v1661_v28, %v1110_v29  ;;  %v2254_v3 = vmul.f32 %v1110_v29, %v1110_v29  ;;  %v959_v37 = vpop.f32.mrf.mxu1  ;;  %2087 = vst [vmem:[%s3261_s27 + $0xf8] sm:$0xff] %v1110_v29 }
 0x192   : > { %v960_v38 = vadd.f32 %v959_v37, %v693_v36  ;;  %v1857_v27 = vadd.f32 %v1856_v10, %v1804_v32  ;;  %v1971_v40 = vmul.f32 %v1917_v33, %v1661_v28  ;;  %2685 = vmatmul.msk.bf16.gmra.mxu3 %vm518_vm1, %v2834_v30  ;;  %v2691_v37 = vld [vmem:[%s3133_s26 + $0xe8] sm:$0xff] }
 0x193   : > { %v2194_v19 = vadd.f32 %v2193_v22, %v2141_v34  ;;  %v2308_v42 = vmul.f32 %v2254_v3, %v1661_v28  ;;  %2582 = vmatmul.msk.bf16.gmra.mxu0 %vm518_vm1, %v3021_v31  ;;  %v1676_v22 = vpop.permute.xlu1 %1675 }
 0x194   : > { %2617 = vmatmul.msk.bf16.gmra.mxu1 %vm518_vm1, %v3542_v46  ;;  %v2024_v43 = vadd.f32 %v2023_v61, %v1971_v40  ;;  %v3024_v40 = vld [vmem:[%s3133_s26 + $0xdc] sm:$0xff]   ;;  %s2549_s26 = sshll.u32 %s3759_s25, 1 }
 0x195   : > { %v2361_v44 = vadd.f32 %v2360_v24, %v2308_v42  ;;  %2648 = vmatmul.msk.bf16.gmra.mxu2 %vm518_vm1, %v3021_v31  ;;  %v1286_v35 = vpop.f32.mrf.mxu3  ;;  %s302_s28 = scalar_lea.vmem %s3755_s5, %s2549_s26  ;;  %s311_s8 = scalar_lea.vmem %s3757_s7, %s2549_s26 }
 0x196   : > { %v1373_v45 = vadd.f32 %v1286_v35, %v960_v38  ;;  %v1681_v38 = vpop.permute.xlu2 %1680 }
 0x198   : > { %v1113_v48 = vpop.f32.mrf.mxu2  ;;  %1427 = vst [vmem:[%s3256_s21 + $0x100] sm:$0xff] %v1373_v45  ;;  %v1805_v50 = vmul.f32 %v1666_v47, %v1373_v45  ;;  %v1918_v51 = vmul.f32 %v1373_v45, %v1373_v45  ;;  %v695_v55 = vpop.f32.mrf.mxu0 }
 0x199   : > { %v2142_v53 = vmul.f32 %v1666_v47, %v1113_v48  ;;  %v2255_v54 = vmul.f32 %v1113_v48, %v1113_v48  ;;  %v961_v56 = vpop.f32.mrf.mxu1  ;;  %2088 = vst [vmem:[%s3261_s27 + $0x100] sm:$0xff] %v1113_v48 }
 0x19a   : > { %v1858_v46 = vadd.f32 %v1857_v27, %v1805_v50  ;;  %v1972_v57 = vmul.f32 %v1918_v51, %v1666_v47  ;;  %v962_v39 = vadd.f32 %v961_v56, %v695_v55 }
 0x19b   : > { %v2195_v59 = vadd.f32 %v2194_v19, %v2142_v53  ;;  %v2309_v60 = vmul.f32 %v2255_v54, %v1666_v47 }
 0x19c   : > { %v2025_v63 = vadd.f32 %v2024_v43, %v1972_v57  ;;  %v1686_v57 = vpop.permute.xlu0 %1685 }
 0x19d   : > { %v2362_v41 = vadd.f32 %v2361_v44, %v2309_v60  ;;  %v1288_v0 = vpop.f32.mrf.mxu3 }
 0x19e   : > { %v1374_v1 = vadd.f32 %v1288_v0, %v962_v39 }
 0x1a0   : > { %v1115_v52 = vpop.f32.mrf.mxu2  ;;  %1428 = vst [vmem:[%s3256_s21 + $0x108] sm:$0xff] %v1374_v1  ;;  %v1806_v6 = vmul.f32 %v1671_v2, %v1374_v1  ;;  %v1919_v7 = vmul.f32 %v1374_v1, %v1374_v1  ;;  %v698_v9 = vpop.f32.mrf.mxu0 }
 0x1a1   : > { %v2143_v8 = vmul.f32 %v1671_v2, %v1115_v52  ;;  %v2256_v62 = vmul.f32 %v1115_v52, %v1115_v52  ;;  %v964_v12 = vpop.f32.mrf.mxu1  ;;  %2089 = vst [vmem:[%s3261_s27 + $0x108] sm:$0xff] %v1115_v52 }
 0x1a2   : > { %v965_v13 = vadd.f32 %v964_v12, %v698_v9  ;;  %v1859_v49 = vadd.f32 %v1858_v46, %v1806_v6  ;;  %v1973_v14 = vmul.f32 %v1919_v7, %v1671_v2  ;;  %2686 = vmatmul.msk.bf16.gmra.mxu3 %vm518_vm1, %v2835_v4  ;;  %v1691_v9 = vpop.permute.xlu1 %1690 }
 0x1a3   : > { %v2196_v15 = vadd.f32 %v2195_v59, %v2143_v8  ;;  %v2310_v16 = vmul.f32 %v2256_v62, %v1671_v2  ;;  %2583 = vmatmul.msk.bf16.gmra.mxu0 %vm518_vm1, %v3023_v5 }
 0x1a4   : > { %2618 = vmatmul.msk.bf16.gmra.mxu1 %vm518_vm1, %v3556_v21  ;;  %v2026_v17 = vadd.f32 %v2025_v63, %v1973_v14 }
 0x1a5   : > { %v2363_v18 = vadd.f32 %v2362_v41, %v2310_v16  ;;  %2649 = vmatmul.msk.bf16.gmra.mxu2 %vm518_vm1, %v3023_v5  ;;  %v1291_v10 = vpop.f32.mrf.mxu3 }
 0x1a6   : > { %v1375_v20 = vadd.f32 %v1291_v10, %v965_v13 }
 0x1a8   : > { %v1118_v23 = vpop.f32.mrf.mxu2  ;;  %1429 = vst [vmem:[%s3256_s21 + $0x110] sm:$0xff] %v1375_v20  ;;  %v1807_v61 = vmul.f32 %v1676_v22, %v1375_v20  ;;  %v1920_v24 = vmul.f32 %v1375_v20, %v1375_v20  ;;  %v700_v11 = vpop.f32.mrf.mxu0 }
 0x1a9   : > { %v2144_v25 = vmul.f32 %v1676_v22, %v1118_v23  ;;  %v2257_v26 = vmul.f32 %v1118_v23, %v1118_v23  ;;  %v966_v28 = vpop.f32.mrf.mxu1  ;;  %2090 = vst [vmem:[%s3261_s27 + $0x110] sm:$0xff] %v1118_v23 }
 0x1aa   : > { %v1860_v21 = vadd.f32 %v1859_v49, %v1807_v61  ;;  %v1974_v29 = vmul.f32 %v1920_v24, %v1676_v22  ;;  %v967_v34 = vadd.f32 %v966_v28, %v700_v11  ;;  %v1696_v11 = vpop.permute.xlu2 %1695 }
 0x1ab   : > { %v2197_v30 = vadd.f32 %v2196_v15, %v2144_v25  ;;  %v2311_v31 = vmul.f32 %v2257_v26, %v1676_v22 }
 0x1ac   : > { %v2027_v32 = vadd.f32 %v2026_v17, %v1974_v29 }
 0x1ad   : > { %v2364_v33 = vadd.f32 %v2363_v18, %v2311_v31  ;;  %v1293_v3 = vpop.f32.mrf.mxu3 }
 0x1ae   : > { %v1376_v36 = vadd.f32 %v1293_v3, %v967_v34 }
 0x1b0   : > { %v1120_v27 = vpop.f32.mrf.mxu2  ;;  %1430 = vst [vmem:[%s3256_s21 + $0x118] sm:$0xff] %v1376_v36  ;;  %v1808_v19 = vmul.f32 %v1681_v38, %v1376_v36  ;;  %v1921_v42 = vmul.f32 %v1376_v36, %v1376_v36  ;;  %v703_v35 = vpop.f32.mrf.mxu0 }
 0x1b1   : > { %v2145_v43 = vmul.f32 %v1681_v38, %v1120_v27  ;;  %v2258_v44 = vmul.f32 %v1120_v27, %v1120_v27  ;;  %v969_v45 = vpop.f32.mrf.mxu1  ;;  %2091 = vst [vmem:[%s3261_s27 + $0x118] sm:$0xff] %v1120_v27 }
 0x1b2   : > { %v970_v47 = vadd.f32 %v969_v45, %v703_v35  ;;  %v1861_v48 = vadd.f32 %v1860_v21, %v1808_v19  ;;  %v1975_v50 = vmul.f32 %v1921_v42, %v1681_v38  ;;  %2687 = vmatmul.msk.bf16.gmra.mxu3 %vm518_vm1, %v2691_v37 }
 0x1b3   : > { %v2198_v51 = vadd.f32 %v2197_v30, %v2145_v43  ;;  %v2312_v53 = vmul.f32 %v2258_v44, %v1681_v38  ;;  %2584 = vmatmul.msk.bf16.gmra.mxu0 %vm518_vm1, %v3024_v40  ;;  %v1701_v43 = vpop.permute.xlu0 %1700 }
 0x1b4   : > { %2619 = vmatmul.msk.bf16.gmra.mxu1 %vm518_vm1, %v3570_v58  ;;  %v2028_v54 = vadd.f32 %v2027_v32, %v1975_v50 }
 0x1b5   : > { %v2365_v55 = vadd.f32 %v2364_v33, %v2312_v53  ;;  %2650 = vmatmul.msk.bf16.gmra.mxu2 %vm518_vm1, %v3024_v40  ;;  %v1296_v56 = vpop.f32.mrf.mxu3 }
 0x1b6   : > { %v1377_v46 = vadd.f32 %v1296_v56, %v970_v47 }
 0x1b8   : > { %v1123_v59 = vpop.f32.mrf.mxu2  ;;  %1431 = vst [vmem:[%s3256_s21 + $0x120] sm:$0xff] %v1377_v46  ;;  %v1809_v60 = vmul.f32 %v1686_v57, %v1377_v46  ;;  %v1922_v63 = vmul.f32 %v1377_v46, %v1377_v46  ;;  %v705_v0 = vpop.f32.mrf.mxu0 }
 0x1b9   : > { %v2146_v41 = vmul.f32 %v1686_v57, %v1123_v59  ;;  %v2259_v39 = vmul.f32 %v1123_v59, %v1123_v59  ;;  %v971_v1 = vpop.f32.mrf.mxu1  ;;  %2092 = vst [vmem:[%s3261_s27 + $0x120] sm:$0xff] %v1123_v59 }
 0x1ba   : > { %v1862_v2 = vadd.f32 %v1861_v48, %v1809_v60  ;;  %v1976_v52 = vmul.f32 %v1922_v63, %v1686_v57  ;;  %v972_v7 = vadd.f32 %v971_v1, %v705_v0 }
 0x1bb   : > { %v2199_v58 = vadd.f32 %v2198_v51, %v2146_v41  ;;  %v2313_v4 = vmul.f32 %v2259_v39, %v1686_v57  ;;  %v1706_v41 = vpop.permute.xlu1 %1705 }
 0x1bc   : > { %v2029_v5 = vadd.f32 %v2028_v54, %v1976_v52 }
 0x1bd   : > { %v2366_v6 = vadd.f32 %v2365_v55, %v2313_v4  ;;  %v1298_v8 = vpop.f32.mrf.mxu3 }
 0x1be   : > { %v1378_v62 = vadd.f32 %v1298_v8, %v972_v7 }
 0x1c0   : > { %v1125_v12 = vpop.f32.mrf.mxu2  ;;  %1432 = vst [vmem:[%s3256_s21 + $0x128] sm:$0xff] %v1378_v62  ;;  %v1810_v13 = vmul.f32 %v1691_v9, %v1378_v62  ;;  %v1923_v49 = vmul.f32 %v1378_v62, %v1378_v62  ;;  %v708_v16 = vpop.f32.mrf.mxu0 }
 0x1c1   : > { %v2147_v14 = vmul.f32 %v1691_v9, %v1125_v12  ;;  %v2260_v15 = vmul.f32 %v1125_v12, %v1125_v12  ;;  %v974_v17 = vpop.f32.mrf.mxu1  ;;  %2093 = vst [vmem:[%s3261_s27 + $0x128] sm:$0xff] %v1125_v12 }
 0x1c2   : > { %v975_v18 = vadd.f32 %v974_v17, %v708_v16  ;;  %v1863_v10 = vadd.f32 %v1862_v2, %v1810_v13  ;;  %v1977_v20 = vmul.f32 %v1923_v49, %v1691_v9 }
 0x1c3   : > { %v2200_v22 = vadd.f32 %v2199_v58, %v2147_v14  ;;  %v2314_v23 = vmul.f32 %v2260_v15, %v1691_v9  ;;  %v1711_v14 = vpop.permute.xlu2 %1710 }
 0x1c4   : > { %v2030_v61 = vadd.f32 %v2029_v5, %v1977_v20 }
 0x1c5   : > { %v2367_v24 = vadd.f32 %v2366_v6, %v2314_v23  ;;  %v1301_v25 = vpop.f32.mrf.mxu3 }
 0x1c6   : > { %v1379_v26 = vadd.f32 %v1301_v25, %v975_v18 }
 0x1c8   : > { %v1128_v28 = vpop.f32.mrf.mxu2  ;;  %1433 = vst [vmem:[%s3256_s21 + $0x130] sm:$0xff] %v1379_v26  ;;  %v1811_v21 = vmul.f32 %v1696_v11, %v1379_v26  ;;  %v1924_v29 = vmul.f32 %v1379_v26, %v1379_v26  ;;  %v710_v32 = vpop.f32.mrf.mxu0 }
 0x1c9   : > { %v2148_v30 = vmul.f32 %v1696_v11, %v1128_v28  ;;  %v2261_v31 = vmul.f32 %v1128_v28, %v1128_v28  ;;  %v976_v33 = vpop.f32.mrf.mxu1  ;;  %2094 = vst [vmem:[%s3261_s27 + $0x130] sm:$0xff] %v1128_v28 }
 0x1ca   : > { %v1864_v34 = vadd.f32 %v1863_v10, %v1811_v21  ;;  %v1978_v3 = vmul.f32 %v1924_v29, %v1696_v11  ;;  %v977_v40 = vadd.f32 %v976_v33, %v710_v32 }
 0x1cb   : > { %v2201_v36 = vadd.f32 %v2200_v22, %v2148_v30  ;;  %v2315_v37 = vmul.f32 %v2261_v31, %v1696_v11  ;;  %v1716_v30 = vpop.permute.xlu0 %1715 }
 0x1cc   : > { %v2031_v38 = vadd.f32 %v2030_v61, %v1978_v3 }
 0x1cd   : > { %v2368_v27 = vadd.f32 %v2367_v24, %v2315_v37  ;;  %v1303_v19 = vpop.f32.mrf.mxu3 }
 0x1ce   : > { %v1380_v42 = vadd.f32 %v1303_v19, %v977_v40 }
 0x1d0   : > { %v1130_v44 = vpop.f32.mrf.mxu2  ;;  %1434 = vst [vmem:[%s3256_s21 + $0x138] sm:$0xff] %v1380_v42  ;;  %v1812_v35 = vmul.f32 %v1701_v43, %v1380_v42  ;;  %v1925_v45 = vmul.f32 %v1380_v42, %v1380_v42  ;;  %v713_v50 = vpop.f32.mrf.mxu0 }
 0x1d1   : > { %v2149_v47 = vmul.f32 %v1701_v43, %v1130_v44  ;;  %v2262_v48 = vmul.f32 %v1130_v44, %v1130_v44  ;;  %v979_v51 = vpop.f32.mrf.mxu1  ;;  %2095 = vst [vmem:[%s3261_s27 + $0x138] sm:$0xff] %v1130_v44 }
 0x1d2   : > { %v980_v53 = vadd.f32 %v979_v51, %v713_v50  ;;  %v1865_v54 = vadd.f32 %v1864_v34, %v1812_v35  ;;  %v1979_v55 = vmul.f32 %v1925_v45, %v1701_v43 }
 0x1d3   : > { %v2202_v56 = vadd.f32 %v2201_v36, %v2149_v47  ;;  %v2316_v46 = vmul.f32 %v2262_v48, %v1701_v43 }
 0x1d4   : > { %v2032_v57 = vadd.f32 %v2031_v38, %v1979_v55 }
 0x1d5   : > { %v2369_v59 = vadd.f32 %v2368_v27, %v2316_v46  ;;  %v1306_v60 = vpop.f32.mrf.mxu3 }
 0x1d6   : > { %v1381_v63 = vadd.f32 %v1306_v60, %v980_v53 }
 0x1d8   : > { %v1133_v39 = vpop.f32.mrf.mxu2  ;;  %1435 = vst [vmem:[%s3256_s21 + $0x140] sm:$0xff] %v1381_v63  ;;  %v1813_v0 = vmul.f32 %v1706_v41, %v1381_v63  ;;  %v1926_v1 = vmul.f32 %v1381_v63, %v1381_v63  ;;  %v715_v58 = vpop.f32.mrf.mxu0 }
 0x1d9   : > { %v2150_v2 = vmul.f32 %v1706_v41, %v1133_v39  ;;  %v2263_v52 = vmul.f32 %v1133_v39, %v1133_v39  ;;  %v981_v4 = vpop.f32.mrf.mxu1  ;;  %2096 = vst [vmem:[%s3261_s27 + $0x140] sm:$0xff] %v1133_v39 }
 0x1da   : > { %v1866_v5 = vadd.f32 %v1865_v54, %v1813_v0  ;;  %v1980_v6 = vmul.f32 %v1926_v1, %v1706_v41  ;;  %v982_v12 = vadd.f32 %v981_v4, %v715_v58 }
 0x1db   : > { %v2203_v7 = vadd.f32 %v2202_v56, %v2150_v2  ;;  %v2317_v8 = vmul.f32 %v2263_v52, %v1706_v41 }
 0x1dc   : > { %v2033_v62 = vadd.f32 %v2032_v57, %v1980_v6 }
 0x1dd   : > { %v2370_v9 = vadd.f32 %v2369_v59, %v2317_v8  ;;  %v1308_v13 = vpop.f32.mrf.mxu3 }
 0x1de   : > { %v1382_v49 = vadd.f32 %v1308_v13, %v982_v12 }
 0x1e0   : > { %v1135_v15 = vpop.f32.mrf.mxu2  ;;  %1436 = vst [vmem:[%s3256_s21 + $0x148] sm:$0xff] %v1382_v49  ;;  %v1814_v16 = vmul.f32 %v1711_v14, %v1382_v49  ;;  %v1927_v17 = vmul.f32 %v1382_v49, %v1382_v49  ;;  %v718_v20 = vpop.f32.mrf.mxu0 }
 0x1e1   : > { %v2151_v18 = vmul.f32 %v1711_v14, %v1135_v15  ;;  %v2264_v10 = vmul.f32 %v1135_v15, %v1135_v15  ;;  %v984_v22 = vpop.f32.mrf.mxu1  ;;  %2097 = vst [vmem:[%s3261_s27 + $0x148] sm:$0xff] %v1135_v15 }
 0x1e2   : > { %v985_v23 = vadd.f32 %v984_v22, %v718_v20  ;;  %v1867_v61 = vadd.f32 %v1866_v5, %v1814_v16  ;;  %v1981_v24 = vmul.f32 %v1927_v17, %v1711_v14  ;;  %v1721_v17 = vpop.permute.xlu1 %1720 }
 0x1e3   : > { %v2204_v25 = vadd.f32 %v2203_v7, %v2151_v18  ;;  %v2318_v26 = vmul.f32 %v2264_v10, %v1711_v14 }
 0x1e4   : > { %v2034_v11 = vadd.f32 %v2033_v62, %v1981_v24  ;;  %v1726_v24 = vpop.permute.xlu2 %1725 }
 0x1e5   : > { %v2371_v28 = vadd.f32 %v2370_v9, %v2318_v26  ;;  %v1311_v21 = vpop.f32.mrf.mxu3 }
 0x1e6   : > { %v1383_v29 = vadd.f32 %v1311_v21, %v985_v23  ;;  %v1731_v21 = vpop.permute.xlu0 %1730 }
 0x1e8   : > { %v1138_v31 = vpop.f32.mrf.mxu2  ;;  %1437 = vst [vmem:[%s3256_s21 + $0x150] sm:$0xff] %v1383_v29  ;;  %v1815_v32 = vmul.f32 %v1716_v30, %v1383_v29  ;;  %v1928_v33 = vmul.f32 %v1383_v29, %v1383_v29  ;;  %v720_v36 = vpop.f32.mrf.mxu0 }
 0x1e9   : > { %v2152_v34 = vmul.f32 %v1716_v30, %v1138_v31  ;;  %v2265_v3 = vmul.f32 %v1138_v31, %v1138_v31  ;;  %v986_v37 = vpop.f32.mrf.mxu1  ;;  %2098 = vst [vmem:[%s3261_s27 + $0x150] sm:$0xff] %v1138_v31 }
 0x1ea   : > { %v3628_v38 = vadd.f32 %v1867_v61, %v1815_v32  ;;  %v1982_v27 = vmul.f32 %v1928_v33, %v1716_v30  ;;  %v987_v44 = vadd.f32 %v986_v37, %v720_v36  ;;  %v1736_v31 = vpop.permute.xlu1 %1735 }
 0x1eb   : > { %v3630_v40 = vadd.f32 %v2204_v25, %v2152_v34  ;;  %v2319_v19 = vmul.f32 %v2265_v3, %v1716_v30 }
 0x1ec   : > { %v3632_v42 = vadd.f32 %v2034_v11, %v1982_v27 }
 0x1ed   : > { %v3634_v43 = vadd.f32 %v2371_v28, %v2319_v19  ;;  %v1313_v35 = vpop.f32.mrf.mxu3 }
 0x1ee   : > { %v1384_v45 = vadd.f32 %v1313_v35, %v987_v44 }
 0x1f0   : > { %v1140_v47 = vpop.f32.mrf.mxu2  ;;  %1438 = vst [vmem:[%s3256_s21 + $0x158] sm:$0xff] %v1384_v45  ;;  %v723_v48 = vpop.f32.mrf.mxu0  ;;  %v1929_v25 = vmul.f32 %v1384_v45, %v1384_v45  ;;  %v1816_v29 = vmul.f32 %v1721_v17, %v1384_v45 }
 0x1f1   : > { %v989_v50 = vpop.f32.mrf.mxu1  ;;  %2099 = vst [vmem:[%s3261_s27 + $0x158] sm:$0xff] %v1140_v47  ;;  %v2266_v26 = vmul.f32 %v1140_v47, %v1140_v47  ;;  %v2153_v30 = vmul.f32 %v1721_v17, %v1140_v47 }
 0x1f2   : > { %v990_v51 = vadd.f32 %v989_v50, %v723_v48  ;;  %v1983_v32 = vmul.f32 %v1929_v25, %v1721_v17  ;;  %v1869_v47 = vadd.f32 %v3628_v38, %v1816_v29 }
 0x1f3   : > { %v2320_v3 = vmul.f32 %v2266_v26, %v1721_v17  ;;  %v2206_v48 = vadd.f32 %v3630_v40, %v2153_v30 }
 0x1f5   : > { %v1316_v53 = vpop.f32.mrf.mxu3  ;;  %v2373_v38 = vadd.f32 %v3634_v43, %v2320_v3 }
 0x1f6   : > { %v1385_v54 = vadd.f32 %v1316_v53, %v990_v51 }
 0x1f8   : > { %v3638_v55 = vpop.f32.mrf.mxu2  ;;  %1439 = vst [vmem:[%s3256_s21 + $0x160] sm:$0xff] %v1385_v54  ;;  %v725_v56 = vpop.f32.mrf.mxu0  ;;  %v1930_v28 = vmul.f32 %v1385_v54, %v1385_v54  ;;  %v1817_v36 = vmul.f32 %v1726_v24, %v1385_v54  ;;  %v2036_v54 = vadd.f32 %v3632_v42, %v1983_v32 }
 0x1f9   : > { %v991_v46 = vpop.f32.mrf.mxu1  ;;  %2100 = vst [vmem:[%s3261_s27 + $0x160] sm:$0xff] %v3638_v55  ;;  %v2267_v33 = vmul.f32 %v3638_v55, %v3638_v55  ;;  %v2154_v44 = vmul.f32 %v1726_v24, %v3638_v55 }
 0x1fa   : > { %v992_v57 = vadd.f32 %v991_v46, %v725_v56  ;;  %v1984_v19 = vmul.f32 %v1930_v28, %v1726_v24 }
 0x1fb   : > { %v2321_v56 = vmul.f32 %v2267_v33, %v1726_v24 }
 0x1fd   : > { %v1318_v59 = vpop.f32.mrf.mxu3 }
 0x1fe   : > { %v3643_v60 = vadd.f32 %v1318_v59, %v992_v57  ;;  %v1870_v57 = vadd.f32 %v1869_v47, %v1817_v36 }
 0x200   : > { %v3645_v63 = vpop.f32.mrf.mxu2  ;;  %1440 = vst [vmem:[%s3256_s21 + $0x168] sm:$0xff] %v3643_v60  ;;  %v728_v41 = vpop.f32.mrf.mxu0  ;;  %v1931_v37 = vmul.f32 %v3643_v60, %v3643_v60  ;;  %v1818_v55 = vmul.f32 %v1731_v21, %v3643_v60 }
 0x201   : > { %v994_v39 = vpop.f32.mrf.mxu1  ;;  %2101 = vst [vmem:[%s3261_s27 + $0x168] sm:$0xff] %v3645_v63  ;;  %v2268_v35 = vmul.f32 %v3645_v63, %v3645_v63  ;;  %v2155_v46 = vmul.f32 %v1731_v21, %v3645_v63 }
 0x202   : > { %v995_v0 = vadd.f32 %v994_v39, %v728_v41  ;;  %v1985_v40 = vmul.f32 %v1931_v37, %v1731_v21  ;;  %v1741_v41 = vpop.permute.xlu2 %1740  ;;  %v2037_v39 = vadd.f32 %v2036_v54, %v1984_v19  ;;  %v1871_v43 = vadd.f32 %v1870_v57, %v1818_v55 }
 0x205   : > { %v1321_v1 = vpop.f32.mrf.mxu3 }
 0x206   : > { %v3651_v2 = vadd.f32 %v1321_v1, %v995_v0  ;;  %v2207_v0 = vadd.f32 %v2206_v48, %v2154_v44  ;;  %v2322_v1 = vmul.f32 %v2268_v35, %v1731_v21 }
 0x208   : > { %v3653_v52 = vpop.f32.mrf.mxu2  ;;  %1441 = vst [vmem:[%s3256_s21 + $0x170] sm:$0xff] %v3651_v2  ;;  %v730_v58 = vpop.f32.mrf.mxu0  ;;  %v1932_v50 = vmul.f32 %v3651_v2, %v3651_v2  ;;  %v1819_v60 = vmul.f32 %v1736_v31, %v3651_v2 }
 0x209   : > { %v996_v4 = vpop.f32.mrf.mxu1  ;;  %2102 = vst [vmem:[%s3261_s27 + $0x170] sm:$0xff] %v3653_v52  ;;  %v2269_v59 = vmul.f32 %v3653_v52, %v3653_v52  ;;  %v2156_v63 = vmul.f32 %v1736_v31, %v3653_v52 }
 0x20a   : > { %v997_v5 = vadd.f32 %v996_v4, %v730_v58  ;;  %v1986_v58 = vmul.f32 %v1932_v50, %v1736_v31  ;;  %v1872_v25 = vadd.f32 %v1871_v43, %v1819_v60  ;;  %v1756_v47 = vpop.permute.xlu2 %1755 }
 0x20d   : > { %v1323_v6 = vpop.f32.mrf.mxu3 }
 0x20e   : > { %v3659_v7 = vadd.f32 %v1323_v6, %v997_v5  ;;  %v2374_v5 = vadd.f32 %v2373_v38, %v2321_v56  ;;  %v2208_v6 = vadd.f32 %v2207_v0, %v2155_v46 }
 0x210   : > { %v3661_v8 = vpop.f32.mrf.mxu2  ;;  %1442 = vst [vmem:[%s3256_s21 + $0x178] sm:$0xff] %v3659_v7  ;;  %v733_v62 = vpop.f32.mrf.mxu0  ;;  %v1933_v42 = vmul.f32 %v3659_v7, %v3659_v7  ;;  %v2375_v24 = vadd.f32 %v2374_v5, %v2322_v1 }
 0x211   : > { %v999_v9 = vpop.f32.mrf.mxu1  ;;  %2103 = vst [vmem:[%s3261_s27 + $0x178] sm:$0xff] %v3661_v8  ;;  %v2157_v52 = vmul.f32 %v1741_v41, %v3661_v8 }
 0x212   : > { %v1000_v12 = vadd.f32 %v999_v9, %v733_v62  ;;  %v2270_v62 = vmul.f32 %v3661_v8, %v3661_v8  ;;  %v1987_v2 = vmul.f32 %v1933_v42, %v1741_v41 }
 0x214   : > { %v2324_v21 = vmul.f32 %v2270_v62, %v1741_v41 }
 0x215   : > { %v1326_v13 = vpop.f32.mrf.mxu3 }
 0x216   : > { %v3667_v49 = vadd.f32 %v1326_v13, %v1000_v12  ;;  %v1746_v12 = vpop.permute.xlu0 %1745  ;;  %v2038_v13 = vadd.f32 %v2037_v39, %v1985_v40 }
 0x218   : > { %v3669_v14 = vpop.f32.mrf.mxu2  ;;  %1443 = vst [vmem:[%s3256_s21 + $0x180] sm:$0xff] %v3667_v49  ;;  %v735_v15 = vpop.f32.mrf.mxu0  ;;  %v2039_v26 = vadd.f32 %v2038_v13, %v1986_v58  ;;  %v1821_v29 = vmul.f32 %v1746_v12, %v3667_v49 }
 0x219   : > { %v1001_v16 = vpop.f32.mrf.mxu1  ;;  %2104 = vst [vmem:[%s3261_s27 + $0x180] sm:$0xff] %v3669_v14  ;;  %v2158_v30 = vmul.f32 %v1746_v12, %v3669_v14 }
 0x21a   : > { %v1002_v18 = vadd.f32 %v1001_v16, %v735_v15  ;;  %v2323_v15 = vmul.f32 %v2269_v59, %v1736_v31  ;;  %v1820_v16 = vmul.f32 %v1741_v41, %v3659_v7  ;;  %v2040_v3 = vadd.f32 %v2039_v26, %v1987_v2  ;;  %v1771_v26 = vpop.permute.xlu2 %1770 }
 0x21c   : > { %v2376_v31 = vadd.f32 %v2375_v24, %v2323_v15  ;;  %v1873_v32 = vadd.f32 %v1872_v25, %v1820_v16 }
 0x21d   : > { %v1328_v10 = vpop.f32.mrf.mxu3 }
 0x21e   : > { %v3675_v20 = vadd.f32 %v1328_v10, %v1002_v18  ;;  %v1751_v18 = vpop.permute.xlu1 %1750  ;;  %v1934_v10 = vmul.f32 %v3667_v49, %v3667_v49  ;;  %v2377_v48 = vadd.f32 %v2376_v31, %v2324_v21  ;;  %v1874_v50 = vadd.f32 %v1873_v32, %v1821_v29  ;;  %v1761_v41 = vpop.permute.xlu0 %1760 }
 0x220   : > { %v3677_v22 = vpop.f32.mrf.mxu2  ;;  %1444 = vst [vmem:[%s3256_s21 + $0x188] sm:$0xff] %v3675_v20  ;;  %v738_v23 = vpop.f32.mrf.mxu0  ;;  %v1935_v8 = vmul.f32 %v3675_v20, %v3675_v20  ;;  %v1988_v37 = vmul.f32 %v1934_v10, %v1746_v12  ;;  %v1822_v44 = vmul.f32 %v1751_v18, %v3675_v20 }
 0x221   : > { %v1004_v61 = vpop.f32.mrf.mxu1  ;;  %2105 = vst [vmem:[%s3261_s27 + $0x188] sm:$0xff] %v3677_v22  ;;  %v2272_v33 = vmul.f32 %v3677_v22, %v3677_v22  ;;  %v2159_v49 = vmul.f32 %v1751_v18, %v3677_v22 }
 0x222   : > { %v1005_v11 = vadd.f32 %v1004_v61, %v738_v23  ;;  %v2271_v23 = vmul.f32 %v3669_v14, %v3669_v14  ;;  %v2041_v46 = vadd.f32 %v2040_v3, %v1988_v37  ;;  %v1875_v39 = vadd.f32 %v1874_v50, %v1822_v44 }
 0x223   : > { %v2326_v56 = vmul.f32 %v2272_v33, %v1751_v18 }
 0x224   : > { %v2325_v19 = vmul.f32 %v2271_v23, %v1746_v12 }
 0x225   : > { %v1331_v34 = vpop.f32.mrf.mxu3 }
 0x226   : > { %v3687_v27 = vadd.f32 %v1331_v34, %v1005_v11  ;;  %v2209_v11 = vadd.f32 %v2208_v6, %v2156_v63  ;;  %v2378_v38 = vadd.f32 %v2377_v48, %v2325_v19  ;;  %v1766_v5 = vpop.permute.xlu1 %1765 }
 0x228   : > { %v3692_v45 = vpop.f32.mrf.mxu2  ;;  %1445 = vst [vmem:[%s3256_s21 + $0x190] sm:$0xff] %v3687_v27  ;;  %v740_v51 = vpop.f32.mrf.mxu0  ;;  %v2210_v36 = vadd.f32 %v2209_v11, %v2157_v52  ;;  %v1936_v14 = vmul.f32 %v3687_v27, %v3687_v27  ;;  %v1823_v55 = vmul.f32 %v1756_v47, %v3687_v27  ;;  %v2379_v6 = vadd.f32 %v2378_v38, %v2326_v56 }
 0x229   : > { %v1006_v53 = vpop.f32.mrf.mxu1  ;;  %2106 = vst [vmem:[%s3261_s27 + $0x190] sm:$0xff] %v3692_v45  ;;  %v2273_v35 = vmul.f32 %v3692_v45, %v3692_v45  ;;  %v2160_v20 = vmul.f32 %v1756_v47, %v3692_v45 }
 0x22a   : > { %v1007_v4 = vadd.f32 %v1006_v53, %v740_v51  ;;  %v2211_v51 = vadd.f32 %v2210_v36, %v2158_v30  ;;  %v1989_v53 = vmul.f32 %v1935_v8, %v1751_v18  ;;  %v1990_v1 = vmul.f32 %v1936_v14, %v1756_v47 }
 0x22b   : > { %v2327_v42 = vmul.f32 %v2273_v35, %v1756_v47  ;;  %v1876_v62 = vadd.f32 %v1875_v39, %v1823_v55 }
 0x22c   : > { %v2212_v0 = vadd.f32 %v2211_v51, %v2159_v49  ;;  %v2042_v43 = vadd.f32 %v2041_v46, %v1989_v53 }
 0x22d   : > { %v1333_v9 = vpop.f32.mrf.mxu3  ;;  %v2380_v2 = vadd.f32 %v2379_v6, %v2327_v42 }
 0x22e   : > { %v1392_v17 = vadd.f32 %v1333_v9, %v1007_v4  ;;  %v2213_v9 = vadd.f32 %v2212_v0, %v2160_v20  ;;  %v2043_v18 = vadd.f32 %v2042_v43, %v1990_v1 }
 0x230   : > { %v1160_v61 = vpop.f32.mrf.mxu2  ;;  %1446 = vst [vmem:[%s3256_s21 + $0x198] sm:$0xff] %v1392_v17  ;;  %v743_v28 = vpop.f32.mrf.mxu0  ;;  %v1937_v57 = vmul.f32 %v1392_v17, %v1392_v17  ;;  %v1824_v60 = vmul.f32 %v1761_v41, %v1392_v17 }
 0x231   : > { %v1009_v7 = vpop.f32.mrf.mxu1  ;;  %2107 = vst [vmem:[%s3261_s27 + $0x198] sm:$0xff] %v1160_v61  ;;  %v2274_v40 = vmul.f32 %v1160_v61, %v1160_v61  ;;  %v2161_v58 = vmul.f32 %v1761_v41, %v1160_v61 }
 0x232   : > { %v1010_v34 = vadd.f32 %v1009_v7, %v743_v28  ;;  %v1991_v12 = vmul.f32 %v1937_v57, %v1761_v41  ;;  %v1877_v17 = vadd.f32 %v1876_v62, %v1824_v60 }
 0x233   : > { %v2328_v13 = vmul.f32 %v2274_v40, %v1761_v41  ;;  %v2214_v10 = vadd.f32 %v2213_v9, %v2161_v58 }
 0x234   : > { %v2044_v11 = vadd.f32 %v2043_v18, %v1991_v12 }
 0x235   : > { %v1336_v54 = vpop.f32.mrf.mxu3  ;;  %v2381_v28 = vadd.f32 %v2380_v2, %v2328_v13 }
 0x236   : > { %v1393_v22 = vadd.f32 %v1336_v54, %v1010_v34 }
 0x238   : > { %v1163_v59 = vpop.f32.mrf.mxu2  ;;  %1447 = vst [vmem:[%s3256_s21 + $0x1a0] sm:$0xff] %v1393_v22  ;;  %v1938_v63 = vmul.f32 %v1393_v22, %v1393_v22  ;;  %v745_v4 = vpop.f32.mrf.mxu0  ;;  %v1825_v15 = vmul.f32 %v1766_v5, %v1393_v22 }
 0x239   : > { %2108 = vst [vmem:[%s3261_s27 + $0x1a0] sm:$0xff] %v1163_v59  ;;  %v2275_v27 = vmul.f32 %v1163_v59, %v1163_v59  ;;  %v1011_v45 = vpop.f32.mrf.mxu1  ;;  %v2162_v16 = vmul.f32 %v1766_v5, %v1163_v59 }
 0x23a   : > { %v1012_v52 = vadd.f32 %v1011_v45, %v745_v4  ;;  %v1992_v23 = vmul.f32 %v1938_v63, %v1766_v5  ;;  %v1878_v7 = vadd.f32 %v1877_v17, %v1825_v15 }
 0x23b   : > { %v2329_v61 = vmul.f32 %v2275_v27, %v1766_v5  ;;  %v2215_v21 = vadd.f32 %v2214_v10, %v2162_v16 }
 0x23c   : > { %v2045_v33 = vadd.f32 %v2044_v11, %v1992_v23 }
 0x23d   : > { %v1338_v24 = vpop.f32.mrf.mxu3  ;;  %v2382_v34 = vadd.f32 %v2381_v28, %v2329_v61 }
 0x23e   : > { %v1394_v25 = vadd.f32 %v1338_v24, %v1012_v52 }
 0x240   : > { %v1165_v29 = vpop.f32.mrf.mxu2  ;;  %1448 = vst [vmem:[%s3256_s21 + $0x1a8] sm:$0xff] %v1394_v25  ;;  %v1826_v30 = vmul.f32 %v1771_v26, %v1394_v25  ;;  %v1939_v8 = vmul.f32 %v1394_v25, %v1394_v25 }
 0x241   : > { %v2163_v31 = vmul.f32 %v1771_v26, %v1165_v29  ;;  %v2276_v32 = vmul.f32 %v1165_v29, %v1165_v29  ;;  %2109 = vst [vmem:[%s3261_s27 + $0x1a8] sm:$0xff] %v1165_v29 }
 0x242   : > { %v1879_v3 = vadd.f32 %v1878_v7, %v1826_v30  ;;  %v1993_v36 = vmul.f32 %v1939_v8, %v1771_v26 }
 0x243   : > { %v2216_v37 = vadd.f32 %v2215_v21, %v2163_v31  ;;  %v2330_v19 = vmul.f32 %v2276_v32, %v1771_v26 }
 0x244   : > { %v1880_v44 = vrot.slane %v1879_v3, 4  ;;  %v2046_v49 = vadd.f32 %v2045_v33, %v1993_v36 }
 0x245   : > { %v2217_v14 = vrot.slane %v2216_v37, 4  ;;  %v2383_v35 = vadd.f32 %v2382_v34, %v2330_v19 }
 0x246   : > { %v1881_v47 = vadd.f32 %v1880_v44, %v1879_v3  ;;  %v2047_v48 = vrot.slane %v2046_v49, 4 }
 0x247   : > { %v2218_v50 = vadd.f32 %v2217_v14, %v2216_v37  ;;  %v2384_v51 = vrot.slane %v2383_v35, 4 }
 0x248   : > { %v1882_v53 = vrot.slane %v1881_v47, 2  ;;  %v2048_v54 = vadd.f32 %v2047_v48, %v2046_v49 }
 0x249   : > { %v2219_v56 = vrot.slane %v2218_v50, 2  ;;  %v2385_v55 = vadd.f32 %v2384_v51, %v2383_v35 }
 0x24a   : > { %v1883_v20 = vadd.f32 %v1882_v53, %v1881_v47  ;;  %v2049_v22 = vrot.slane %v2048_v54, 2 }
 0x24b   : > { %v2220_v46 = vadd.f32 %v2219_v56, %v2218_v50  ;;  %v2386_v38 = vrot.slane %v2385_v55, 2 }
 0x24c   : > { %v1884_v57 = vrot.slane %v1883_v20, 1  ;;  %v2050_v40 = vadd.f32 %v2049_v22, %v2048_v54 }
 0x24d   : > { %v2221_v59 = vrot.slane %v2220_v46, 1  ;;  %v2387_v41 = vadd.f32 %v2386_v38, %v2385_v55 }
 0x24e   : > { %v2051_v39 = vrot.slane %v2050_v40, 1  ;;  %v1885_v1 = vadd.f32 %v1884_v57, %v1883_v20 }
 0x24f   : > { %v2388_v0 = vrot.slane %v2387_v41, 1  ;;  %v2222_v60 = vadd.f32 %v2221_v59, %v2220_v46 }
 0x250   : > { %v2052_v42 = vadd.f32 %v2051_v39, %v2050_v40 }
 0x251   : > { %v2389_v58 = vadd.f32 %v2388_v0, %v2387_v41 }
 0x252   : > { %v2054_v63 = vsel %vm2053_vm2, %v1885_v1, %v2052_v42 }
 0x253   : > { %v2390_v27 = vsel %vm2053_vm2, %v2222_v60, %v2389_v58  ;;  %2055 = vst [vmem:[%s302_s28] sm:$0x3] %v2054_v63 }
 0x254   : > { %2391 = vst [vmem:[%s311_s8] sm:$0x3] %v2390_v27 }
 0x255 PF: > { %s18_s24 = sadd.s32 1, %s3045_s24  }
 0x256   : > { %p15_p4 = scmp.ge.s32.totalorder %s18_s24, 4  }
 0x258   :  { %17 = sbr.rel (!%p15_p4) target bundleno = 1 (0x1), region = 104 }

// kernel: basic_block_forward.4
= control target key start
LH: loop header
LB: loop body
LE: loop exit
PB: predicated region body
PF: predicated region fallthrough
CT: control target
= control target key end

     0   :  { %s3582_s21 = smov 0   ;;  %s4737_s0 = inlined_call_operand.vmem [shape: f32[2,18,24,128], index: 0, kind: input, shape index: {}]   ;;  %s4738_s1 = inlined_call_operand.vmem [shape: f32[1,128], index: 1, kind: input, shape index: {}]   ;;  %s4739_s2 = inlined_call_operand.vmem [shape: f32[1,128], index: 2, kind: input, shape index: {}]   ;;  %s4740_s3 = inlined_call_operand.vmem [shape: f32[18,24,1], index: 3, kind: input, shape index: {}]   ;;  %s4741_s4 = inlined_call_operand.vmem [shape: bf16[3,384,128], index: 4, kind: input, shape index: {}]   ;;  %s4742_s5 = inlined_call_operand.vmem [shape: f32[2,256,128], index: 5, kind: output, shape index: {0}]   ;;  %s4743_s6 = inlined_call_operand.vmem [shape: f32[2,2,128], index: 6, kind: output, shape index: {1}]  }
   0x1 LB: > { %s3027_s22 = sadd.s32 4294967295, %s3544_s21   ;;  %p3031_p0 = scmp.ge.s32.totalorder %s3544_s21, 1  ;;  %s3544_s21 = sphi %s3582_s21, %s17_s21  }
   0x2   : > { %p215_p1 = scmp.lt.s32.totalorder %s3544_s21, 3 }
   0x4   : > { %p216_p2 = pnand %p3031_p0, %p215_p1 }
   0x6   : > { %219 = sbr.rel (%p216_p2) target bundleno = 885 (0x375), region = 40 }
   0xb   : > { %v526_v0 = vld [vmem:[%s4740_s3 + $0x138] sm:$0xff]  ;;  %v3546_v3 = vmov 0   ;;  %v527_v4 = vld [vmem:[%s4740_s3 + $0x140] sm:$0xff]  ;;  %v517_v9 = vld [vmem:[%s4740_s3 + $0xf0] sm:$0xff]  ;;  %p249_p3 = scmp.lt.s32.totalorder %s3027_s22, 1  ;;  %vm1316_vm0 = vcmask 1046528  }
   0xc   : > { %v514_v1 = vld [vmem:[%s4740_s3 + $0xd8] sm:$0xff]  ;;  %3531 = vset.pattern.permute.xlu2 %v3546_v3  ;;  %3530 = vset.pattern.permute.xlu1 %v3546_v3  ;;  %v515_v5 = vld [vmem:[%s4740_s3 + $0xe0] sm:$0xff]  ;;  %v529_v10 = vld [vmem:[%s4740_s3 + $0x150] sm:$0xff]  ;;  %vm1081_vm1 = vsmask.f32 7424  ;;  %vm2938_vm2 = vcmask 1040384  }
   0xd   : > { %v490_v2 = vld [vmem:[%s4740_s3 + $0x18] sm:$0xff]  ;;  %3529 = vset.pattern.permute.xlu0 %v3546_v3  ;;  %738 = vperm.xlu1 %3530, %v526_v0   ;;  %v491_v6 = vld [vmem:[%s4740_s3 + $0x20] sm:$0xff]  ;;  %v493_v14 = vld [vmem:[%s4740_s3 + $0x30] sm:$0xff]  ;;  %s4844_s22 = smov (!%p249_p3, %s3027_s22), 1 }
   0xe   : > { %678 = vperm.xlu0 %3529, %v514_v1   ;;  %558 = vperm.xlu2 %3531, %v490_v2   ;;  %v503_v7 = vld [vmem:[%s4740_s3 + $0x80] sm:$0xff]  ;;  %v502_v8 = vld [vmem:[%s4740_s3 + $0x78] sm:$0xff]  ;;  %v505_v15 = vld [vmem:[%s4740_s3 + $0x90] sm:$0xff]  ;;  %s3519_s27 = smul.u32 432, %s4844_s22  ;;  %s3422_s7 = sshll.u32 %s4844_s22, 8 }
   0xf   : > { %v518_v11 = vld [vmem:[%s4740_s3 + $0xf8] sm:$0xff]  ;;  %v520_v16 = vld [vmem:[%s4740_s3 + $0x108] sm:$0xff]  ;;  %v521_v18 = vld [vmem:[%s4740_s3 + $0x110] sm:$0xff]  ;;  %s4627_s11 = scalar_lea.vmem %s4742_s5, %s3422_s7 }
  0x10   : > { %v530_v12 = vld [vmem:[%s4740_s3 + $0x158] sm:$0xff]  ;;  %v533_v19 = vld [vmem:[%s4740_s3 + $0x170] sm:$0xff]  ;;  %v532_v20 = vld [vmem:[%s4740_s3 + $0x168] sm:$0xff]  ;;  %s3708_s8 = scalar_lea.vmem %s4737_s0, %s3519_s27 }
  0x11   : > { %v494_v13 = vld [vmem:[%s4740_s3 + $0x38] sm:$0xff]  ;;  %v496_v21 = vld [vmem:[%s4740_s3 + $0x48] sm:$0xff]  ;;  %v497_v24 = vld [vmem:[%s4740_s3 + $0x50] sm:$0xff] }
  0x12   : > { %v506_v17 = vld [vmem:[%s4740_s3 + $0x98] sm:$0xff]  ;;  %v508_v23 = vld [vmem:[%s4740_s3 + $0xa8] sm:$0xff]  ;;  %v509_v25 = vld [vmem:[%s4740_s3 + $0xb0] sm:$0xff] }
  0x13   : > { %v3454_v22 = vld [vmem:[%s4741_s4 + $0xf8] sm:$0xff]  ;;  %v3453_v26 = vld [vmem:[%s4741_s4 + $0xf0] sm:$0xff]  ;;  %v524_v27 = vld [vmem:[%s4740_s3 + $0x128] sm:$0xff] }
  0x14   : > { %1630 = vmatpush.bf16.msra.mxu0 %v3454_v22  ;;  %3496 = vmatpush.bf16.msra.mxu2 %v3454_v22  ;;  %v523_v28 = vld [vmem:[%s4740_s3 + $0x120] sm:$0xff]  ;;  %v3452_v30 = vld [vmem:[%s4741_s4 + $0xe8] sm:$0xff]  ;;  %v3450_v35 = vld [vmem:[%s4741_s4 + $0xd8] sm:$0xff] }
  0x15   : > { %743 = vperm.xlu1 %3530, %v527_v4   ;;  %3497 = vmatpush.bf16.msra.mxu3 %v3454_v22  ;;  %v535_v29 = vld [vmem:[%s4740_s3 + $0x180] sm:$0xff]  ;;  %v536_v33 = vld [vmem:[%s4740_s3 + $0x188] sm:$0xff]  ;;  %v3449_v36 = vld [vmem:[%s4741_s4 + $0xd0] sm:$0xff] }
  0x16   : > { %683 = vperm.xlu0 %3529, %v515_v5   ;;  %563 = vperm.xlu2 %3531, %v491_v6   ;;  %v3451_v31 = vld [vmem:[%s4741_s4 + $0xe0] sm:$0xff]  ;;  %v500_v34 = vld [vmem:[%s4740_s3 + $0x68] sm:$0xff]  ;;  %v266_v42 = vld [vmem:[%s3708_s8 + $0x18] sm:$0xff] }
  0x17   : > { %3495 = vmatpush.bf16.msra.mxu1 %v3454_v22  ;;  %v499_v32 = vld [vmem:[%s4740_s3 + $0x60] sm:$0xff]  ;;  %v512_v37 = vld [vmem:[%s4740_s3 + $0xc8] sm:$0xff]  ;;  %v489_v48 = vld [vmem:[%s4740_s3 + $0x10] sm:$0xff] }
  0x18   : > { %1631 = vmatpush.bf16.msra.mxu0 %v3453_v26  ;;  %3499 = vmatpush.bf16.msra.mxu2 %v3453_v26  ;;  %v511_v38 = vld [vmem:[%s4740_s3 + $0xc0] sm:$0xff]  ;;  %v492_v39 = vld [vmem:[%s4740_s3 + $0x28] sm:$0xff]  ;;  %v498_v55 = vld [vmem:[%s4740_s3 + $0x58] sm:$0xff] }
  0x19   : > { %3500 = vmatpush.bf16.msra.mxu3 %v3453_v26  ;;  %v3722_v40 = vld [vmem:[%s4738_s1] ss:$0 sm:$0xff]  ;;  %v3448_v41 = vld [vmem:[%s4741_s4 + $0xc8] sm:$0xff]  ;;  %v501_v57 = vld [vmem:[%s4740_s3 + $0x70] sm:$0xff] }
  0x1a   : > { %v324_v43 = vmul.f32 %v3722_v40, %v266_v42  ;;  %v3732_v44 = vld [vmem:[%s4739_s2] ss:$0 sm:$0xff]  ;;  %v488_v46 = vld [vmem:[%s4740_s3 + $0x8] sm:$0xff]  ;;  %v510_v2 = vld [vmem:[%s4740_s3 + $0xb8] sm:$0xff] }
  0x1b   : > { %3498 = vmatpush.bf16.msra.mxu1 %v3453_v26  ;;  %v3447_v45 = vld [vmem:[%s4741_s4 + $0xc0] sm:$0xff]  ;;  %v504_v3 = vld [vmem:[%s4740_s3 + $0x88] sm:$0xff]  ;;  %v302_v5 = vld [vmem:[%s3708_s8 + $0x138] sm:$0xff] }
  0x1c   : > { %1632 = vmatpush.bf16.msra.mxu0 %v3452_v30  ;;  %3502 = vmatpush.bf16.msra.mxu2 %v3452_v30  ;;  %v267_v47 = vld [vmem:[%s3708_s8 + $0x20] sm:$0xff]  ;;  %v382_v50 = vadd.f32 %v3732_v44, %v324_v43  ;;  %v290_v6 = vld [vmem:[%s3708_s8 + $0xd8] sm:$0xff] }
  0x1d   : > { %623 = vperm.xlu1 %3530, %v503_v7   ;;  %3503 = vmatpush.bf16.msra.mxu3 %v3452_v30  ;;  %v487_v49 = vld [vmem:[%s4740_s3] sm:$0xff]  ;;  %v325_v51 = vmul.f32 %v3722_v40, %v267_v47 }
  0x1e   : > { %618 = vperm.xlu0 %3529, %v502_v8   ;;  %693 = vperm.xlu2 %3531, %v517_v9   ;;  %v436_v52 = vmax.f32 %v382_v50, 0.0  ;;  %v495_v58 = vld [vmem:[%s4740_s3 + $0x40] sm:$0xff]  ;;  %v360_v9 = vmul.f32 %v3722_v40, %v302_v5 }
  0x1f   : > { %3501 = vmatpush.bf16.msra.mxu1 %v3452_v30  ;;  %v383_v54 = vadd.f32 %v3732_v44, %v325_v51  ;;  %v507_v63 = vld [vmem:[%s4740_s3 + $0xa0] sm:$0xff]  ;;  %v528_v30 = vld [vmem:[%s4740_s3 + $0x148] sm:$0xff] }
  0x20   : > { %1633 = vmatpush.bf16.msra.mxu0 %v3451_v31  ;;  %3505 = vmatpush.bf16.msra.mxu2 %v3451_v31 }
  0x21   : > { %3506 = vmatpush.bf16.msra.mxu3 %v3451_v31  ;;  %v437_v59 = vmax.f32 %v383_v54, 0.0 }
  0x23   : > { %3504 = vmatpush.bf16.msra.mxu1 %v3451_v31  ;;  %v522_v31 = vld [vmem:[%s4740_s3 + $0x118] sm:$0xff] }
  0x24   : > { %1634 = vmatpush.bf16.msra.mxu0 %v3450_v35  ;;  %3508 = vmatpush.bf16.msra.mxu2 %v3450_v35 }
  0x25   : > { %753 = vperm.xlu1 %3530, %v529_v10   ;;  %3509 = vmatpush.bf16.msra.mxu3 %v3450_v35  ;;  %v348_v10 = vmul.f32 %v3722_v40, %v290_v6 }
  0x26   : > { %698 = vperm.xlu0 %3529, %v518_v11   ;;  %758 = vperm.xlu2 %3531, %v530_v12   ;;  %v303_v11 = vld [vmem:[%s3708_s8 + $0x140] sm:$0xff]  ;;  %v516_v12 = vld [vmem:[%s4740_s3 + $0xe8] sm:$0xff] }
  0x27   : > { %3507 = vmatpush.bf16.msra.mxu1 %v3450_v35 }
  0x28   : > { %1635 = vmatpush.bf16.msra.mxu0 %v3449_v36  ;;  %3511 = vmatpush.bf16.msra.mxu2 %v3449_v36 }
  0x29   : > { %3512 = vmatpush.bf16.msra.mxu3 %v3449_v36 }
  0x2b   : > { %3510 = vmatpush.bf16.msra.mxu1 %v3449_v36 }
  0x2c   : > { %1636 = vmatpush.bf16.msra.mxu0 %v3448_v41  ;;  %3514 = vmatpush.bf16.msra.mxu2 %v3448_v41 }
  0x2d   : > { %578 = vperm.xlu1 %3530, %v494_v13   ;;  %3515 = vmatpush.bf16.msra.mxu3 %v3448_v41  ;;  %v291_v13 = vld [vmem:[%s3708_s8 + $0xe0] sm:$0xff] }
  0x2e   : > { %573 = vperm.xlu0 %3529, %v493_v14   ;;  %633 = vperm.xlu2 %3531, %v505_v15   ;;  %v519_v14 = vld [vmem:[%s4740_s3 + $0x100] sm:$0xff]  ;;  %v513_v15 = vld [vmem:[%s4740_s3 + $0xd0] sm:$0xff] }
  0x2f   : > { %3513 = vmatpush.bf16.msra.mxu1 %v3448_v41 }
  0x30   : > { %1637 = vmatpush.bf16.msra.mxu0 %v3447_v45  ;;  %3517 = vmatpush.bf16.msra.mxu2 %v3447_v45 }
  0x31   : > { %3518 = vmatpush.bf16.msra.mxu3 %v3447_v45 }
  0x33   : > { %3516 = vmatpush.bf16.msra.mxu1 %v3447_v45  ;;  %v3470_v45 = vld [vmem:[%s4741_s4 + $0x178] sm:$0xff] }
  0x34   : > { %1808 = vmatpush.bf16.msrb.mxu2 %v3470_v45 }
  0x35   : > { %708 = vperm.xlu1 %3530, %v520_v16   ;;  %v418_v16 = vadd.f32 %v3732_v44, %v360_v9 }
  0x36   : > { %638 = vperm.xlu0 %3529, %v506_v17   ;;  %713 = vperm.xlu2 %3531, %v521_v18   ;;  %v361_v17 = vmul.f32 %v3722_v40, %v303_v11  ;;  %v406_v18 = vadd.f32 %v3732_v44, %v348_v10 }
  0x3d   : > { %773 = vperm.xlu1 %3530, %v533_v19   ;;  %v349_v19 = vmul.f32 %v3722_v40, %v291_v13  ;;  %v3462_v13 = vld [vmem:[%s4741_s4 + $0x138] sm:$0xff] }
  0x3e   : > { %768 = vperm.xlu0 %3529, %v532_v20   ;;  %588 = vperm.xlu2 %3531, %v496_v21   ;;  %v472_v21 = vmax.f32 %v418_v16, 0.0 }
  0x3f   : > { %v407_v26 = vadd.f32 %v3732_v44, %v349_v19  ;;  %1719 = vmatpush.bf16.msrb.mxu1 %v3462_v13 }
  0x45   : > { %648 = vperm.xlu1 %3530, %v508_v23  }
  0x46   : > { %593 = vperm.xlu0 %3529, %v497_v24   ;;  %653 = vperm.xlu2 %3531, %v509_v25   ;;  %v419_v24 = vadd.f32 %v3732_v44, %v361_v17  ;;  %v460_v25 = vmax.f32 %v406_v18, 0.0 }
  0x48   : > { %v473_v35 = vmax.f32 %v419_v24, 0.0 }
  0x4d   : > { %728 = vperm.xlu1 %3530, %v524_v27   ;;  %v279_v27 = vld [vmem:[%s3708_s8 + $0x80] sm:$0xff] }
  0x4e   : > { %723 = vperm.xlu0 %3529, %v523_v28   ;;  %783 = vperm.xlu2 %3531, %v535_v29   ;;  %v525_v28 = vld [vmem:[%s4740_s3 + $0x130] sm:$0xff]  ;;  %v278_v29 = vld [vmem:[%s3708_s8 + $0x78] sm:$0xff]  ;;  %v337_v36 = vmul.f32 %v3722_v40, %v279_v27 }
  0x50   : > { %v395_v51 = vadd.f32 %v3732_v44, %v337_v36  ;;  %v297_v36 = vld [vmem:[%s3708_s8 + $0x110] sm:$0xff] }
  0x55   : > { %603 = vperm.xlu1 %3530, %v499_v32   ;;  %v293_v32 = vld [vmem:[%s3708_s8 + $0xf0] sm:$0xff] }
  0x56   : > { %788 = vperm.xlu0 %3529, %v536_v33   ;;  %608 = vperm.xlu2 %3531, %v500_v34   ;;  %v306_v34 = vld [vmem:[%s3708_s8 + $0x158] sm:$0xff]  ;;  %v351_v41 = vmul.f32 %v3722_v40, %v293_v32 }
  0x57   : > { %v364_v42 = vmul.f32 %v3722_v40, %v306_v34  ;;  %v538_v32 = vld [vmem:[%s4740_s3 + $0x198] sm:$0xff]  ;;  %v281_v34 = vld [vmem:[%s3708_s8 + $0x90] sm:$0xff] }
  0x58   : > { %v339_v45 = vmul.f32 %v3722_v40, %v281_v34 }
  0x5d   : > { %668 = vperm.xlu1 %3530, %v512_v37  }
  0x5e   : > { %663 = vperm.xlu0 %3529, %v511_v38   ;;  %568 = vperm.xlu2 %3531, %v492_v39   ;;  %v461_v38 = vmax.f32 %v407_v26, 0.0  ;;  %v336_v39 = vmul.f32 %v3722_v40, %v278_v29  ;;  %v270_v26 = vld [vmem:[%s3708_s8 + $0x38] sm:$0xff]  ;;  %v269_v29 = vld [vmem:[%s3708_s8 + $0x30] sm:$0xff] }
  0x60   : > { %v394_v54 = vadd.f32 %v3732_v44, %v336_v39 }
  0x62   : > { %v448_v6 = vmax.f32 %v394_v54, 0.0 }
  0x65   : > { %548 = vperm.xlu1 %3530, %v488_v46   ;;  %v3430_v46 = vld [vmem:[%s4741_s4 + $0x38] sm:$0xff] }
  0x66   : > { %553 = vperm.xlu2 %3531, %v489_v48   ;;  %543 = vperm.xlu0 %3529, %v487_v49  }
  0x67   : > { %2041 = vmatpush.bf16.msrb.mxu3 %v3430_v46 }
  0x68   : > { %v559_v53 = vpop.permute.xlu2 %558 }
  0x69   : > { %v814_v56 = vmul.f32 %v559_v53, %v436_v52 }
  0x6b   : > { %v868_v60 = vpack.c.bf16 %v814_v56, %v814_v56 }
  0x6d   : > { %598 = vperm.xlu1 %3530, %v498_v55   ;;  %v957_v0 = vunpack.c.l.b16 %v868_v60  ;;  %v305_v55 = vld [vmem:[%s3708_s8 + $0x150] sm:$0xff]  ;;  %v422_v60 = vadd.f32 %v3732_v44, %v364_v42 }
  0x6e   : > { %613 = vperm.xlu2 %3531, %v501_v57   ;;  %583 = vperm.xlu0 %3529, %v495_v58   ;;  %v534_v57 = vld [vmem:[%s4740_s3 + $0x178] sm:$0xff] }
  0x6f   : > { %v294_v58 = vld [vmem:[%s3708_s8 + $0xf8] sm:$0xff]  ;;  %v476_v16 = vmax.f32 %v422_v60, 0.0  ;;  %v296_v60 = vld [vmem:[%s3708_s8 + $0x108] sm:$0xff] }
  0x70   : > { %v564_v61 = vpop.permute.xlu2 %563  ;;  %v352_v9 = vmul.f32 %v3722_v40, %v294_v58 }
  0x71   : > { %v815_v62 = vmul.f32 %v564_v61, %v437_v59  ;;  %v409_v59 = vadd.f32 %v3732_v44, %v351_v41 }
  0x73   : > { %v869_v1 = vpack.c.bf16 %v815_v62, %v815_v62  ;;  %v537_v62 = vld [vmem:[%s4740_s3 + $0x190] sm:$0xff] }
  0x75   : > { %v958_v4 = vunpack.c.l.b16 %v869_v1  ;;  %643 = vperm.xlu1 %3530, %v507_v63   ;;  %v531_v63 = vld [vmem:[%s4740_s3 + $0x160] sm:$0xff] }
  0x76   : > { %658 = vperm.xlu2 %3531, %v510_v2   ;;  %628 = vperm.xlu0 %3529, %v504_v3   ;;  %v449_v2 = vmax.f32 %v395_v51, 0.0  ;;  %v363_v3 = vmul.f32 %v3722_v40, %v305_v55  ;;  %v3437_v55 = vld [vmem:[%s4741_s4 + $0x70] sm:$0xff] }
  0x77   : > { %v3770_v7 = vpack.c.b16 %v958_v4, %v957_v0 }
  0x78   : > { %v3772_v8 = vpop.permute.xlu2 %693 }
  0x79   : > { %1638 = vmatmul.bf16.vlgmr.msra.gmra.mxu0 %v3770_v7 }
  0x7d   : > { %688 = vperm.xlu1 %3530, %v516_v12  }
  0x7e   : > { %703 = vperm.xlu2 %3531, %v519_v14   ;;  %673 = vperm.xlu0 %3529, %v513_v15   ;;  %v3469_v14 = vld [vmem:[%s4741_s4 + $0x170] sm:$0xff] }
  0x7f   : > { %v739_v20 = vpop.permute.xlu1 %738  ;;  %v3429_v15 = vld [vmem:[%s4741_s4 + $0x30] sm:$0xff]  ;;  %1809 = vmatpush.bf16.msrb.mxu2 %v3469_v14 }
  0x80   : > { %v679_v22 = vpop.permute.xlu0 %678  ;;  %v3792_v23 = vpop.permute.xlu2 %758  ;;  %v850_v33 = vmul.f32 %v739_v20, %v472_v21  ;;  %v421_v20 = vadd.f32 %v3732_v44, %v363_v3  ;;  %v3438_v21 = vld [vmem:[%s4741_s4 + $0x78] sm:$0xff]  ;;  %2042 = vmatpush.bf16.msrb.mxu3 %v3429_v15 }
  0x81   : > { %v838_v37 = vmul.f32 %v679_v22, %v460_v25  ;;  %v463_v22 = vmax.f32 %v409_v59, 0.0  ;;  %v410_v25 = vadd.f32 %v3732_v44, %v352_v9  ;;  %2130 = vmatpush.bf16.msrb.mxu0 %v3438_v21 }
  0x82   : > { %v904_v47 = vpack.c.bf16 %v850_v33, %v850_v33  ;;  %v854_v33 = vmul.f32 %v3792_v23, %v476_v16  ;;  %v355_v23 = vmul.f32 %v3722_v40, %v297_v36 }
  0x83   : > { %v892_v52 = vpack.c.bf16 %v838_v37, %v838_v37  ;;  %v475_v37 = vmax.f32 %v421_v20, 0.0  ;;  %v841_v39 = vmul.f32 %v3772_v8, %v463_v22  ;;  %v464_v42 = vmax.f32 %v410_v25, 0.0  ;;  %v3468_v8 = vld [vmem:[%s4741_s4 + $0x168] sm:$0xff] }
  0x84   : > { %v981_v0 = vunpack.c.l.b16 %v904_v47  ;;  %v908_v51 = vpack.c.bf16 %v854_v33, %v854_v33  ;;  %1810 = vmatpush.bf16.msrb.mxu2 %v3468_v8  ;;  %v3427_v33 = vld [vmem:[%s4741_s4 + $0x20] sm:$0xff] }
  0x85   : > { %733 = vperm.xlu1 %3530, %v525_v28   ;;  %v973_v4 = vunpack.c.l.b16 %v892_v52  ;;  %v539_v28 = vld [vmem:[%s4740_s3 + $0x1a0] sm:$0xff]  ;;  %2131 = vmatpush.bf16.msrb.mxu0 %v3437_v55 }
  0x86   : > { %748 = vperm.xlu2 %3531, %v528_v30   ;;  %718 = vperm.xlu0 %3529, %v522_v31   ;;  %v540_v31 = vld [vmem:[%s4740_s3 + $0x1a8] sm:$0xff] }
  0x87   : > { %v744_v43 = vpop.permute.xlu1 %743 }
  0x88   : > { %v851_v48 = vmul.f32 %v744_v43, %v473_v35  ;;  %v684_v49 = vpop.permute.xlu0 %683  ;;  %v3819_v50 = vpop.permute.xlu2 %633  ;;  %v327_v43 = vmul.f32 %v3722_v40, %v269_v29 }
  0x89   : > { %v839_v53 = vmul.f32 %v684_v49, %v461_v38  ;;  %v328_v38 = vmul.f32 %v3722_v40, %v270_v26  ;;  %v3428_v49 = vld [vmem:[%s4741_s4 + $0x28] sm:$0xff]  ;;  %v309_v26 = vld [vmem:[%s3708_s8 + $0x170] sm:$0xff] }
  0x8a   : > { %v905_v56 = vpack.c.bf16 %v851_v48, %v851_v48  ;;  %v3461_v48 = vld [vmem:[%s4741_s4 + $0x130] sm:$0xff]  ;;  %v385_v59 = vadd.f32 %v3732_v44, %v327_v43  ;;  %2043 = vmatpush.bf16.msrb.mxu3 %v3428_v49 }
  0x8b   : > { %v893_v61 = vpack.c.bf16 %v839_v53, %v839_v53  ;;  %v386_v54 = vadd.f32 %v3732_v44, %v328_v38  ;;  %1720 = vmatpush.bf16.msrb.mxu1 %v3461_v48 }
  0x8c   : > { %v982_v1 = vunpack.c.l.b16 %v905_v56  ;;  %v895_v56 = vpack.c.bf16 %v841_v39, %v841_v39  ;;  %v367_v39 = vmul.f32 %v3722_v40, %v309_v26 }
  0x8d   : > { %v974_v5 = vunpack.c.l.b16 %v893_v61  ;;  %778 = vperm.xlu1 %3530, %v534_v57  }
  0x8e   : > { %v3838_v10 = vpack.c.b16 %v982_v1, %v981_v0  ;;  %793 = vperm.xlu2 %3531, %v537_v62   ;;  %763 = vperm.xlu0 %3529, %v531_v63   ;;  %v282_v62 = vld [vmem:[%s3708_s8 + $0x98] sm:$0xff]  ;;  %v397_v63 = vadd.f32 %v3732_v44, %v339_v45  ;;  %v413_v0 = vadd.f32 %v3732_v44, %v355_v23 }
  0x8f   : > { %v3840_v11 = vpack.c.b16 %v974_v5, %v973_v4  ;;  %v624_v12 = vpop.permute.xlu1 %623  ;;  %v440_v4 = vmax.f32 %v386_v54, 0.0  ;;  %v354_v5 = vmul.f32 %v3722_v40, %v296_v60  ;;  %v340_v13 = vmul.f32 %v3722_v40, %v282_v62  ;;  %2044 = vmatpush.bf16.msrb.mxu3 %v3427_v33  ;;  %v273_v60 = vld [vmem:[%s3708_s8 + $0x50] sm:$0xff]  ;;  %v300_v33 = vld [vmem:[%s3708_s8 + $0x128] sm:$0xff] }
  0x90   : > { %v827_v17 = vmul.f32 %v624_v12, %v449_v2  ;;  %v619_v18 = vpop.permute.xlu0 %618  ;;  %v3851_v19 = vpop.permute.xlu2 %713  ;;  %1698 = vmatmul.bf16.vlgmr.msra.gmra.mxu3 %v3838_v10  ;;  %v984_v2 = vunpack.c.l.b16 %v908_v51  ;;  %v439_v12 = vmax.f32 %v385_v59, 0.0  ;;  %v451_v22 = vmax.f32 %v397_v63, 0.0 }
  0x91   : > { %v826_v24 = vmul.f32 %v619_v18, %v448_v6  ;;  %1678 = vmatmul.bf16.vlgmr.msra.gmra.mxu2 %v3840_v11  ;;  %v975_v6 = vunpack.c.l.b16 %v895_v56  ;;  %v412_v21 = vadd.f32 %v3732_v44, %v354_v5  ;;  %v398_v25 = vadd.f32 %v3732_v44, %v340_v13 }
  0x92   : > { %v881_v27 = vpack.c.bf16 %v827_v17, %v827_v17  ;;  %v467_v17 = vmax.f32 %v413_v0, 0.0  ;;  %v3459_v0 = vld [vmem:[%s4741_s4 + $0x120] sm:$0xff] }
  0x93   : > { %v880_v30 = vpack.c.bf16 %v826_v24, %v826_v24  ;;  %v466_v38 = vmax.f32 %v412_v21, 0.0  ;;  %v452_v45 = vmax.f32 %v398_v25, 0.0 }
  0x94   : > { %v966_v35 = vunpack.c.l.b16 %v881_v27  ;;  %v845_v34 = vmul.f32 %v3851_v19, %v467_v17 }
  0x95   : > { %v965_v41 = vunpack.c.l.b16 %v880_v30  ;;  %803 = vperm.xlu1 %3530, %v539_v28   ;;  %v308_v28 = vld [vmem:[%s3708_s8 + $0x168] sm:$0xff] }
  0x96   : > { %808 = vperm.xlu2 %3531, %v540_v31   ;;  %798 = vperm.xlu0 %3529, %v538_v32   ;;  %v3460_v31 = vld [vmem:[%s4741_s4 + $0x128] sm:$0xff]  ;;  %v3467_v32 = vld [vmem:[%s4741_s4 + $0x160] sm:$0xff]  ;;  %v366_v23 = vmul.f32 %v3722_v40, %v308_v28  ;;  %v899_v49 = vpack.c.bf16 %v845_v34, %v845_v34 }
  0x97   : > { %v3878_v46 = vpack.c.b16 %v966_v35, %v965_v41  ;;  %v754_v47 = vpop.permute.xlu1 %753  ;;  %v272_v35 = vld [vmem:[%s3708_s8 + $0x48] sm:$0xff]  ;;  %1721 = vmatpush.bf16.msrb.mxu1 %v3460_v31  ;;  %1811 = vmatpush.bf16.msrb.mxu2 %v3467_v32  ;;  %v311_v34 = vld [vmem:[%s3708_s8 + $0x180] sm:$0xff] }
  0x98   : > { %v853_v52 = vmul.f32 %v754_v47, %v475_v37  ;;  %v699_v53 = vpop.permute.xlu0 %698  ;;  %v3894_v58 = vpop.permute.xlu2 %588  ;;  %v285_v37 = vld [vmem:[%s3708_s8 + $0xb0] sm:$0xff]  ;;  %v3436_v41 = vld [vmem:[%s4741_s4 + $0x68] sm:$0xff]  ;;  %v330_v19 = vmul.f32 %v3722_v40, %v272_v35  ;;  %v424_v56 = vadd.f32 %v3732_v44, %v366_v23 }
  0x99   : > { %4773 = vst [vmem:[#allocation2_spill] sm:$0xff] %v3878_v46  ;;  %v842_v57 = vmul.f32 %v699_v53, %v464_v42  ;;  %1658 = vmatmul.bf16.vlgmr.msra.gmra.mxu1 %v3878_v46  ;;  %v829_v42 = vmul.f32 %v3819_v50, %v451_v22  ;;  %2132 = vmatpush.bf16.msrb.mxu0 %v3436_v41  ;;  %v3466_v53 = vld [vmem:[%s4741_s4 + $0x158] sm:$0xff]  ;;  %v3464_v28 = vld [vmem:[%s4741_s4 + $0x148] sm:$0xff] }
  0x9a   : > { %v907_v61 = vpack.c.bf16 %v853_v52, %v853_v52  ;;  %v343_v48 = vmul.f32 %v3722_v40, %v285_v37  ;;  %v425_v52 = vadd.f32 %v3732_v44, %v367_v39  ;;  %v478_v17 = vmax.f32 %v424_v56, 0.0  ;;  %v3425_v39 = vld [vmem:[%s4741_s4 + $0x10] sm:$0xff]  ;;  %v3434_v41 = vld [vmem:[%s4741_s4 + $0x58] sm:$0xff] }
  0x9b   : > { %v896_v1 = vpack.c.bf16 %v842_v57, %v842_v57  ;;  %v883_v54 = vpack.c.bf16 %v829_v42, %v829_v42  ;;  %v284_v57 = vld [vmem:[%s3708_s8 + $0xa8] sm:$0xff]  ;;  %1812 = vmatpush.bf16.msrb.mxu2 %v3466_v53  ;;  %1722 = vmatpush.bf16.msrb.mxu1 %v3459_v0 }
  0x9c   : > { %v983_v3 = vunpack.c.l.b16 %v907_v61  ;;  %v388_v61 = vadd.f32 %v3732_v44, %v330_v19  ;;  %v401_v62 = vadd.f32 %v3732_v44, %v343_v48  ;;  %v479_v5 = vmax.f32 %v425_v52, 0.0  ;;  %v268_v19 = vld [vmem:[%s3708_s8 + $0x28] sm:$0xff] }
  0x9d   : > { %v976_v9 = vunpack.c.l.b16 %v896_v1  ;;  %v3426_v1 = vld [vmem:[%s4741_s4 + $0x18] sm:$0xff]  ;;  %v358_v48 = vmul.f32 %v3722_v40, %v300_v33 }
  0x9e   : > { %v3904_v14 = vpack.c.b16 %v984_v2, %v983_v3  ;;  %v3435_v2 = vld [vmem:[%s4741_s4 + $0x60] sm:$0xff]  ;;  %v978_v3 = vunpack.c.l.b16 %v899_v49  ;;  %2045 = vmatpush.bf16.msrb.mxu3 %v3426_v1 }
  0x9f   : > { %v3906_v15 = vpack.c.b16 %v976_v9, %v975_v6  ;;  %v579_v16 = vpop.permute.xlu1 %578  ;;  %v342_v6 = vmul.f32 %v3722_v40, %v284_v57  ;;  %v3465_v9 = vld [vmem:[%s4741_s4 + $0x150] sm:$0xff]  ;;  %2133 = vmatpush.bf16.msrb.mxu0 %v3435_v2  ;;  %v275_v2 = vld [vmem:[%s3708_s8 + $0x60] sm:$0xff] }
  0xa0   : > { %v818_v18 = vmul.f32 %v579_v16, %v440_v4  ;;  %v574_v20 = vpop.permute.xlu0 %573  ;;  %1703 = vmatmul.bf16.gmra.mxu3 %v3904_v14  ;;  %v3914_v30 = vpop.permute.xlu2 %653  ;;  %1813 = vmatpush.bf16.msrb.mxu2 %v3465_v9 }
  0xa1   : > { %v817_v24 = vmul.f32 %v574_v20, %v439_v12  ;;  %1683 = vmatmul.bf16.gmra.mxu2 %v3906_v15  ;;  %v967_v12 = vunpack.c.l.b16 %v883_v54 }
  0xa2   : > { %v872_v27 = vpack.c.bf16 %v818_v18, %v818_v18  ;;  %v331_v18 = vmul.f32 %v3722_v40, %v273_v60  ;;  %2046 = vmatpush.bf16.msrb.mxu3 %v3425_v39 }
  0xa3   : > { %v871_v29 = vpack.c.bf16 %v817_v24, %v817_v24  ;;  %v455_v24 = vmax.f32 %v401_v62, 0.0  ;;  %2134 = vmatpush.bf16.msrb.mxu0 %v3434_v41  ;;  %v3424_v62 = vld [vmem:[%s4741_s4 + $0x8] sm:$0xff] }
  0xa4   : > { %v960_v36 = vunpack.c.l.b16 %v872_v27  ;;  %v400_v27 = vadd.f32 %v3732_v44, %v342_v6  ;;  %v389_v32 = vadd.f32 %v3732_v44, %v331_v18  ;;  %1814 = vmatpush.bf16.msrb.mxu2 %v3464_v28 }
  0xa5   : > { %v959_v43 = vunpack.c.l.b16 %v871_v29  ;;  %v442_v29 = vmax.f32 %v388_v61, 0.0  ;;  %v833_v42 = vmul.f32 %v3914_v30, %v455_v24  ;;  %v369_v30 = vmul.f32 %v3722_v40, %v311_v34 }
  0xa6   : > { %v454_v23 = vmax.f32 %v400_v27, 0.0  ;;  %v416_v61 = vadd.f32 %v3732_v44, %v358_v48  ;;  %2047 = vmatpush.bf16.msrb.mxu3 %v3424_v62 }
  0xa7   : > { %v3935_v47 = vpack.c.b16 %v960_v36, %v959_v43  ;;  %v709_v8 = vpop.permute.xlu1 %708  ;;  %v299_v36 = vld [vmem:[%s3708_s8 + $0x120] sm:$0xff]  ;;  %v820_v49 = vmul.f32 %v3894_v58, %v442_v29  ;;  %v326_v58 = vmul.f32 %v3722_v40, %v268_v19  ;;  %v887_v57 = vpack.c.bf16 %v833_v42, %v833_v42  ;;  %v288_v42 = vld [vmem:[%s3708_s8 + $0xc8] sm:$0xff] }
  0xa8   : > { %v844_v51 = vmul.f32 %v709_v8, %v466_v38  ;;  %v639_v50 = vpop.permute.xlu0 %638  ;;  %v3961_v16 = vpop.permute.xlu2 %783  ;;  %v3458_v38 = vld [vmem:[%s4741_s4 + $0x118] sm:$0xff]  ;;  %v3463_v8 = vld [vmem:[%s4741_s4 + $0x140] sm:$0xff]  ;;  %v357_v52 = vmul.f32 %v3722_v40, %v299_v36  ;;  %v470_v24 = vmax.f32 %v416_v61, 0.0 }
  0xa9   : > { %v830_v55 = vmul.f32 %v639_v50, %v452_v45  ;;  %1643 = vmatmul.bf16.gmra.mxu0 %v3935_v47  ;;  %v276_v45 = vld [vmem:[%s3708_s8 + $0x68] sm:$0xff]  ;;  %v443_v50 = vmax.f32 %v389_v32, 0.0  ;;  %1723 = vmatpush.bf16.msrb.mxu1 %v3458_v38  ;;  %v970_v18 = vunpack.c.l.b16 %v887_v57 }
  0xaa   : > { %v898_v59 = vpack.c.bf16 %v844_v51, %v844_v51  ;;  %1815 = vmatpush.bf16.msrb.mxu2 %v3463_v8  ;;  %v415_v1 = vadd.f32 %v3732_v44, %v357_v52  ;;  %v346_v52 = vmul.f32 %v3722_v40, %v288_v42 }
  0xab   : > { %v884_v63 = vpack.c.bf16 %v830_v55, %v830_v55  ;;  %v334_v55 = vmul.f32 %v3722_v40, %v276_v45 }
  0xac   : > { %v977_v4 = vunpack.c.l.b16 %v898_v59  ;;  %v469_v29 = vmax.f32 %v415_v1, 0.0 }
  0xad   : > { %v968_v13 = vunpack.c.l.b16 %v884_v63  ;;  %v874_v63 = vpack.c.bf16 %v820_v49, %v820_v49  ;;  %v392_v6 = vadd.f32 %v3732_v44, %v334_v55  ;;  %v287_v49 = vld [vmem:[%s3708_s8 + $0xc0] sm:$0xff] }
  0xae   : > { %v3964_v20 = vpack.c.b16 %v978_v3, %v977_v4  ;;  %v312_v4 = vld [vmem:[%s3708_s8 + $0x188] sm:$0xff] }
  0xaf   : > { %v3966_v21 = vpack.c.b16 %v968_v13, %v967_v12  ;;  %v774_v22 = vpop.permute.xlu1 %773  ;;  %v384_v12 = vadd.f32 %v3732_v44, %v326_v58  ;;  %v3457_v13 = vld [vmem:[%s4741_s4 + $0x110] sm:$0xff]  ;;  %v961_v27 = vunpack.c.l.b16 %v874_v63  ;;  %v446_v36 = vmax.f32 %v392_v6, 0.0 }
  0xb0   : > { %v857_v25 = vmul.f32 %v774_v22, %v479_v5  ;;  %v769_v26 = vpop.permute.xlu0 %768  ;;  %v609_v54 = vpop.permute.xlu2 %608  ;;  %v427_v5 = vadd.f32 %v3732_v44, %v369_v30  ;;  %1724 = vmatpush.bf16.msrb.mxu1 %v3457_v13  ;;  %v3431_v30 = vld [vmem:[%s4741_s4 + $0x40] sm:$0xff]  ;;  %v345_v63 = vmul.f32 %v3722_v40, %v287_v49  ;;  %v264_v13 = vld [vmem:[%s3708_s8 + $0x8] sm:$0xff] }
  0xb1   : > { %4774 = vst [vmem:[#allocation3_spill] sm:$0xff] %v3966_v21  ;;  %v856_v31 = vmul.f32 %v769_v26, %v478_v17  ;;  %1663 = vmatmul.bf16.gmra.mxu1 %v3966_v21  ;;  %1688 = vmatmul.bf16.gmra.mxu2 %v3964_v20  ;;  %v3433_v17 = vld [vmem:[%s4741_s4 + $0x50] sm:$0xff]  ;;  %v3423_v26 = vld [vmem:[%s4741_s4] sm:$0xff]  ;;  %v824_v55 = vmul.f32 %v609_v54, %v446_v36 }
  0xb2   : > { %v911_v35 = vpack.c.bf16 %v857_v25, %v857_v25  ;;  %v333_v25 = vmul.f32 %v3722_v40, %v275_v2  ;;  %2135 = vmatpush.bf16.msrb.mxu0 %v3433_v17  ;;  %2048 = vmatpush.bf16.msrb.mxu3 %v3423_v26  ;;  %v481_v45 = vmax.f32 %v427_v5, 0.0  ;;  %v404_v2 = vadd.f32 %v3732_v44, %v346_v52  ;;  %v3478_v26 = vld [vmem:[%s4741_s4 + $0x1b8] sm:$0xff] }
  0xb3   : > { %v910_v37 = vpack.c.bf16 %v856_v31, %v856_v31  ;;  %v370_v31 = vmul.f32 %v3722_v40, %v312_v4  ;;  %2501 = vmatpush.bf16.msra.mxu2 %v3478_v26 }
  0xb4   : > { %v986_v43 = vunpack.c.l.b16 %v911_v35  ;;  %v3432_v35 = vld [vmem:[%s4741_s4 + $0x48] sm:$0xff]  ;;  %v391_v41 = vadd.f32 %v3732_v44, %v333_v25  ;;  %v458_v25 = vmax.f32 %v404_v2, 0.0 }
  0xb5   : > { %v985_v51 = vunpack.c.l.b16 %v910_v37  ;;  %v438_v37 = vmax.f32 %v384_v12, 0.0  ;;  %v428_v48 = vadd.f32 %v3732_v44, %v370_v31  ;;  %v403_v12 = vadd.f32 %v3732_v44, %v345_v63 }
  0xb6   : > { %2136 = vmatpush.bf16.msrb.mxu0 %v3432_v35  ;;  %v445_v57 = vmax.f32 %v391_v41, 0.0 }
  0xb7   : > { %v3997_v53 = vpack.c.b16 %v986_v43, %v985_v51  ;;  %v649_v56 = vpop.permute.xlu1 %648  ;;  %v3456_v43 = vld [vmem:[%s4741_s4 + $0x108] sm:$0xff]  ;;  %v482_v62 = vmax.f32 %v428_v48, 0.0 }
  0xb8   : > { %v832_v59 = vmul.f32 %v649_v56, %v454_v23  ;;  %v594_v60 = vpop.permute.xlu0 %593  ;;  %v569_v23 = vpop.permute.xlu2 %568  ;;  %1725 = vmatpush.bf16.msrb.mxu1 %v3456_v43 }
  0xb9   : > { %v821_v0 = vmul.f32 %v594_v60, %v443_v50  ;;  %1708 = vmatmul.bf16.gmra.mxu3 %v3997_v53  ;;  %v265_v50 = vld [vmem:[%s3708_s8 + $0x10] sm:$0xff]  ;;  %v816_v56 = vmul.f32 %v569_v23, %v438_v37  ;;  %v859_v60 = vmul.f32 %v3961_v16, %v481_v45  ;;  %v457_v37 = vmax.f32 %v403_v12, 0.0 }
  0xba   : > { %v886_v3 = vpack.c.bf16 %v832_v59, %v832_v59  ;;  %v3455_v59 = vld [vmem:[%s4741_s4 + $0x100] sm:$0xff]  ;;  %2137 = vmatpush.bf16.msrb.mxu0 %v3431_v30 }
  0xbb   : > { %v875_v9 = vpack.c.bf16 %v821_v0, %v821_v0  ;;  %v323_v0 = vmul.f32 %v3722_v40, %v265_v50  ;;  %v870_v4 = vpack.c.bf16 %v816_v56, %v816_v56  ;;  %v913_v16 = vpack.c.bf16 %v859_v60, %v859_v60  ;;  %v271_v30 = vld [vmem:[%s3708_s8 + $0x40] sm:$0xff]  ;;  %v3494_v60 = vld [vmem:[%s4741_s4 + $0x238] sm:$0xff] }
  0xbc   : > { %v969_v22 = vunpack.c.l.b16 %v886_v3  ;;  %1726 = vmatpush.bf16.msrb.mxu1 %v3455_v59  ;;  %v878_v3 = vpack.c.bf16 %v824_v55, %v824_v55  ;;  %v3446_v59 = vld [vmem:[%s4741_s4 + $0xb8] sm:$0xff]  ;;  %v329_v63 = vmul.f32 %v3722_v40, %v271_v30 }
  0xbd   : > { %v962_v28 = vunpack.c.l.b16 %v875_v9  ;;  %v381_v17 = vadd.f32 %v3732_v44, %v323_v0  ;;  %v987_v35 = vunpack.c.l.b16 %v913_v16  ;;  %v274_v16 = vld [vmem:[%s3708_s8 + $0x58] sm:$0xff] }
  0xbe   : > { %v4023_v32 = vpack.c.b16 %v970_v18, %v969_v22  ;;  %v263_v22 = vld [vmem:[%s3708_s8] sm:$0xff]  ;;  %2679 = vmatpush.bf16.msra.mxu0 %v3494_v60  ;;  %v387_v12 = vadd.f32 %v3732_v44, %v329_v63  ;;  %v277_v60 = vld [vmem:[%s3708_s8 + $0x70] sm:$0xff] }
  0xbf   : > { %v4025_v33 = vpack.c.b16 %v962_v28, %v961_v27  ;;  %v729_v34 = vpop.permute.xlu1 %728  ;;  %v3486_v27 = vld [vmem:[%s4741_s4 + $0x1f8] sm:$0xff]  ;;  %v964_v28 = vunpack.c.l.b16 %v878_v3 }
  0xc0   : > { %4775 = vst [vmem:[#allocation4_spill] sm:$0xff] %v4023_v32  ;;  %v848_v38 = vmul.f32 %v729_v34, %v470_v24  ;;  %v724_v39 = vpop.permute.xlu0 %723  ;;  %v322_v34 = vmul.f32 %v3722_v40, %v264_v13  ;;  %2590 = vmatpush.bf16.msra.mxu3 %v3486_v27  ;;  %v554_v42 = vpop.permute.xlu2 %553  ;;  %2219 = vmatpush.bf16.msra.mxu1 %v3446_v59  ;;  %v441_v26 = vmax.f32 %v387_v12, 0.0 }
  0xc1   : > { %v847_v19 = vmul.f32 %v724_v39, %v469_v29  ;;  %1648 = vmatmul.bf16.gmra.mxu0 %v4025_v33  ;;  %1668 = vmatmul.bf16.gmra.mxu1 %v4023_v32  ;;  %v1046_v29 = vunpack.c.l.b16 %v870_v4  ;;  %v435_v39 = vmax.f32 %v381_v17, 0.0 }
  0xc2   : > { %v902_v8 = vpack.c.bf16 %v848_v38, %v848_v38  ;;  %v321_v38 = vmul.f32 %v3722_v40, %v263_v22  ;;  %v332_v22 = vmul.f32 %v3722_v40, %v274_v16  ;;  %v3485_v16 = vld [vmem:[%s4741_s4 + $0x1f0] sm:$0xff] }
  0xc3   : > { %v901_v51 = vpack.c.bf16 %v847_v19, %v847_v19  ;;  %v1064_v23 = vpack.c.b16 %v1046_v29, %v1046_v29  ;;  %v813_v50 = vmul.f32 %v554_v42, %v435_v39  ;;  %v1095_v39 = vshrl.u32 %v3770_v7, 16 }
  0xc4   : > { %v980_v58 = vunpack.c.l.b16 %v902_v8  ;;  %v380_v8 = vadd.f32 %v3732_v44, %v322_v34  ;;  %v390_v34 = vadd.f32 %v3732_v44, %v332_v22  ;;  %2591 = vmatpush.bf16.msra.mxu3 %v3485_v16 }
  0xc5   : > { %v979_v61 = vunpack.c.l.b16 %v901_v51  ;;  %v379_v51 = vadd.f32 %v3732_v44, %v321_v38  ;;  %v1321_v56 = vrot.slane %v1064_v23, 1  ;;  %v867_v0 = vpack.c.bf16 %v813_v50, %v813_v50 }
  0xc6   : > { %v1102_v29 = vshll.u32 %v1064_v23, 16 }
  0xc7   : > { %v4050_v54 = vpack.c.b16 %v980_v58, %v979_v61  ;;  %v604_v1 = vpop.permute.xlu1 %603  ;;  %v1045_v13 = vunpack.c.l.b16 %v867_v0  ;;  %v1323_v0 = vrot.slane %v3935_v47, 1 }
  0xc8   : > { %v823_v5 = vmul.f32 %v604_v1, %v445_v57  ;;  %v789_v6 = vpop.permute.xlu0 %788  ;;  %v434_v57 = vmax.f32 %v380_v8, 0.0  ;;  %v1320_v1 = vrot.slane %v3770_v7, 1 }
  0xc9   : > { %v860_v9 = vmul.f32 %v789_v6, %v482_v62  ;;  %1693 = vmatmul.bf16.gmra.mxu2 %v4050_v54  ;;  %v433_v62 = vmax.f32 %v379_v51, 0.0  ;;  %v1063_v27 = vpack.c.b16 %v1045_v13, %v1045_v13  ;;  %v3445_v13 = vld [vmem:[%s4741_s4 + $0xb0] sm:$0xff] }
  0xca   : > { %v877_v18 = vpack.c.bf16 %v823_v5, %v823_v5  ;;  %v4086_v6 = vsel %vm1316_vm0, %v1320_v1, %v1321_v56  ;;  %v335_v1 = vmul.f32 %v3722_v40, %v277_v60  ;;  %2220 = vmatpush.bf16.msra.mxu1 %v3445_v13 }
  0xcb   : > { %v914_v24 = vpack.c.bf16 %v860_v9, %v860_v9  ;;  %v1318_v8 = vrot.slane %v1063_v27, 1 }
  0xcc   : > { %v963_v31 = vunpack.c.l.b16 %v877_v18  ;;  %v393_v40 = vadd.f32 %v3732_v44, %v335_v1  ;;  %v3492_v1 = vld [vmem:[%s4741_s4 + $0x228] sm:$0xff] }
  0xcd   : > { %v988_v36 = vunpack.c.l.b16 %v914_v24 }
  0xce   : > { %v4066_v41 = vpack.c.b16 %v964_v28, %v963_v31  ;;  %v1097_v28 = vshll.u32 %v3770_v7, 16 }
  0xcf   : > { %v4068_v43 = vpack.c.b16 %v988_v36, %v987_v35  ;;  %v669_v45 = vpop.permute.xlu1 %668 }
  0xd0   : > { %v836_v19 = vmul.f32 %v669_v45, %v458_v25  ;;  %v664_v48 = vpop.permute.xlu0 %663  ;;  %v1099_v42 = vrot.slane %v1097_v28, 1  ;;  %v1104_v45 = vrot.slane %v1102_v29, 1 }
  0xd1   : > { %v835_v49 = vmul.f32 %v664_v48, %v457_v37  ;;  %1653 = vmatmul.bf16.gmra.mxu0 %v4066_v41  ;;  %1713 = vmatmul.bf16.gmra.mxu3 %v4068_v43  ;;  %v1090_v37 = vshll.u32 %v1063_v27, 16  ;;  %v1107_v27 = vshrl.u32 %v3935_v47, 16 }
  0xd2   : > { %v890_v52 = vpack.c.bf16 %v836_v19, %v836_v19  ;;  %v444_v19 = vmax.f32 %v390_v34, 0.0  ;;  %v1100_v56 = vor.u32 %v1099_v42, %v1095_v39  ;;  %v280_v34 = vld [vmem:[%s3708_s8 + $0x88] sm:$0xff]  ;;  %v1121_v42 = vshll.u32 %v4025_v33, 16 }
  0xd3   : > { %v889_v55 = vpack.c.bf16 %v835_v49, %v835_v49  ;;  %v1092_v30 = vrot.slane %v1090_v37, 1  ;;  %v4133_v37 = vld [vmem:[%s4738_s1] ss:$0 sm:$0xff] }
  0xd4   : > { %v972_v58 = vunpack.c.l.b16 %v890_v52 }
  0xd5   : > { %v971_v61 = vunpack.c.l.b16 %v889_v55 }
  0xd7   : > { %v4083_v2 = vpack.c.b16 %v972_v58, %v971_v61  ;;  %v549_v3 = vpop.permute.xlu1 %548 }
  0xd8   : > { %v812_v4 = vmul.f32 %v549_v3, %v434_v57  ;;  %v544_v5 = vpop.permute.xlu0 %543 }
  0xd9   : > { %4776 = vst [vmem:[#allocation5_spill] sm:$0xff] %v4083_v2  ;;  %v811_v9 = vmul.f32 %v544_v5, %v433_v62  ;;  %1673 = vmatmul.bf16.gmra.mxu1 %v4083_v2  ;;  %1816 = vmatmul.bf16.vlgmr.msrb.gmra.mxu2 %v4086_v6  ;;  %v1105_v62 = vsel %vm1081_vm1, %v1100_v56, %v1104_v45  ;;  %v3477_v5 = vld [vmem:[%s4741_s4 + $0x1b0] sm:$0xff]  ;;  %v1119_v56 = vshrl.u32 %v4025_v33, 16 }
  0xda   : > { %v866_v17 = vpack.c.bf16 %v812_v4, %v812_v4  ;;  %2502 = vmatpush.bf16.msra.mxu2 %v3477_v5 }
  0xdb   : > { %v865_v18 = vpack.c.bf16 %v811_v9, %v811_v9  ;;  %v1109_v9 = vshll.u32 %v3935_v47, 16 }
  0xdc   : > { %v956_v24 = vunpack.c.l.b16 %v866_v17  ;;  %v3493_v17 = vld [vmem:[%s4741_s4 + $0x230] sm:$0xff] }
  0xdd   : > { %v955_v25 = vunpack.c.l.b16 %v865_v18  ;;  %v1111_v22 = vrot.slane %v1109_v9, 1  ;;  %2680 = vmatpush.bf16.msra.mxu0 %v3493_v17  ;;  %v1133_v9 = vshll.u32 %v4066_v41, 16 }
  0xdf   : > { %v991_v31 = vpack.c.b16 %v956_v24, %v955_v25  ;;  %v599_v49 = vpop.permute.xlu1 %598  ;;  %v447_v24 = vmax.f32 %v393_v40, 0.0  ;;  %v1112_v28 = vor.u32 %v1111_v22, %v1107_v27  ;;  %v1135_v13 = vrot.slane %v1133_v9, 1 }
  0xe0   : > { %v584_v35 = vpop.permute.xlu0 %583  ;;  %v822_v57 = vmul.f32 %v599_v49, %v444_v19  ;;  %v4144_v19 = vld [vmem:[%s4739_s2] ss:$0 sm:$0xff]  ;;  %v3476_v49 = vld [vmem:[%s4741_s4 + $0x1a8] sm:$0xff] }
  0xe1   : > { %v819_v36 = vmul.f32 %v584_v35, %v441_v26  ;;  %2049 = vmatmul.bf16.vlgmr.msrb.gmra.mxu3 %v991_v31  ;;  %v1085_v38 = vshll.u32 %v991_v31, 16  ;;  %v1083_v51 = vshrl.u32 %v991_v31, 16  ;;  %v1317_v23 = vrot.slane %v991_v31, 1  ;;  %v614_v26 = vpop.permute.xlu2 %613  ;;  %2503 = vmatpush.bf16.msra.mxu2 %v3476_v49 }
  0xe2   : > { %v876_v3 = vpack.c.bf16 %v822_v57, %v822_v57  ;;  %v825_v29 = vmul.f32 %v614_v26, %v447_v24  ;;  %2681 = vmatpush.bf16.msra.mxu0 %v3492_v1 }
  0xe3   : > { %v873_v48 = vpack.c.bf16 %v819_v36, %v819_v36  ;;  %v1087_v50 = vrot.slane %v1085_v38, 1  ;;  %v4097_v58 = vsel %vm1316_vm0, %v1317_v23, %v1318_v8  ;;  %v338_v38 = vmul.f32 %v4133_v37, %v280_v34 }
  0xe4   : > { %v1048_v12 = vunpack.c.l.b16 %v876_v3  ;;  %v879_v36 = vpack.c.bf16 %v825_v29, %v825_v29 }
  0xe5   : > { %v1047_v52 = vunpack.c.l.b16 %v873_v48  ;;  %v1088_v55 = vor.u32 %v1087_v50, %v1083_v51  ;;  %v396_v48 = vadd.f32 %v4144_v19, %v338_v38  ;;  %v3484_v51 = vld [vmem:[%s4741_s4 + $0x1e8] sm:$0xff]  ;;  %v1123_v50 = vrot.slane %v1121_v42, 1 }
  0xe6   : > { %v1066_v25 = vpack.c.b16 %v1048_v12, %v1048_v12  ;;  %v1049_v45 = vunpack.c.l.b16 %v879_v36  ;;  %2592 = vmatpush.bf16.msra.mxu3 %v3484_v51  ;;  %v1145_v51 = vshll.u32 %v3878_v46, 16 }
  0xe7   : > { %v1065_v59 = vpack.c.b16 %v1047_v52, %v1047_v52  ;;  %v1093_v61 = vsel %vm1081_vm1, %v1088_v55, %v1092_v30  ;;  %v450_v52 = vmax.f32 %v396_v48, 0.0  ;;  %v1124_v57 = vor.u32 %v1123_v50, %v1119_v56 }
  0xe8   : > { %2138 = vmatmul.bf16.vlgmr.msrb.gmra.mxu0 %v1093_v61  ;;  %v1327_v31 = vrot.slane %v1066_v25, 1  ;;  %v1126_v8 = vshll.u32 %v1066_v25, 16  ;;  %v1067_v23 = vpack.c.b16 %v1049_v45, %v1049_v45  ;;  %v629_v55 = vpop.permute.xlu0 %628  ;;  %v1329_v61 = vrot.slane %v4066_v41, 1  ;;  %v644_v25 = vpop.permute.xlu1 %643 }
  0xe9   : > { %v1324_v63 = vrot.slane %v1065_v59, 1  ;;  %1727 = vmatmul.bf16.vlgmr.msrb.gmra.mxu1 %v1105_v62  ;;  %v1114_v18 = vshll.u32 %v1065_v59, 16  ;;  %v828_v60 = vmul.f32 %v629_v55, %v450_v52  ;;  %v3483_v55 = vld [vmem:[%s4741_s4 + $0x1e0] sm:$0xff]  ;;  %v1147_v56 = vrot.slane %v1145_v51, 1 }
  0xea   : > { %v1128_v30 = vrot.slane %v1126_v8, 1  ;;  %v1330_v59 = vrot.slane %v1067_v23, 1  ;;  %v1138_v17 = vshll.u32 %v1067_v23, 16  ;;  %2593 = vmatpush.bf16.msra.mxu3 %v3483_v55 }
  0xeb   : > { %v4105_v4 = vsel %vm1316_vm0, %v1323_v0, %v1324_v63  ;;  %v1116_v44 = vrot.slane %v1114_v18, 1  ;;  %v3444_v0 = vld [vmem:[%s4741_s4 + $0xa8] sm:$0xff]  ;;  %v882_v5 = vpack.c.bf16 %v828_v60, %v828_v60  ;;  %v1131_v18 = vshrl.u32 %v4066_v41, 16  ;;  %v659_v60 = vpop.permute.xlu2 %658 }
  0xec   : > { %1821 = vmatmul.bf16.gmra.mxu2 %v4105_v4  ;;  %v4158_v63 = vsel %vm1081_vm1, %v1124_v57, %v1128_v30  ;;  %v4170_v16 = vsel %vm1316_vm0, %v1329_v61, %v1330_v59  ;;  %2221 = vmatpush.bf16.msra.mxu1 %v3444_v0  ;;  %v1140_v27 = vrot.slane %v1138_v17, 1  ;;  %v3475_v30 = vld [vmem:[%s4741_s4 + $0x1a0] sm:$0xff] }
  0xed   : > { %v4126_v35 = vsel %vm1081_vm1, %v1112_v28, %v1116_v44  ;;  %4777 = vst [vmem:[#allocation6_spill] sm:$0xff] %v4170_v16  ;;  %v1050_v12 = vunpack.c.l.b16 %v882_v5  ;;  %v1136_v44 = vor.u32 %v1135_v13, %v1131_v18  ;;  %2504 = vmatpush.bf16.msra.mxu2 %v3475_v30  ;;  %v1335_v18 = vrot.slane %v3966_v21, 1 }
  0xef   : > { %v1068_v24 = vpack.c.b16 %v1050_v12, %v1050_v12  ;;  %v4181_v34 = vsel %vm1081_vm1, %v1136_v44, %v1140_v27  ;;  %v289_v12 = vld [vmem:[%s3708_s8 + $0xd0] sm:$0xff] }
  0xf0   : > { %v347_v44 = vmul.f32 %v4133_v37, %v289_v12  ;;  %v1338_v12 = vrot.slane %v4023_v32, 1 }
  0xf1   : > { %2054 = vmatmul.bf16.gmra.mxu3 %v3770_v7  ;;  %v1326_v7 = vrot.slane %v4025_v33, 1  ;;  %v1333_v29 = vrot.slane %v1068_v24, 1  ;;  %v1150_v52 = vshll.u32 %v1068_v24, 16  ;;  %v3491_v24 = vld [vmem:[%s4741_s4 + $0x220] sm:$0xff] }
  0xf2   : > { %2682 = vmatpush.bf16.msra.mxu0 %v3491_v24 }
  0xf3   : > { %v4137_v39 = vsel %vm1316_vm0, %v1326_v7, %v1327_v31  ;;  %v286_v31 = vld [vmem:[%s3708_s8 + $0xb8] sm:$0xff]  ;;  %v1332_v7 = vrot.slane %v3878_v46, 1  ;;  %v1152_v61 = vrot.slane %v1150_v52, 1 }
  0xf4   : > { %v344_v36 = vmul.f32 %v4133_v37, %v286_v31 }
  0xf5   : > { %v4192_v48 = vsel %vm1316_vm0, %v1332_v7, %v1333_v29  ;;  %v1157_v29 = vshll.u32 %v3966_v21, 16  ;;  %v405_v7 = vadd.f32 %v4144_v19, %v347_v44 }
  0xf6   : > { %v4187_v42 = vpop.f32.mrf.mxu0  ;;  %4779 = vst [vmem:[#allocation8_spill] sm:$0xff] %v4192_v48  ;;  %v402_v50 = vadd.f32 %v4144_v19, %v344_v36 }
  0xf7   : > { %v459_v30 = vmax.f32 %v405_v7, 0.0 }
  0xf8   : > { %2143 = vmatmul.bf16.gmra.mxu0 %v1105_v62  ;;  %v283_v62 = vld [vmem:[%s3708_s8 + $0xa0] sm:$0xff]  ;;  %v456_v57 = vmax.f32 %v402_v50, 0.0 }
  0xf9   : > { %1732 = vmatmul.bf16.gmra.mxu1 %v4126_v35  ;;  %v341_v3 = vmul.f32 %v4133_v37, %v283_v62  ;;  %v1143_v62 = vshrl.u32 %v3878_v46, 16 }
  0xfa   : > { %v834_v9 = vmul.f32 %v659_v60, %v456_v57  ;;  %v1155_v57 = vshrl.u32 %v3966_v21, 16 }
  0xfb   : > { %v399_v40 = vadd.f32 %v4144_v19, %v341_v3  ;;  %v1148_v5 = vor.u32 %v1147_v56, %v1143_v62  ;;  %v674_v56 = vpop.permute.xlu0 %673 }
  0xfc   : > { %1826 = vmatmul.bf16.gmra.mxu2 %v4137_v39  ;;  %v837_v62 = vmul.f32 %v674_v56, %v459_v30  ;;  %v3474_v30 = vld [vmem:[%s4741_s4 + $0x198] sm:$0xff] }
  0xfd   : > { %v453_v22 = vmax.f32 %v399_v40, 0.0  ;;  %v4219_v17 = vsel %vm1081_vm1, %v1148_v5, %v1152_v61  ;;  %2505 = vmatpush.bf16.msra.mxu2 %v3474_v30 }
  0xfe   : > { %v4209_v0 = vpop.f32.mrf.mxu0  ;;  %4781 = vst [vmem:[#allocation10_spill] sm:$0xff] %v4219_v17 }
  0xff   : > { %v831_v28 = vmul.f32 %v644_v25, %v453_v22  ;;  %v3443_v22 = vld [vmem:[%s4741_s4 + $0xa0] sm:$0xff]  ;;  %v888_v25 = vpack.c.bf16 %v834_v9, %v834_v9  ;;  %v292_v9 = vld [vmem:[%s3708_s8 + $0xe8] sm:$0xff] }
 0x100   : > { %2222 = vmatpush.bf16.msra.mxu1 %v3443_v22  ;;  %v350_v24 = vmul.f32 %v4133_v37, %v292_v9 }
 0x101   : > { %2059 = vmatmul.bf16.gmra.mxu3 %v3935_v47  ;;  %v885_v38 = vpack.c.bf16 %v831_v28, %v831_v28  ;;  %v1052_v31 = vunpack.c.l.b16 %v888_v25  ;;  %v891_v25 = vpack.c.bf16 %v837_v62, %v837_v62 }
 0x103   : > { %v1051_v23 = vunpack.c.l.b16 %v885_v38  ;;  %v1070_v52 = vpack.c.b16 %v1052_v31, %v1052_v31  ;;  %v408_v31 = vadd.f32 %v4144_v19, %v350_v24  ;;  %v1053_v7 = vunpack.c.l.b16 %v891_v25 }
 0x104   : > { %v1167_v24 = vshrl.u32 %v4023_v32, 16 }
 0x105   : > { %v1069_v59 = vpack.c.b16 %v1051_v23, %v1051_v23  ;;  %v1159_v23 = vrot.slane %v1157_v29, 1  ;;  %v1339_v61 = vrot.slane %v1070_v52, 1  ;;  %v1169_v29 = vshll.u32 %v4023_v32, 16 }
 0x106   : > { %v1071_v62 = vpack.c.b16 %v1053_v7, %v1053_v7  ;;  %v3442_v7 = vld [vmem:[%s4741_s4 + $0x98] sm:$0xff] }
 0x107   : > { %v1336_v40 = vrot.slane %v1069_v59, 1  ;;  %v1162_v38 = vshll.u32 %v1069_v59, 16  ;;  %v1160_v60 = vor.u32 %v1159_v23, %v1155_v57  ;;  %v4264_v44 = vsel %vm1316_vm0, %v1338_v12, %v1339_v61  ;;  %2223 = vmatpush.bf16.msra.mxu1 %v3442_v7 }
 0x108   : > { %2148 = vmatmul.bf16.gmra.mxu0 %v4126_v35  ;;  %4786 = vst [vmem:[#allocation15_spill] sm:$0xff] %v4264_v44  ;;  %v1174_v23 = vshll.u32 %v1070_v52, 16  ;;  %v1171_v57 = vrot.slane %v1169_v29, 1  ;;  %v462_v61 = vmax.f32 %v408_v31, 0.0  ;;  %v1341_v31 = vrot.slane %v4083_v2, 1 }
 0x109   : > { %1737 = vmatmul.bf16.gmra.mxu1 %v4158_v63  ;;  %v4232_v27 = vsel %vm1316_vm0, %v1335_v18, %v1336_v40  ;;  %v1164_v55 = vrot.slane %v1162_v38, 1 }
 0x10a   : > { %4782 = vst [vmem:[#allocation11_spill] sm:$0xff] %v4232_v27  ;;  %v1176_v52 = vrot.slane %v1174_v23, 1  ;;  %v1172_v25 = vor.u32 %v1171_v57, %v1167_v24  ;;  %v3490_v23 = vld [vmem:[%s4741_s4 + $0x218] sm:$0xff]  ;;  %v1181_v24 = vshll.u32 %v4083_v2, 16 }
 0x10b   : > { %v4251_v59 = vsel %vm1081_vm1, %v1160_v60, %v1164_v55  ;;  %v3482_v55 = vld [vmem:[%s4741_s4 + $0x1d8] sm:$0xff]  ;;  %v689_v60 = vpop.permute.xlu1 %688  ;;  %2683 = vmatpush.bf16.msra.mxu0 %v3490_v23 }
 0x10c   : > { %1831 = vmatmul.bf16.gmra.mxu2 %v4170_v16  ;;  %4784 = vst [vmem:[#allocation13_spill] sm:$0xff] %v4251_v59  ;;  %2594 = vmatpush.bf16.msra.mxu3 %v3482_v55 }
 0x111   : > { %2064 = vmatmul.bf16.gmra.mxu3 %v4025_v33 }
 0x113   : > { %v4189_v45 = vpop.f32.mrf.mxu3 }
 0x114   : > { %v4177_v26 = vpop.f32.mrf.mxu2  ;;  %4778 = vst [vmem:[#allocation7_spill] sm:$0xff] %v4189_v45  ;;  %v1179_v45 = vshrl.u32 %v4083_v2, 16 }
 0x116   : > { %v4197_v49 = vpop.f32.mrf.mxu1 }
 0x118   : > { %2153 = vmatmul.bf16.gmra.mxu0 %v4158_v63 }
 0x119   : > { %1742 = vmatmul.bf16.gmra.mxu1 %v4181_v34 }
 0x11b   : > { %v4211_v1 = vpop.f32.mrf.mxu3 }
 0x11c   : > { %v4194_v8 = vpop.f32.mrf.mxu2  ;;  %1836 = vmatmul.bf16.gmra.mxu2 %v4192_v48  ;;  %4780 = vst [vmem:[#allocation9_spill] sm:$0xff] %v4211_v1  ;;  %v4287_v1 = vsel %vm1081_vm1, %v1172_v25, %v1176_v52 }
 0x11d   : > { %4789 = vst [vmem:[#allocation18_spill] sm:$0xff] %v4287_v1 }
 0x11e   : > { %v4216_v13 = vpop.f32.mrf.mxu1 }
 0x121   : > { %2069 = vmatmul.bf16.gmra.mxu3 %v4066_v41 }
 0x123   : > { %v4239_v36 = vpop.f32.mrf.mxu3 }
 0x124   : > { %v4213_v3 = vpop.f32.mrf.mxu2  ;;  %4783 = vst [vmem:[#allocation12_spill] sm:$0xff] %v4239_v36  ;;  %v295_v36 = vld [vmem:[%s3708_s8 + $0x100] sm:$0xff] }
 0x125   : > { %v353_v30 = vmul.f32 %v4133_v37, %v295_v36  ;;  %v1186_v36 = vshll.u32 %v1071_v62, 16 }
 0x126   : > { %v4235_v28 = vpop.f32.mrf.mxu0 }
 0x127   : > { %v411_v25 = vadd.f32 %v4144_v19, %v353_v30 }
 0x128   : > { %2158 = vmatmul.bf16.gmra.mxu0 %v4181_v34 }
 0x129   : > { %1747 = vmatmul.bf16.gmra.mxu1 %v4219_v17 }
 0x12b   : > { %v4253_v40 = vpop.f32.mrf.mxu3 }
 0x12c   : > { %1841 = vmatmul.bf16.gmra.mxu2 %v4232_v27  ;;  %v4241_v51 = vpop.f32.mrf.mxu2  ;;  %4785 = vst [vmem:[#allocation14_spill] sm:$0xff] %v4253_v40  ;;  %v840_v40 = vmul.f32 %v689_v60, %v462_v61 }
 0x12e   : > { %v4243_v50 = vpop.f32.mrf.mxu1  ;;  %v4247_v5 = vpop.f32.mrf.mxu0  ;;  %v894_v55 = vpack.c.bf16 %v840_v40, %v840_v40  ;;  %v1183_v40 = vrot.slane %v1181_v24, 1 }
 0x130   : > { %v1184_v30 = vor.u32 %v1183_v40, %v1179_v45 }
 0x131   : > { %2074 = vmatmul.bf16.gmra.mxu3 %v3878_v46 }
 0x134   : > { %v4258_v18 = vpop.f32.mrf.mxu2 }
 0x136   : > { %v4260_v22 = vpop.f32.mrf.mxu1 }
 0x138   : > { %2163 = vmatmul.bf16.gmra.mxu0 %v4219_v17  ;;  %v301_v17 = vld [vmem:[%s3708_s8 + $0x130] sm:$0xff] }
 0x139   : > { %1752 = vmatmul.bf16.gmra.mxu1 %v4251_v59 }
 0x13c   : > { %1846 = vmatmul.bf16.gmra.mxu2 %v4264_v44  ;;  %v4278_v56 = vpop.f32.mrf.mxu3  ;;  %v4280_v9 = vpop.f32.mrf.mxu2  ;;  %v1342_v44 = vrot.slane %v1071_v62, 1 }
 0x13d   : > { %4787 = vst [vmem:[#allocation16_spill] sm:$0xff] %v4278_v56  ;;  %v1054_v56 = vunpack.c.l.b16 %v894_v55 }
 0x13e   : > { %v4269_v38 = vpop.f32.mrf.mxu0  ;;  %4788 = vst [vmem:[#allocation17_spill] sm:$0xff] %v4280_v9  ;;  %v4282_v12 = vpop.f32.mrf.mxu1  ;;  %v4302_v57 = vsel %vm1316_vm0, %v1341_v31, %v1342_v44  ;;  %v465_v31 = vmax.f32 %v411_v25, 0.0 }
 0x13f   : > { %4790 = vst [vmem:[#allocation19_spill] sm:$0xff] %v4302_v57  ;;  %v704_v44 = vpop.permute.xlu2 %703  ;;  %v1072_v7 = vpack.c.b16 %v1054_v56, %v1054_v56  ;;  %v1344_v56 = vrot.slane %v3840_v11, 1 }
 0x140   : > { %v843_v55 = vmul.f32 %v704_v44, %v465_v31  ;;  %v1193_v44 = vshll.u32 %v3840_v11, 16 }
 0x141   : > { %2079 = vmatmul.bf16.gmra.mxu3 %v3966_v21  ;;  %v1345_v62 = vrot.slane %v1072_v7, 1  ;;  %v298_v21 = vld [vmem:[%s3708_s8 + $0x118] sm:$0xff] }
 0x142   : > { %v897_v25 = vpack.c.bf16 %v843_v55, %v843_v55  ;;  %v1198_v55 = vshll.u32 %v1072_v7, 16  ;;  %v1191_v7 = vshrl.u32 %v3840_v11, 16 }
 0x144   : > { %v4304_v60 = vpop.f32.mrf.mxu3  ;;  %v1055_v31 = vunpack.c.l.b16 %v897_v25  ;;  %v1200_v25 = vrot.slane %v1198_v55, 1  ;;  %v3441_v55 = vld [vmem:[%s4741_s4 + $0x90] sm:$0xff] }
 0x145   : > { %4791 = vst [vmem:[#allocation20_spill] sm:$0xff] %v4304_v60  ;;  %v1188_v60 = vrot.slane %v1186_v36, 1  ;;  %v356_v36 = vmul.f32 %v4133_v37, %v298_v21  ;;  %v3473_v21 = vld [vmem:[%s4741_s4 + $0x190] sm:$0xff]  ;;  %2224 = vmatpush.bf16.msra.mxu1 %v3441_v55 }
 0x146   : > { %v4289_v29 = vpop.f32.mrf.mxu0  ;;  %v4309_v52 = vpop.f32.mrf.mxu1  ;;  %2506 = vmatpush.bf16.msra.mxu2 %v3473_v21 }
 0x147   : > { %v4325_v24 = vsel %vm1081_vm1, %v1184_v30, %v1188_v60  ;;  %v414_v30 = vadd.f32 %v4144_v19, %v356_v36 }
 0x148   : > { %2168 = vmatmul.bf16.gmra.mxu0 %v4251_v59  ;;  %4795 = vst [vmem:[#allocation24_spill] sm:$0xff] %v4325_v24 }
 0x149   : > { %1757 = vmatmul.bf16.gmra.mxu1 %v4287_v1 }
 0x14c   : > { %v4306_v61 = vpop.f32.mrf.mxu2  ;;  %1851 = vmatmul.bf16.gmra.mxu2 %v4302_v57 }
 0x14d   : > { %4792 = vst [vmem:[#allocation21_spill] sm:$0xff] %v4306_v61 }
 0x14e   : > { %v4314_v23 = vpop.f32.mrf.mxu0 }
 0x151   : > { %2084 = vmatmul.bf16.gmra.mxu3 %v4023_v32 }
 0x154   : > { %v4316_v27 = vpop.f32.mrf.mxu2  ;;  %v4318_v57 = vpop.f32.mrf.mxu3 }
 0x155   : > { %4793 = vst [vmem:[#allocation22_spill] sm:$0xff] %v4316_v27 }
 0x156   : > { %4794 = vst [vmem:[#allocation23_spill] sm:$0xff] %v4318_v57  ;;  %v4321_v59 = vpop.f32.mrf.mxu1  ;;  %v4332_v57 = vsel %vm1316_vm0, %v1344_v56, %v1345_v62  ;;  %v4337_v40 = vpop.f32.mrf.mxu0  ;;  %v3481_v62 = vld [vmem:[%s4741_s4 + $0x1d0] sm:$0xff]  ;;  %v1195_v56 = vrot.slane %v1193_v44, 1 }
 0x157   : > { %4796 = vst [vmem:[#allocation25_spill] sm:$0xff] %v4332_v57  ;;  %2595 = vmatpush.bf16.msra.mxu3 %v3481_v62 }
 0x158   : > { %2173 = vmatmul.bf16.gmra.mxu0 %v4287_v1  ;;  %v719_v1 = vpop.permute.xlu0 %718  ;;  %v1196_v48 = vor.u32 %v1195_v56, %v1191_v7  ;;  %v1205_v56 = vshll.u32 %v3906_v15, 16 }
 0x159   : > { %1762 = vmatmul.bf16.gmra.mxu1 %v4325_v24 }
 0x15a   : > { %v4354_v44 = vsel %vm1081_vm1, %v1196_v48, %v1200_v25 }
 0x15c   : > { %v4334_v32 = vpop.f32.mrf.mxu3  ;;  %1856 = vmatmul.bf16.gmra.mxu2 %v4332_v57  ;;  %v1817_v45 = vpop.f32.mrf.mxu2  ;;  %v468_v57 = vmax.f32 %v414_v30, 0.0  ;;  %v1347_v30 = vrot.slane %v3906_v15, 1 }
 0x15d   : > { %4797 = vst [vmem:[#allocation26_spill] sm:$0xff] %v4334_v32  ;;  %v1073_v32 = vpack.c.b16 %v1055_v31, %v1055_v31 }
 0x15e   : > { %v4339_v60 = vpop.f32.mrf.mxu1  ;;  %v846_v9 = vmul.f32 %v719_v1, %v468_v57  ;;  %v3489_v1 = vld [vmem:[%s4741_s4 + $0x210] sm:$0xff] }
 0x15f   : > { %v1348_v61 = vrot.slane %v1073_v32, 1  ;;  %2684 = vmatpush.bf16.msra.mxu0 %v3489_v1 }
 0x161   : > { %2089 = vmatmul.bf16.gmra.mxu3 %v4083_v2  ;;  %v4367_v48 = vsel %vm1316_vm0, %v1347_v30, %v1348_v61  ;;  %v1210_v61 = vshll.u32 %v1073_v32, 16 }
 0x162   : > { %4798 = vst [vmem:[#allocation27_spill] sm:$0xff] %v4367_v48 }
 0x163   : > { %v1212_v1 = vrot.slane %v1210_v61, 1 }
 0x164   : > { %v2050_v36 = vpop.f32.mrf.mxu3  ;;  %v1819_v46 = vpop.f32.mrf.mxu2 }
 0x165   : > { %v2139_v2 = vpop.f32.mrf.mxu0 }
 0x166   : > { %v1728_v27 = vpop.f32.mrf.mxu1 }
 0x167   : > { %v1729_v16 = vadd.f32 %v1728_v27, %v4187_v42  ;;  %v359_v42 = vmul.f32 %v4133_v37, %v301_v17  ;;  %v900_v27 = vpack.c.bf16 %v846_v9, %v846_v9 }
 0x168   : > { %2178 = vmatmul.bf16.gmra.mxu0 %v4325_v24 }
 0x169   : > { %v1818_v31 = vadd.f32 %v1817_v45, %v1729_v16  ;;  %1767 = vmatmul.bf16.gmra.mxu1 %v4354_v44  ;;  %v417_v25 = vadd.f32 %v4144_v19, %v359_v42  ;;  %v1056_v7 = vunpack.c.l.b16 %v900_v27 }
 0x16b   : > { %v2051_v16 = vadd.f32 %v2050_v36, %v1818_v31  ;;  %v1207_v36 = vrot.slane %v1205_v56, 1  ;;  %v471_v31 = vmax.f32 %v417_v25, 0.0  ;;  %v1074_v55 = vpack.c.b16 %v1056_v7, %v1056_v7  ;;  %v304_v56 = vld [vmem:[%s3708_s8 + $0x148] sm:$0xff] }
 0x16c   : > { %1861 = vmatmul.bf16.gmra.mxu2 %v4367_v48  ;;  %v2052_v57 = vpop.f32.mrf.mxu3  ;;  %v362_v7 = vmul.f32 %v4133_v37, %v304_v56 }
 0x16d   : > { %v4370_v45 = vadd.f32 %v2139_v2, %v2051_v16  ;;  %v2141_v21 = vpop.f32.mrf.mxu0  ;;  %v734_v16 = vpop.permute.xlu1 %733  ;;  %v1351_v32 = vrot.slane %v1074_v55, 1 }
 0x16e   : > { %v1730_v62 = vpop.f32.mrf.mxu1 }
 0x16f   : > { %4799 = vst [vmem:[#allocation28_spill] sm:$0xff] %v4370_v45  ;;  %v1731_v17 = vadd.f32 %v1730_v62, %v4209_v0  ;;  %v1822_v9 = vpop.f32.mrf.mxu2  ;;  %v1203_v45 = vshrl.u32 %v3906_v15, 16  ;;  %v849_v62 = vmul.f32 %v734_v16, %v471_v31 }
 0x171   : > { %v1820_v30 = vadd.f32 %v1819_v46, %v1731_v17  ;;  %2094 = vmatmul.bf16.gmra.mxu3 %v3840_v11  ;;  %v1208_v0 = vor.u32 %v1207_v36, %v1203_v45  ;;  %v903_v61 = vpack.c.bf16 %v849_v62, %v849_v62  ;;  %v1222_v62 = vshll.u32 %v1074_v55, 16 }
 0x173   : > { %v2053_v2 = vadd.f32 %v2052_v57, %v1820_v30  ;;  %v4382_v25 = vsel %vm1081_vm1, %v1208_v0, %v1212_v1  ;;  %v420_v1 = vadd.f32 %v4144_v19, %v362_v7  ;;  %v1057_v16 = vunpack.c.l.b16 %v903_v61 }
 0x174   : > { %v2055_v48 = vpop.f32.mrf.mxu3  ;;  %v1224_v55 = vrot.slane %v1222_v62, 1  ;;  %v1215_v7 = vshrl.u32 %v3964_v20, 16  ;;  %v3440_v62 = vld [vmem:[%s4741_s4 + $0x88] sm:$0xff] }
 0x175   : > { %v4377_v24 = vadd.f32 %v2141_v21, %v2053_v2  ;;  %v2144_v42 = vpop.f32.mrf.mxu0  ;;  %v1350_v21 = vrot.slane %v3964_v20, 1  ;;  %v1217_v2 = vshll.u32 %v3964_v20, 16  ;;  %v474_v56 = vmax.f32 %v420_v1, 0.0  ;;  %2225 = vmatpush.bf16.msra.mxu1 %v3440_v62  ;;  %v764_v62 = vpop.permute.xlu0 %763 }
 0x176   : > { %v1733_v27 = vpop.f32.mrf.mxu1 }
 0x177   : > { %4800 = vst [vmem:[#allocation29_spill] sm:$0xff] %v4377_v24  ;;  %v1734_v46 = vadd.f32 %v1733_v27, %v4235_v28  ;;  %v1824_v17 = vpop.f32.mrf.mxu2  ;;  %v4389_v45 = vsel %vm1316_vm0, %v1350_v21, %v1351_v32  ;;  %v1219_v32 = vrot.slane %v1217_v2, 1  ;;  %v749_v21 = vpop.permute.xlu2 %748  ;;  %v307_v24 = vld [vmem:[%s3708_s8 + $0x160] sm:$0xff] }
 0x178   : > { %2183 = vmatmul.bf16.gmra.mxu0 %v4354_v44  ;;  %4801 = vst [vmem:[#allocation30_spill] sm:$0xff] %v4389_v45 }
 0x179   : > { %v1823_v57 = vadd.f32 %v1822_v9, %v1734_v46  ;;  %1772 = vmatmul.bf16.gmra.mxu1 %v4382_v25 }
 0x17b   : > { %v2056_v30 = vadd.f32 %v2055_v48, %v1823_v57  ;;  %v3472_v48 = vld [vmem:[%s4741_s4 + $0x188] sm:$0xff]  ;;  %v1075_v57 = vpack.c.b16 %v1057_v16, %v1057_v16 }
 0x17c   : > { %1866 = vmatmul.bf16.gmra.mxu2 %v4389_v45  ;;  %v2057_v28 = vpop.f32.mrf.mxu3  ;;  %v852_v45 = vmul.f32 %v749_v21, %v474_v56 }
 0x17d   : > { %v4392_v36 = vadd.f32 %v2144_v42, %v2056_v30  ;;  %v2146_v31 = vpop.f32.mrf.mxu0  ;;  %v3480_v42 = vld [vmem:[%s4741_s4 + $0x1c8] sm:$0xff]  ;;  %2507 = vmatpush.bf16.msra.mxu2 %v3472_v48 }
 0x17e   : > { %v1735_v9 = vpop.f32.mrf.mxu1  ;;  %2596 = vmatpush.bf16.msra.mxu3 %v3480_v42  ;;  %v906_v48 = vpack.c.bf16 %v852_v45, %v852_v45 }
 0x17f   : > { %4802 = vst [vmem:[#allocation31_spill] sm:$0xff] %v4392_v36  ;;  %v1736_v27 = vadd.f32 %v1735_v9, %v4247_v5  ;;  %v1827_v0 = vpop.f32.mrf.mxu2  ;;  %v1354_v36 = vrot.slane %v1075_v57, 1 }
 0x181   : > { %v1825_v46 = vadd.f32 %v1824_v17, %v1736_v27  ;;  %2099 = vmatmul.bf16.gmra.mxu3 %v3906_v15  ;;  %v1220_v27 = vor.u32 %v1219_v32, %v1215_v7  ;;  %v1058_v7 = vunpack.c.l.b16 %v906_v48 }
 0x183   : > { %v2058_v5 = vadd.f32 %v2057_v28, %v1825_v46  ;;  %v4410_v16 = vsel %vm1081_vm1, %v1220_v27, %v1224_v55  ;;  %v3488_v46 = vld [vmem:[%s4741_s4 + $0x208] sm:$0xff]  ;;  %v1229_v55 = vshll.u32 %v4050_v54, 16 }
 0x184   : > { %v2060_v17 = vpop.f32.mrf.mxu3  ;;  %2685 = vmatpush.bf16.msra.mxu0 %v3488_v46 }
 0x185   : > { %v4405_v61 = vadd.f32 %v2146_v31, %v2058_v5  ;;  %v2149_v30 = vpop.f32.mrf.mxu0  ;;  %v1353_v31 = vrot.slane %v4050_v54, 1 }
 0x186   : > { %v1738_v9 = vpop.f32.mrf.mxu1 }
 0x187   : > { %v1739_v2 = vadd.f32 %v1738_v9, %v4269_v38  ;;  %v1829_v1 = vpop.f32.mrf.mxu2  ;;  %v365_v38 = vmul.f32 %v4133_v37, %v307_v24  ;;  %v4423_v42 = vsel %vm1316_vm0, %v1353_v31, %v1354_v36  ;;  %v1234_v36 = vshll.u32 %v1075_v57, 16 }
 0x188   : > { %2188 = vmatmul.bf16.gmra.mxu0 %v4382_v25  ;;  %4803 = vst [vmem:[#allocation32_spill] sm:$0xff] %v4423_v42 }
 0x189   : > { %v1828_v28 = vadd.f32 %v1827_v0, %v1739_v2  ;;  %1777 = vmatmul.bf16.gmra.mxu1 %v4410_v16  ;;  %v423_v9 = vadd.f32 %v4144_v19, %v365_v38  ;;  %v1076_v2 = vpack.c.b16 %v1058_v7, %v1058_v7  ;;  %v1236_v31 = vrot.slane %v1234_v36, 1 }
 0x18b   : > { %v2061_v0 = vadd.f32 %v2060_v17, %v1828_v28  ;;  %v1231_v17 = vrot.slane %v1229_v55, 1  ;;  %v477_v28 = vmax.f32 %v423_v9, 0.0  ;;  %v310_v55 = vld [vmem:[%s3708_s8 + $0x178] sm:$0xff] }
 0x18c   : > { %1871 = vmatmul.bf16.gmra.mxu2 %v4423_v42  ;;  %v2062_v32 = vpop.f32.mrf.mxu3  ;;  %v368_v9 = vmul.f32 %v4133_v37, %v310_v55 }
 0x18d   : > { %v4426_v56 = vadd.f32 %v2149_v30, %v2061_v0  ;;  %v2151_v5 = vpop.f32.mrf.mxu0  ;;  %v1227_v0 = vshrl.u32 %v4050_v54, 16  ;;  %v855_v57 = vmul.f32 %v764_v62, %v477_v28 }
 0x18e   : > { %v1740_v21 = vpop.f32.mrf.mxu1 }
 0x18f   : > { %v1741_v24 = vadd.f32 %v1740_v21, %v4289_v29  ;;  %v1832_v45 = vpop.f32.mrf.mxu2  ;;  %v1232_v29 = vor.u32 %v1231_v17, %v1227_v0  ;;  %v1357_v21 = vrot.slane %v1076_v2, 1  ;;  %v909_v36 = vpack.c.bf16 %v855_v57, %v855_v57 }
 0x190   : > { %v1246_v57 = vshll.u32 %v1076_v2, 16  ;;  %v779_v2 = vpop.permute.xlu1 %778 }
 0x191   : > { %v1830_v27 = vadd.f32 %v1829_v1, %v1741_v24  ;;  %2104 = vmatmul.bf16.gmra.mxu3 %v3964_v20  ;;  %v4438_v7 = vsel %vm1081_vm1, %v1232_v29, %v1236_v31  ;;  %v426_v31 = vadd.f32 %v4144_v19, %v368_v9  ;;  %v1059_v62 = vunpack.c.l.b16 %v909_v36 }
 0x192   : > { %v1239_v9 = vshrl.u32 %v3838_v10, 16 }
 0x193   : > { %v2063_v30 = vadd.f32 %v2062_v32, %v1830_v27  ;;  %v480_v55 = vmax.f32 %v426_v31, 0.0 }
 0x194   : > { %v2065_v46 = vpop.f32.mrf.mxu3 }
 0x195   : > { %v4433_v48 = vadd.f32 %v2151_v5, %v2063_v30  ;;  %v2154_v38 = vpop.f32.mrf.mxu0  ;;  %v1356_v5 = vrot.slane %v3838_v10, 1  ;;  %v1241_v30 = vshll.u32 %v3838_v10, 16 }
 0x196   : > { %v1743_v42 = vpop.f32.mrf.mxu1 }
 0x197   : > { %4804 = vst [vmem:[#allocation33_spill] sm:$0xff] %v4433_v48  ;;  %v1744_v1 = vadd.f32 %v1743_v42, %v4314_v23  ;;  %v1834_v24 = vpop.f32.mrf.mxu2  ;;  %v4445_v27 = vsel %vm1316_vm0, %v1356_v5, %v1357_v21  ;;  %v1243_v21 = vrot.slane %v1241_v30, 1  ;;  %v1248_v5 = vrot.slane %v1246_v57, 1  ;;  %v3439_v57 = vld [vmem:[%s4741_s4 + $0x80] sm:$0xff] }
 0x198   : > { %2193 = vmatmul.bf16.gmra.mxu0 %v4410_v16  ;;  %4805 = vst [vmem:[#allocation34_spill] sm:$0xff] %v4445_v27  ;;  %2226 = vmatpush.bf16.msra.mxu1 %v3439_v57 }
 0x199   : > { %v1833_v32 = vadd.f32 %v1832_v45, %v1744_v1  ;;  %1782 = vmatmul.bf16.gmra.mxu1 %v4438_v7 }
 0x19b   : > { %v2066_v17 = vadd.f32 %v2065_v46, %v1833_v32  ;;  %v3471_v46 = vld [vmem:[%s4741_s4 + $0x180] sm:$0xff]  ;;  %v1077_v32 = vpack.c.b16 %v1059_v62, %v1059_v62 }
 0x19c   : > { %1876 = vmatmul.bf16.gmra.mxu2 %v4445_v27  ;;  %v2067_v23 = vpop.f32.mrf.mxu3  ;;  %v313_v27 = vld [vmem:[%s3708_s8 + $0x190] sm:$0xff] }
 0x19d   : > { %v4448_v42 = vadd.f32 %v2154_v38, %v2066_v17  ;;  %v2156_v28 = vpop.f32.mrf.mxu0  ;;  %v3479_v38 = vld [vmem:[%s4741_s4 + $0x1c0] sm:$0xff]  ;;  %2508 = vmatpush.bf16.msra.mxu2 %v3471_v46  ;;  %v1360_v48 = vrot.slane %v1077_v32, 1 }
 0x19e   : > { %v1745_v45 = vpop.f32.mrf.mxu1  ;;  %2597 = vmatpush.bf16.msra.mxu3 %v3479_v38 }
 0x19f   : > { %4806 = vst [vmem:[#allocation35_spill] sm:$0xff] %v4448_v42  ;;  %v1746_v0 = vadd.f32 %v1745_v45, %v4337_v40  ;;  %v1837_v29 = vpop.f32.mrf.mxu2  ;;  %v858_v42 = vmul.f32 %v779_v2, %v480_v55  ;;  %v1253_v2 = vshll.u32 %v3904_v14, 16 }
 0x1a1   : > { %v1835_v1 = vadd.f32 %v1834_v24, %v1746_v0  ;;  %2109 = vmatmul.bf16.gmra.mxu3 %v4050_v54  ;;  %v1244_v0 = vor.u32 %v1243_v21, %v1239_v9  ;;  %v912_v46 = vpack.c.bf16 %v858_v42, %v858_v42 }
 0x1a3   : > { %v2068_v40 = vadd.f32 %v2067_v23, %v1835_v1  ;;  %v4466_v62 = vsel %vm1081_vm1, %v1244_v0, %v1248_v5  ;;  %v3487_v1 = vld [vmem:[%s4741_s4 + $0x200] sm:$0xff] }
 0x1a4   : > { %v2070_v24 = vpop.f32.mrf.mxu3  ;;  %2686 = vmatpush.bf16.msra.mxu0 %v3487_v1  ;;  %v1251_v1 = vshrl.u32 %v3904_v14, 16 }
 0x1a5   : > { %v4461_v36 = vadd.f32 %v2156_v28, %v2068_v40  ;;  %v2159_v17 = vpop.f32.mrf.mxu0  ;;  %v1359_v28 = vrot.slane %v3904_v14, 1 }
 0x1a6   : > { %v1748_v45 = vpop.f32.mrf.mxu1 }
 0x1a7   : > { %v1749_v30 = vadd.f32 %v1748_v45, %v4197_v49  ;;  %v1839_v31 = vpop.f32.mrf.mxu2  ;;  %v371_v49 = vmul.f32 %v4133_v37, %v313_v27  ;;  %v4479_v38 = vsel %vm1316_vm0, %v1359_v28, %v1360_v48  ;;  %v1060_v45 = vunpack.c.l.b16 %v912_v46 }
 0x1a8   : > { %2198 = vmatmul.bf16.gmra.mxu0 %v4438_v7  ;;  %v1258_v48 = vshll.u32 %v1077_v32, 16 }
 0x1a9   : > { %v1838_v23 = vadd.f32 %v1837_v29, %v1749_v30  ;;  %1787 = vmatmul.bf16.gmra.mxu1 %v4466_v62  ;;  %v429_v9 = vadd.f32 %v4144_v19, %v371_v49  ;;  %v1078_v30 = vpack.c.b16 %v1060_v45, %v1060_v45 }
 0x1aa   : > { %v1260_v28 = vrot.slane %v1258_v48, 1 }
 0x1ab   : > { %v2071_v29 = vadd.f32 %v2070_v24, %v1838_v23  ;;  %v1255_v24 = vrot.slane %v1253_v2, 1  ;;  %v483_v0 = vmax.f32 %v429_v9, 0.0 }
 0x1ac   : > { %1881 = vmatmul.bf16.gmra.mxu2 %v4479_v38  ;;  %v2072_v21 = vpop.f32.mrf.mxu3 }
 0x1ad   : > { %v4482_v55 = vadd.f32 %v2159_v17, %v2071_v29  ;;  %v2161_v40 = vpop.f32.mrf.mxu0  ;;  %v794_v17 = vpop.permute.xlu2 %793  ;;  %v1256_v46 = vor.u32 %v1255_v24, %v1251_v1 }
 0x1ae   : > { %v1750_v5 = vpop.f32.mrf.mxu1 }
 0x1af   : > { %v1751_v37 = vadd.f32 %v1750_v5, %v4216_v13  ;;  %v1842_v27 = vpop.f32.mrf.mxu2  ;;  %v861_v13 = vmul.f32 %v794_v17, %v483_v0  ;;  %v1363_v5 = vrot.slane %v1078_v30, 1  ;;  %v4493_v2 = vsel %vm1081_vm1, %v1256_v46, %v1260_v28 }
 0x1b0   : > { %v1270_v28 = vshll.u32 %v1078_v30, 16 }
 0x1b1   : > { %v1840_v42 = vadd.f32 %v1839_v31, %v1751_v37  ;;  %2114 = vmatmul.bf16.gmra.mxu3 %v3838_v10 }
 0x1b3   : > { %v2073_v23 = vadd.f32 %v2072_v21, %v1840_v42  ;;  %v1362_v21 = vrot.slane %v3997_v53, 1 }
 0x1b4   : > { %v2075_v57 = vpop.f32.mrf.mxu3 }
 0x1b5   : > { %v4489_v29 = vadd.f32 %v2161_v40, %v2073_v23  ;;  %v2164_v19 = vpop.f32.mrf.mxu0  ;;  %v915_v40 = vpack.c.bf16 %v861_v13, %v861_v13  ;;  %v4499_v45 = vsel %vm1316_vm0, %v1362_v21, %v1363_v5  ;;  %v1272_v13 = vrot.slane %v1270_v28, 1 }
 0x1b6   : > { %v1753_v49 = vpop.f32.mrf.mxu1 }
 0x1b7   : > { %v1754_v32 = vadd.f32 %v1753_v49, %v4243_v50  ;;  %v1844_v31 = vpop.f32.mrf.mxu2  ;;  %v1061_v0 = vunpack.c.l.b16 %v915_v40 }
 0x1b8   : > { %2203 = vmatmul.bf16.gmra.mxu0 %v4466_v62 }
 0x1b9   : > { %v1843_v9 = vadd.f32 %v1842_v27, %v1754_v32  ;;  %1792 = vmatmul.bf16.gmra.mxu1 %v4493_v2  ;;  %v1265_v27 = vshll.u32 %v3997_v53, 16  ;;  %v1079_v46 = vpack.c.b16 %v1061_v0, %v1061_v0 }
 0x1bb   : > { %v2076_v37 = vadd.f32 %v2075_v57, %v1843_v9  ;;  %v1267_v49 = vrot.slane %v1265_v27, 1  ;;  %v1366_v40 = vrot.slane %v1079_v46, 1 }
 0x1bc   : > { %1886 = vmatmul.bf16.gmra.mxu2 %v4499_v45  ;;  %v2077_v48 = vpop.f32.mrf.mxu3 }
 0x1bd   : > { %v4502_v50 = vadd.f32 %v2164_v19, %v2076_v37  ;;  %v2166_v42 = vpop.f32.mrf.mxu0  ;;  %v1263_v19 = vshrl.u32 %v3997_v53, 16 }
 0x1be   : > { %v1755_v24 = vpop.f32.mrf.mxu1 }
 0x1bf   : > { %v1756_v23 = vadd.f32 %v1755_v24, %v4260_v22  ;;  %v1847_v17 = vpop.f32.mrf.mxu2  ;;  %v1268_v37 = vor.u32 %v1267_v49, %v1263_v19 }
 0x1c1   : > { %v1845_v1 = vadd.f32 %v1844_v31, %v1756_v23  ;;  %2119 = vmatmul.bf16.gmra.mxu3 %v3904_v14  ;;  %v4512_v30 = vsel %vm1081_vm1, %v1268_v37, %v1272_v13 }
 0x1c3   : > { %v2078_v57 = vadd.f32 %v2077_v48, %v1845_v1  ;;  %v1365_v48 = vrot.slane %v4068_v43, 1  ;;  %v1277_v1 = vshll.u32 %v4068_v43, 16 }
 0x1c4   : > { %v2080_v5 = vpop.f32.mrf.mxu3 }
 0x1c5   : > { %v4508_v32 = vadd.f32 %v2166_v42, %v2078_v57  ;;  %v2169_v9 = vpop.f32.mrf.mxu0  ;;  %v4518_v42 = vsel %vm1316_vm0, %v1365_v48, %v1366_v40  ;;  %v1282_v57 = vshll.u32 %v1079_v46, 16  ;;  %v1279_v19 = vrot.slane %v1277_v1, 1 }
 0x1c6   : > { %v1758_v21 = vpop.f32.mrf.mxu1  ;;  %4807 = vst [vmem:[#allocation36_spill] sm:$0xff] %v4518_v42  ;;  %v1275_v40 = vshrl.u32 %v4068_v43, 16 }
 0x1c7   : > { %v1759_v22 = vadd.f32 %v1758_v21, %v4282_v12  ;;  %v1849_v24 = vpop.f32.mrf.mxu2  ;;  %v1284_v37 = vrot.slane %v1282_v57, 1 }
 0x1c8   : > { %2208 = vmatmul.bf16.gmra.mxu0 %v4493_v2  ;;  %v1280_v48 = vor.u32 %v1279_v19, %v1275_v40 }
 0x1c9   : > { %v1848_v31 = vadd.f32 %v1847_v17, %v1759_v22  ;;  %1797 = vmatmul.bf16.gmra.mxu1 %v4512_v30 }
 0x1cb   : > { %v2081_v27 = vadd.f32 %v2080_v5, %v1848_v31 }
 0x1cc   : > { %1891 = vmatmul.bf16.gmra.mxu2 %v4518_v42  ;;  %v2082_v0 = vpop.f32.mrf.mxu3 }
 0x1cd   : > { %v4521_v23 = vadd.f32 %v2169_v9, %v2081_v27  ;;  %v2171_v12 = vpop.f32.mrf.mxu0 }
 0x1ce   : > { %v1760_v28 = vpop.f32.mrf.mxu1 }
 0x1cf   : > { %v1761_v17 = vadd.f32 %v1760_v28, %v4309_v52  ;;  %v1852_v49 = vpop.f32.mrf.mxu2  ;;  %v4531_v52 = vsel %vm1081_vm1, %v1280_v48, %v1284_v37 }
 0x1d1   : > { %v1850_v13 = vadd.f32 %v1849_v24, %v1761_v17  ;;  %2124 = vmatmul.bf16.gmra.mxu3 %v3997_v53 }
 0x1d3   : > { %v2083_v21 = vadd.f32 %v2082_v0, %v1850_v13 }
 0x1d4   : > { %v2085_v5 = vpop.f32.mrf.mxu3 }
 0x1d5   : > { %v4527_v22 = vadd.f32 %v2171_v12, %v2083_v21  ;;  %v2174_v9 = vpop.f32.mrf.mxu0 }
 0x1d6   : > { %v1763_v31 = vpop.f32.mrf.mxu1 }
 0x1d7   : > { %v1764_v27 = vadd.f32 %v1763_v31, %v4321_v59  ;;  %v1854_v42 = vpop.f32.mrf.mxu2 }
 0x1d8   : > { %2213 = vmatmul.bf16.gmra.mxu0 %v4512_v30 }
 0x1d9   : > { %v1853_v46 = vadd.f32 %v1852_v49, %v1764_v27  ;;  %1802 = vmatmul.bf16.gmra.mxu1 %v4531_v52 }
 0x1db   : > { %v2086_v24 = vadd.f32 %v2085_v5, %v1853_v46 }
 0x1dc   : > { %v2087_v0 = vpop.f32.mrf.mxu3  ;;  %2509 = vmatmul.bf16.vlgmr.msra.gmra.mxu2 %v3935_v47 }
 0x1dd   : > { %v4536_v12 = vadd.f32 %v2174_v9, %v2086_v24  ;;  %v2176_v28 = vpop.f32.mrf.mxu0 }
 0x1de   : > { %v1765_v1 = vpop.f32.mrf.mxu1 }
 0x1df   : > { %v1766_v17 = vadd.f32 %v1765_v1, %v4339_v60  ;;  %v1857_v59 = vpop.f32.mrf.mxu2 }
 0x1e1   : > { %v1855_v57 = vadd.f32 %v1854_v42, %v1766_v17  ;;  %2598 = vmatmul.bf16.vlgmr.msra.gmra.mxu3 %v4126_v35 }
 0x1e3   : > { %v2088_v13 = vadd.f32 %v2087_v0, %v1855_v57 }
 0x1e4   : > { %v2090_v49 = vpop.f32.mrf.mxu3 }
 0x1e5   : > { %v4540_v19 = vadd.f32 %v2176_v28, %v2088_v13  ;;  %v2179_v21 = vpop.f32.mrf.mxu0 }
 0x1e6   : > { %v1768_v37 = vpop.f32.mrf.mxu1 }
 0x1e7   : > { %v1769_v5 = vadd.f32 %v1768_v37, %v4177_v26  ;;  %v1859_v40 = vpop.f32.mrf.mxu2 }
 0x1e8   : > { %2687 = vmatmul.bf16.vlgmr.msra.gmra.mxu0 %v4105_v4 }
 0x1e9   : > { %v1858_v47 = vadd.f32 %v1857_v59, %v1769_v5  ;;  %2227 = vmatmul.bf16.vlgmr.msra.gmra.mxu1 %v4097_v58 }
 0x1eb   : > { %v2091_v9 = vadd.f32 %v2090_v49, %v1858_v47 }
 0x1ec   : > { %v2092_v60 = vpop.f32.mrf.mxu3  ;;  %2514 = vmatmul.bf16.gmra.mxu2 %v4025_v33 }
 0x1ed   : > { %v4546_v42 = vadd.f32 %v2179_v21, %v2091_v9  ;;  %v2181_v35 = vpop.f32.mrf.mxu0 }
 0x1ee   : > { %v1770_v31 = vpop.f32.mrf.mxu1 }
 0x1ef   : > { %v1771_v48 = vadd.f32 %v1770_v31, %v4194_v8  ;;  %v1862_v27 = vpop.f32.mrf.mxu2 }
 0x1f1   : > { %v1860_v46 = vadd.f32 %v1859_v40, %v1771_v48  ;;  %2603 = vmatmul.bf16.gmra.mxu3 %v4158_v63  ;;  %v4809_v48 = vld [vmem:[#allocation2_spill] sm:$0xff] }
 0x1f3   : > { %v2093_v26 = vadd.f32 %v2092_v60, %v1860_v46 }
 0x1f4   : > { %v2095_v24 = vpop.f32.mrf.mxu3 }
 0x1f5   : > { %v4550_v0 = vadd.f32 %v2181_v35, %v2093_v26  ;;  %v2184_v28 = vpop.f32.mrf.mxu0  ;;  %v4808_v35 = vld [vmem:[#allocation6_spill] sm:$0xff]  ;;  %v4810_v26 = vld [vmem:[#allocation17_spill] sm:$0xff] }
 0x1f6   : > { %v1773_v58 = vpop.f32.mrf.mxu1 }
 0x1f7   : > { %v1774_v1 = vadd.f32 %v1773_v58, %v4213_v3  ;;  %v1864_v17 = vpop.f32.mrf.mxu2 }
 0x1f8   : > { %2692 = vmatmul.bf16.gmra.mxu0 %v4137_v39 }
 0x1f9   : > { %v1863_v33 = vadd.f32 %v1862_v27, %v1774_v1  ;;  %2232 = vmatmul.bf16.gmra.mxu1 %v4086_v6  ;;  %v4811_v1 = vld [vmem:[#allocation10_spill] sm:$0xff] }
 0x1fb   : > { %v2096_v59 = vadd.f32 %v2095_v24, %v1863_v33 }
 0x1fc   : > { %v2097_v8 = vpop.f32.mrf.mxu3  ;;  %2519 = vmatmul.bf16.gmra.mxu2 %v4066_v41 }
 0x1fd   : > { %v4556_v57 = vadd.f32 %v2184_v28, %v2096_v59  ;;  %v2186_v63 = vpop.f32.mrf.mxu0 }
 0x1fe   : > { %v1775_v13 = vpop.f32.mrf.mxu1 }
 0x1ff   : > { %v1776_v49 = vadd.f32 %v1775_v13, %v4241_v51  ;;  %v1867_v21 = vpop.f32.mrf.mxu2 }
 0x201   : > { %v1865_v37 = vadd.f32 %v1864_v17, %v1776_v49  ;;  %2608 = vmatmul.bf16.gmra.mxu3 %v4181_v34 }
 0x203   : > { %v2098_v3 = vadd.f32 %v2097_v8, %v1865_v37  ;;  %v4812_v8 = vld [vmem:[#allocation21_spill] sm:$0xff] }
 0x204   : > { %v2100_v5 = vpop.f32.mrf.mxu3 }
 0x205   : > { %v4560_v40 = vadd.f32 %v2186_v63, %v2098_v3  ;;  %v2189_v47 = vpop.f32.mrf.mxu0 }
 0x206   : > { %v1778_v6 = vpop.f32.mrf.mxu1 }
 0x207   : > { %v1779_v9 = vadd.f32 %v1778_v6, %v4258_v18  ;;  %v1869_v60 = vpop.f32.mrf.mxu2 }
 0x208   : > { %2697 = vmatmul.bf16.gmra.mxu0 %v4808_v35 }
 0x209   : > { %v1868_v41 = vadd.f32 %v1867_v21, %v1779_v9  ;;  %2237 = vmatmul.bf16.gmra.mxu1 %v4105_v4  ;;  %v4813_v21 = vld [vmem:[#allocation8_spill] sm:$0xff] }
 0x20b   : > { %v2101_v31 = vadd.f32 %v2100_v5, %v1868_v41  ;;  %v4814_v5 = vld [vmem:[#allocation3_spill] sm:$0xff] }
 0x20c   : > { %v2102_v51 = vpop.f32.mrf.mxu3  ;;  %2524 = vmatmul.bf16.gmra.mxu2 %v4809_v48  ;;  %v4816_v48 = vld [vmem:[#allocation13_spill] sm:$0xff] }
 0x20d   : > { %v4566_v27 = vadd.f32 %v2189_v47, %v2101_v31  ;;  %v2191_v34 = vpop.f32.mrf.mxu0 }
 0x20e   : > { %v1780_v46 = vpop.f32.mrf.mxu1 }
 0x20f   : > { %v1781_v24 = vadd.f32 %v1780_v46, %v4810_v26  ;;  %v1872_v28 = vpop.f32.mrf.mxu2 }
 0x211   : > { %v1870_v58 = vadd.f32 %v1869_v60, %v1781_v24  ;;  %2613 = vmatmul.bf16.gmra.mxu3 %v4811_v1  ;;  %v4815_v60 = vld [vmem:[#allocation22_spill] sm:$0xff] }
 0x213   : > { %v2103_v18 = vadd.f32 %v2102_v51, %v1870_v58 }
 0x214   : > { %v2105_v17 = vpop.f32.mrf.mxu3 }
 0x215   : > { %v4570_v33 = vadd.f32 %v2191_v34, %v2103_v18  ;;  %v2194_v59 = vpop.f32.mrf.mxu0 }
 0x216   : > { %v1783_v4 = vpop.f32.mrf.mxu1 }
 0x217   : > { %v1784_v63 = vadd.f32 %v1783_v4, %v4812_v8  ;;  %v1874_v13 = vpop.f32.mrf.mxu2  ;;  %v4819_v8 = vld [vmem:[#allocation4_spill] sm:$0xff] }
 0x218   : > { %2702 = vmatmul.bf16.gmra.mxu0 %v4813_v21 }
 0x219   : > { %v1873_v49 = vadd.f32 %v1872_v28, %v1784_v63  ;;  %2242 = vmatmul.bf16.gmra.mxu1 %v4137_v39  ;;  %v4817_v28 = vld [vmem:[#allocation7_spill] sm:$0xff] }
 0x21b   : > { %v2106_v37 = vadd.f32 %v2105_v17, %v1873_v49  ;;  %v4818_v17 = vld [vmem:[#allocation11_spill] sm:$0xff] }
 0x21c   : > { %v2107_v3 = vpop.f32.mrf.mxu3  ;;  %2529 = vmatmul.bf16.gmra.mxu2 %v4814_v5 }
 0x21d   : > { %v4576_v47 = vadd.f32 %v2194_v59, %v2106_v37  ;;  %v2196_v6 = vpop.f32.mrf.mxu0  ;;  %v4820_v37 = vld [vmem:[#allocation9_spill] sm:$0xff] }
 0x21e   : > { %v1785_v9 = vpop.f32.mrf.mxu1 }
 0x21f   : > { %v1786_v41 = vadd.f32 %v1785_v9, %v4815_v60  ;;  %v1877_v31 = vpop.f32.mrf.mxu2  ;;  %v4821_v9 = vld [vmem:[#allocation18_spill] sm:$0xff] }
 0x221   : > { %v1875_v51 = vadd.f32 %v1874_v13, %v1786_v41  ;;  %2618 = vmatmul.bf16.gmra.mxu3 %v4816_v48  ;;  %v4822_v48 = vld [vmem:[#allocation12_spill] sm:$0xff] }
 0x223   : > { %v2108_v34 = vadd.f32 %v2107_v3, %v1875_v51 }
 0x224   : > { %v2110_v46 = vpop.f32.mrf.mxu3 }
 0x225   : > { %v4580_v26 = vadd.f32 %v2196_v6, %v2108_v34  ;;  %v2199_v24 = vpop.f32.mrf.mxu0 }
 0x226   : > { %v1788_v39 = vpop.f32.mrf.mxu1 }
 0x227   : > { %v1789_v58 = vadd.f32 %v1788_v39, %v4817_v28  ;;  %v1879_v1 = vpop.f32.mrf.mxu2 }
 0x228   : > { %2707 = vmatmul.bf16.gmra.mxu0 %v4818_v17 }
 0x229   : > { %v1878_v18 = vadd.f32 %v1877_v31, %v1789_v58  ;;  %2247 = vmatmul.bf16.gmra.mxu1 %v4808_v35 }
 0x22b   : > { %v2111_v59 = vadd.f32 %v2110_v46, %v1878_v18  ;;  %v4824_v18 = vld [vmem:[#allocation5_spill] sm:$0xff] }
 0x22c   : > { %v2112_v4 = vpop.f32.mrf.mxu3  ;;  %2534 = vmatmul.bf16.gmra.mxu2 %v4819_v8  ;;  %v4825_v8 = vld [vmem:[#allocation14_spill] sm:$0xff] }
 0x22d   : > { %v4586_v63 = vadd.f32 %v2199_v24, %v2111_v59  ;;  %v2201_v13 = vpop.f32.mrf.mxu0  ;;  %v4823_v24 = vld [vmem:[#allocation15_spill] sm:$0xff] }
 0x22e   : > { %v1790_v49 = vpop.f32.mrf.mxu1 }
 0x22f   : > { %v1791_v3 = vadd.f32 %v1790_v49, %v4820_v37  ;;  %v1882_v5 = vpop.f32.mrf.mxu2 }
 0x231   : > { %v1880_v6 = vadd.f32 %v1879_v1, %v1791_v3  ;;  %2623 = vmatmul.bf16.gmra.mxu3 %v4821_v9  ;;  %v4826_v3 = vld [vmem:[#allocation24_spill] sm:$0xff] }
 0x233   : > { %v2113_v60 = vadd.f32 %v2112_v4, %v1880_v6 }
 0x234   : > { %v2115_v41 = vpop.f32.mrf.mxu3 }
 0x235   : > { %v4590_v31 = vadd.f32 %v2201_v13, %v2113_v60  ;;  %v2204_v51 = vpop.f32.mrf.mxu0 }
 0x236   : > { %v1793_v35 = vpop.f32.mrf.mxu1 }
 0x237   : > { %v1794_v34 = vadd.f32 %v1793_v35, %v4822_v48  ;;  %v1884_v46 = vpop.f32.mrf.mxu2 }
 0x238   : > { %2712 = vmatmul.bf16.gmra.mxu0 %v4823_v24 }
 0x239   : > { %v1883_v39 = vadd.f32 %v1882_v5, %v1794_v34  ;;  %2252 = vmatmul.bf16.gmra.mxu1 %v4813_v21 }
 0x23b   : > { %v2116_v28 = vadd.f32 %v2115_v41, %v1883_v39  ;;  %v4827_v41 = vld [vmem:[#allocation16_spill] sm:$0xff] }
 0x23c   : > { %v2117_v58 = vpop.f32.mrf.mxu3  ;;  %2539 = vmatmul.bf16.gmra.mxu2 %v4824_v18 }
 0x23d   : > { %v4596_v1 = vadd.f32 %v2204_v51, %v2116_v28  ;;  %v2206_v59 = vpop.f32.mrf.mxu0  ;;  %v4828_v51 = vld [vmem:[#allocation19_spill] sm:$0xff] }
 0x23e   : > { %v1795_v4 = vpop.f32.mrf.mxu1 }
 0x23f   : > { %v1796_v13 = vadd.f32 %v1795_v4, %v4825_v8  ;;  %v1887_v49 = vpop.f32.mrf.mxu2 }
 0x241   : > { %v1885_v37 = vadd.f32 %v1884_v46, %v1796_v13  ;;  %2628 = vmatmul.bf16.gmra.mxu3 %v4826_v3 }
 0x243   : > { %v2118_v6 = vadd.f32 %v2117_v58, %v1885_v37 }
 0x244   : > { %v2120_v5 = vpop.f32.mrf.mxu3 }
 0x245   : > { %v4600_v9 = vadd.f32 %v2206_v59, %v2118_v6  ;;  %v2209_v60 = vpop.f32.mrf.mxu0  ;;  %v4829_v59 = vld [vmem:[#allocation20_spill] sm:$0xff] }
 0x246   : > { %v1798_v21 = vpop.f32.mrf.mxu1 }
 0x247   : > { %v1799_v35 = vadd.f32 %v1798_v21, %v4827_v41  ;;  %v1889_v48 = vpop.f32.mrf.mxu2 }
 0x248   : > { %2717 = vmatmul.bf16.gmra.mxu0 %v4828_v51 }
 0x249   : > { %v1888_v34 = vadd.f32 %v1887_v49, %v1799_v35  ;;  %2257 = vmatmul.bf16.gmra.mxu1 %v4818_v17 }
 0x24b   : > { %v2121_v39 = vadd.f32 %v2120_v5, %v1888_v34  ;;  %v4830_v5 = vld [vmem:[#allocation23_spill] sm:$0xff] }
 0x24c   : > { %v2122_v28 = vpop.f32.mrf.mxu3  ;;  %2544 = vmatmul.bf16.gmra.mxu2 %v3840_v11 }
 0x24d   : > { %v4606_v46 = vadd.f32 %v2209_v60, %v2121_v39  ;;  %v2211_v58 = vpop.f32.mrf.mxu0  ;;  %v4831_v60 = vld [vmem:[#allocation25_spill] sm:$0xff] }
 0x24e   : > { %v1800_v18 = vpop.f32.mrf.mxu1 }
 0x24f   : > { %v1801_v4 = vadd.f32 %v1800_v18, %v4829_v59  ;;  %v1892_v8 = vpop.f32.mrf.mxu2 }
 0x251   : > { %v1890_v13 = vadd.f32 %v1889_v48, %v1801_v4  ;;  %2633 = vmatmul.bf16.gmra.mxu3 %v4354_v44 }
 0x253   : > { %v2123_v37 = vadd.f32 %v2122_v28, %v1890_v13  ;;  %v4832_v28 = vld [vmem:[#allocation26_spill] sm:$0xff] }
 0x254   : > { %v2125_v49 = vpop.f32.mrf.mxu3 }
 0x255   : > { %v4610_v3 = vadd.f32 %v2211_v58, %v2123_v37  ;;  %v2214_v6 = vpop.f32.mrf.mxu0 }
 0x256   : > { %v1803_v17 = vpop.f32.mrf.mxu1 }
 0x257   : > { %v1804_v21 = vadd.f32 %v1803_v17, %v4830_v5  ;;  %v1894_v41 = vpop.f32.mrf.mxu2 }
 0x258   : > { %2722 = vmatmul.bf16.gmra.mxu0 %v4831_v60 }
 0x259   : > { %v1893_v11 = vadd.f32 %v1892_v8, %v1804_v21  ;;  %2262 = vmatmul.bf16.gmra.mxu1 %v4823_v24  ;;  %v4834_v21 = vld [vmem:[#allocation27_spill] sm:$0xff] }
 0x25b   : > { %v2126_v35 = vadd.f32 %v2125_v49, %v1893_v11 }
 0x25c   : > { %v2127_v34 = vpop.f32.mrf.mxu3  ;;  %2549 = vmatmul.bf16.gmra.mxu2 %v3906_v15  ;;  %v4833_v15 = vld [vmem:[#allocation28_spill] sm:$0xff] }
 0x25d   : > { %v4616_v44 = vadd.f32 %v2214_v6, %v2126_v35  ;;  %v2216_v48 = vpop.f32.mrf.mxu0 }
 0x25e   : > { %v1805_v39 = vpop.f32.mrf.mxu1 }
 0x25f   : > { %v1806_v58 = vadd.f32 %v1805_v39, %v4832_v28  ;;  %v2510_v18 = vpop.f32.mrf.mxu2  ;;  %v4835_v39 = vld [vmem:[#allocation29_spill] sm:$0xff] }
 0x261   : > { %v1895_v59 = vadd.f32 %v1894_v41, %v1806_v58  ;;  %2638 = vmatmul.bf16.gmra.mxu3 %v4382_v25 }
 0x263   : > { %v2128_v4 = vadd.f32 %v2127_v34, %v1895_v59 }
 0x264   : > { %v2599_v8 = vpop.f32.mrf.mxu3 }
 0x265   : > { %v2600_v13 = vadd.f32 %v2599_v8, %v2510_v18  ;;  %v4621_v37 = vadd.f32 %v2216_v48, %v2128_v4  ;;  %v2688_v24 = vpop.f32.mrf.mxu0 }
 0x266   : > { %v2228_v49 = vpop.f32.mrf.mxu1 }
 0x267   : > { %v2689_v17 = vadd.f32 %v2688_v24, %v2600_v13  ;;  %v2229_v6 = vadd.f32 %v2228_v49, %v4833_v15  ;;  %v2512_v5 = vpop.f32.mrf.mxu2  ;;  %v4836_v15 = vld [vmem:[#allocation31_spill] sm:$0xff] }
 0x268   : > { %2727 = vmatmul.bf16.gmra.mxu0 %v4834_v21 }
 0x269   : > { %v2768_v25 = vadd.f32 %v2689_v17, %v2229_v6  ;;  %2267 = vmatmul.bf16.gmra.mxu1 %v4828_v51 }
 0x26b   : > { %2800 = vst [vmem:[%s4627_s11] sm:$0xff] %v2768_v25  ;;  %v2869_v59 = vmul.f32 %v2768_v25, %v2768_v25 }
 0x26c   : > { %2554 = vmatmul.bf16.gmra.mxu2 %v3964_v20  ;;  %v2601_v41 = vpop.f32.mrf.mxu3 }
 0x26d   : > { %v2602_v11 = vadd.f32 %v2601_v41, %v2512_v5  ;;  %v2690_v35 = vpop.f32.mrf.mxu0 }
 0x26e   : > { %v2230_v34 = vpop.f32.mrf.mxu1 }
 0x26f   : > { %v2691_v48 = vadd.f32 %v2690_v35, %v2602_v11  ;;  %v2231_v28 = vadd.f32 %v2230_v34, %v4835_v39  ;;  %v2515_v58 = vpop.f32.mrf.mxu2  ;;  %v4837_v11 = vld [vmem:[#allocation30_spill] sm:$0xff] }
 0x271   : > { %v2769_v18 = vadd.f32 %v2691_v48, %v2231_v28  ;;  %2643 = vmatmul.bf16.gmra.mxu3 %v4410_v16 }
 0x273   : > { %2801 = vst [vmem:[%s4627_s11 + $0x8] sm:$0xff] %v2769_v18  ;;  %v2832_v4 = vadd.f32 %v2769_v18, %v2768_v25  ;;  %v2870_v8 = vmul.f32 %v2769_v18, %v2769_v18 }
 0x274   : > { %v2604_v51 = vpop.f32.mrf.mxu3 }
 0x275   : > { %v2901_v13 = vadd.f32 %v2870_v8, %v2869_v59  ;;  %v2605_v24 = vadd.f32 %v2604_v51, %v2515_v58  ;;  %v2693_v20 = vpop.f32.mrf.mxu0 }
 0x276   : > { %v2233_v49 = vpop.f32.mrf.mxu1 }
 0x277   : > { %v2694_v17 = vadd.f32 %v2693_v20, %v2605_v24  ;;  %v2234_v6 = vadd.f32 %v2233_v49, %v4836_v15  ;;  %v2517_v5 = vpop.f32.mrf.mxu2 }
 0x278   : > { %2732 = vmatmul.bf16.gmra.mxu0 %v4837_v11 }
 0x279   : > { %v2770_v41 = vadd.f32 %v2694_v17, %v2234_v6  ;;  %2272 = vmatmul.bf16.gmra.mxu1 %v4831_v60 }
 0x27b   : > { %2802 = vst [vmem:[%s4627_s11 + $0x10] sm:$0xff] %v2770_v41  ;;  %v2833_v16 = vadd.f32 %v2832_v4, %v2770_v41  ;;  %v2871_v35 = vmul.f32 %v2770_v41, %v2770_v41 }
 0x27c   : > { %2559 = vmatmul.bf16.gmra.mxu2 %v4050_v54  ;;  %v2606_v25 = vpop.f32.mrf.mxu3 }
 0x27d   : > { %v2902_v34 = vadd.f32 %v2901_v13, %v2871_v35  ;;  %v2607_v48 = vadd.f32 %v2606_v25, %v2517_v5  ;;  %v2695_v39 = vpop.f32.mrf.mxu0  ;;  %v4838_v5 = vld [vmem:[#allocation32_spill] sm:$0xff] }
 0x27e   : > { %v2235_v28 = vpop.f32.mrf.mxu1 }
 0x27f   : > { %v2696_v58 = vadd.f32 %v2695_v39, %v2607_v48  ;;  %v2236_v18 = vadd.f32 %v2235_v28, %v4405_v61  ;;  %v2520_v59 = vpop.f32.mrf.mxu2  ;;  %v4839_v39 = vld [vmem:[#allocation33_spill] sm:$0xff] }
 0x281   : > { %v2771_v8 = vadd.f32 %v2696_v58, %v2236_v18  ;;  %2648 = vmatmul.bf16.gmra.mxu3 %v4438_v7 }
 0x283   : > { %2803 = vst [vmem:[%s4627_s11 + $0x18] sm:$0xff] %v2771_v8  ;;  %v2834_v60 = vadd.f32 %v2833_v16, %v2771_v8  ;;  %v2872_v51 = vmul.f32 %v2771_v8, %v2771_v8 }
 0x284   : > { %v2609_v4 = vpop.f32.mrf.mxu3 }
 0x285   : > { %v2903_v24 = vadd.f32 %v2902_v34, %v2872_v51  ;;  %v2610_v20 = vadd.f32 %v2609_v4, %v2520_v59  ;;  %v2698_v54 = vpop.f32.mrf.mxu0 }
 0x286   : > { %v2238_v49 = vpop.f32.mrf.mxu1 }
 0x287   : > { %v2699_v13 = vadd.f32 %v2698_v54, %v2610_v20  ;;  %v2239_v17 = vadd.f32 %v2238_v49, %v4426_v56  ;;  %v2522_v15 = vpop.f32.mrf.mxu2 }
 0x288   : > { %2737 = vmatmul.bf16.gmra.mxu0 %v4838_v5 }
 0x289   : > { %v2772_v6 = vadd.f32 %v2699_v13, %v2239_v17  ;;  %2277 = vmatmul.bf16.gmra.mxu1 %v4834_v21  ;;  %v4841_v13 = vld [vmem:[#allocation34_spill] sm:$0xff] }
 0x28b   : > { %2804 = vst [vmem:[%s4627_s11 + $0x20] sm:$0xff] %v2772_v6  ;;  %v2835_v61 = vadd.f32 %v2834_v60, %v2772_v6  ;;  %v2873_v7 = vmul.f32 %v2772_v6, %v2772_v6 }
 0x28c   : > { %2564 = vmatmul.bf16.gmra.mxu2 %v3838_v10  ;;  %v2611_v41 = vpop.f32.mrf.mxu3 }
 0x28d   : > { %v2904_v16 = vadd.f32 %v2903_v24, %v2873_v7  ;;  %v2612_v35 = vadd.f32 %v2611_v41, %v2522_v15  ;;  %v2700_v25 = vpop.f32.mrf.mxu0  ;;  %v4840_v24 = vld [vmem:[#allocation35_spill] sm:$0xff] }
 0x28e   : > { %v2240_v34 = vpop.f32.mrf.mxu1 }
 0x28f   : > { %v2701_v48 = vadd.f32 %v2700_v25, %v2612_v35  ;;  %v2241_v56 = vadd.f32 %v2240_v34, %v4839_v39  ;;  %v2525_v28 = vpop.f32.mrf.mxu2 }
 0x291   : > { %v2773_v58 = vadd.f32 %v2701_v48, %v2241_v56  ;;  %2653 = vmatmul.bf16.gmra.mxu3 %v4466_v62  ;;  %v315_v56 = vld [vmem:[%s3708_s8 + $0x1a0] sm:$0xff] }
 0x293   : > { %2805 = vst [vmem:[%s4627_s11 + $0x28] sm:$0xff] %v2773_v58  ;;  %v2836_v21 = vadd.f32 %v2835_v61, %v2773_v58  ;;  %v2874_v18 = vmul.f32 %v2773_v58, %v2773_v58 }
 0x294   : > { %v2614_v59 = vpop.f32.mrf.mxu3 }
 0x295   : > { %v2905_v8 = vadd.f32 %v2904_v16, %v2874_v18  ;;  %v2615_v60 = vadd.f32 %v2614_v59, %v2525_v28  ;;  %v2703_v10 = vpop.f32.mrf.mxu0 }
 0x296   : > { %v2243_v51 = vpop.f32.mrf.mxu1 }
 0x297   : > { %v2704_v4 = vadd.f32 %v2703_v10, %v2615_v60  ;;  %v2244_v20 = vadd.f32 %v2243_v51, %v4840_v24  ;;  %v2527_v54 = vpop.f32.mrf.mxu2 }
 0x298   : > { %2742 = vmatmul.bf16.gmra.mxu0 %v4841_v13 }
 0x299   : > { %v2774_v49 = vadd.f32 %v2704_v4, %v2244_v20  ;;  %2282 = vmatmul.bf16.gmra.mxu1 %v4837_v11  ;;  %v316_v4 = vld [vmem:[%s3708_s8 + $0x1a8] sm:$0xff] }
 0x29b   : > { %2806 = vst [vmem:[%s4627_s11 + $0x30] sm:$0xff] %v2774_v49  ;;  %v2837_v62 = vadd.f32 %v2836_v21, %v2774_v49  ;;  %v2875_v17 = vmul.f32 %v2774_v49, %v2774_v49 }
 0x29c   : > { %2569 = vmatmul.bf16.gmra.mxu2 %v3904_v14  ;;  %v2616_v15 = vpop.f32.mrf.mxu3  ;;  %v314_v14 = vld [vmem:[%s3708_s8 + $0x198] sm:$0xff]  ;;  %s3035_s8 = sshll.u32 %s4844_s22, 1 }
 0x29d   : > { %v2906_v6 = vadd.f32 %v2905_v8, %v2875_v17  ;;  %v2617_v61 = vadd.f32 %v2616_v15, %v2527_v54  ;;  %v2705_v7 = vpop.f32.mrf.mxu0  ;;  %s262_s18 = scalar_lea.vmem %s4743_s6, %s3035_s8 }
 0x29e   : > { %v2245_v41 = vpop.f32.mrf.mxu1 }
 0x29f   : > { %v2706_v16 = vadd.f32 %v2705_v7, %v2617_v61  ;;  %v2246_v35 = vadd.f32 %v2245_v41, %v4461_v36  ;;  %v2530_v25 = vpop.f32.mrf.mxu2 }
 0x2a1   : > { %v2775_v34 = vadd.f32 %v2706_v16, %v2246_v35  ;;  %2658 = vmatmul.bf16.gmra.mxu3 %v4493_v2  ;;  %v3536_v2 = vld [vmem:[%s4738_s1] ss:$0 sm:$0xff] }
 0x2a2   : > { %v373_v60 = vmul.f32 %v3536_v2, %v315_v56  ;;  %v372_v10 = vmul.f32 %v3536_v2, %v314_v14 }
 0x2a3   : > { %2807 = vst [vmem:[%s4627_s11 + $0x38] sm:$0xff] %v2775_v34  ;;  %v2838_v11 = vadd.f32 %v2837_v62, %v2775_v34  ;;  %v2876_v48 = vmul.f32 %v2775_v34, %v2775_v34  ;;  %v804_v34 = vpop.permute.xlu1 %803 }
 0x2a4   : > { %v2619_v39 = vpop.f32.mrf.mxu3 }
 0x2a5   : > { %v2907_v28 = vadd.f32 %v2906_v6, %v2876_v48  ;;  %v2620_v58 = vadd.f32 %v2619_v39, %v2530_v25  ;;  %v2708_v21 = vpop.f32.mrf.mxu0  ;;  %v374_v6 = vmul.f32 %v3536_v2, %v316_v4 }
 0x2a6   : > { %v2248_v18 = vpop.f32.mrf.mxu1 }
 0x2a7   : > { %v2709_v59 = vadd.f32 %v2708_v21, %v2620_v58  ;;  %v2249_v8 = vadd.f32 %v2248_v18, %v4482_v55  ;;  %v2532_v36 = vpop.f32.mrf.mxu2  ;;  %v3537_v55 = vld [vmem:[%s4739_s2] ss:$0 sm:$0xff] }
 0x2a8   : > { %2747 = vmatmul.bf16.gmra.mxu0 %v4479_v38  ;;  %v431_v54 = vadd.f32 %v3537_v55, %v373_v60  ;;  %v430_v49 = vadd.f32 %v3537_v55, %v372_v10  ;;  %v432_v39 = vadd.f32 %v3537_v55, %v374_v6 }
 0x2a9   : > { %v2776_v51 = vadd.f32 %v2709_v59, %v2249_v8  ;;  %2287 = vmatmul.bf16.gmra.mxu1 %v4838_v5 }
 0x2aa   : > { %v485_v35 = vmax.f32 %v431_v54, 0.0  ;;  %v484_v25 = vmax.f32 %v430_v49, 0.0  ;;  %v486_v59 = vmax.f32 %v432_v39, 0.0 }
 0x2ab   : > { %2808 = vst [vmem:[%s4627_s11 + $0x40] sm:$0xff] %v2776_v51  ;;  %v2839_v24 = vadd.f32 %v2838_v11, %v2776_v51  ;;  %v2877_v20 = vmul.f32 %v2776_v51, %v2776_v51  ;;  %v799_v11 = vpop.permute.xlu0 %798 }
 0x2ac   : > { %2574 = vmatmul.bf16.gmra.mxu2 %v3997_v53  ;;  %v2621_v62 = vpop.f32.mrf.mxu3  ;;  %v863_v14 = vmul.f32 %v804_v34, %v485_v35 }
 0x2ad   : > { %v2908_v17 = vadd.f32 %v2907_v28, %v2877_v20  ;;  %v2622_v15 = vadd.f32 %v2621_v62, %v2532_v36  ;;  %v2710_v61 = vpop.f32.mrf.mxu0  ;;  %v862_v28 = vmul.f32 %v799_v11, %v484_v25  ;;  %v809_v36 = vpop.permute.xlu2 %808 }
 0x2ae   : > { %v2250_v7 = vpop.f32.mrf.mxu1  ;;  %v917_v51 = vpack.c.bf16 %v863_v14, %v863_v14 }
 0x2af   : > { %v2711_v5 = vadd.f32 %v2710_v61, %v2622_v15  ;;  %v2251_v41 = vadd.f32 %v2250_v7, %v4489_v29  ;;  %v2535_v16 = vpop.f32.mrf.mxu2 }
 0x2b0   : > { %v990_v54 = vunpack.c.l.b16 %v917_v51 }
 0x2b1   : > { %v2777_v48 = vadd.f32 %v2711_v5, %v2251_v41  ;;  %2663 = vmatmul.bf16.gmra.mxu3 %v4512_v30  ;;  %v916_v30 = vpack.c.bf16 %v862_v28, %v862_v28 }
 0x2b3   : > { %2809 = vst [vmem:[%s4627_s11 + $0x48] sm:$0xff] %v2777_v48  ;;  %v2840_v53 = vadd.f32 %v2839_v24, %v2777_v48  ;;  %v2878_v56 = vmul.f32 %v2777_v48, %v2777_v48  ;;  %v864_v24 = vmul.f32 %v809_v36, %v486_v59  ;;  %v989_v49 = vunpack.c.l.b16 %v916_v30  ;;  %v4842_v59 = vld [vmem:[#allocation36_spill] sm:$0xff] }
 0x2b4   : > { %v2624_v58 = vpop.f32.mrf.mxu3 }
 0x2b5   : > { %v2909_v21 = vadd.f32 %v2908_v17, %v2878_v56  ;;  %v2625_v18 = vadd.f32 %v2624_v58, %v2535_v16  ;;  %v2713_v29 = vpop.f32.mrf.mxu0  ;;  %v918_v15 = vpack.c.bf16 %v864_v24, %v864_v24 }
 0x2b6   : > { %v2253_v8 = vpop.f32.mrf.mxu1 }
 0x2b7   : > { %v2714_v2 = vadd.f32 %v2713_v29, %v2625_v18  ;;  %v2254_v60 = vadd.f32 %v2253_v8, %v4502_v50  ;;  %v2537_v10 = vpop.f32.mrf.mxu2  ;;  %v1062_v35 = vunpack.c.l.b16 %v918_v15 }
 0x2b8   : > { %2752 = vmatmul.bf16.gmra.mxu0 %v4499_v45 }
 0x2b9   : > { %v2778_v4 = vadd.f32 %v2714_v2, %v2254_v60  ;;  %2292 = vmatmul.bf16.gmra.mxu1 %v4841_v13  ;;  %v1008_v13 = vpack.c.b16 %v990_v54, %v989_v49 }
 0x2bb   : > { %2810 = vst [vmem:[%s4627_s11 + $0x50] sm:$0xff] %v2778_v4  ;;  %v2841_v20 = vadd.f32 %v2840_v53, %v2778_v4  ;;  %v2879_v55 = vmul.f32 %v2778_v4, %v2778_v4  ;;  %v1080_v53 = vpack.c.b16 %v1062_v35, %v1062_v35  ;;  %v1287_v29 = vshrl.u32 %v1008_v13, 16 }
 0x2bc   : > { %2579 = vmatmul.bf16.gmra.mxu2 %v4068_v43  ;;  %v2626_v62 = vpop.f32.mrf.mxu3  ;;  %v1289_v43 = vshll.u32 %v1008_v13, 16 }
 0x2bd   : > { %v2910_v17 = vadd.f32 %v2909_v21, %v2879_v55  ;;  %v2627_v50 = vadd.f32 %v2626_v62, %v2537_v10  ;;  %v2715_v6 = vpop.f32.mrf.mxu0 }
 0x2be   : > { %v2255_v61 = vpop.f32.mrf.mxu1  ;;  %v1291_v21 = vrot.slane %v1289_v43, 1 }
 0x2bf   : > { %v2716_v7 = vadd.f32 %v2715_v6, %v2627_v50  ;;  %v2256_v5 = vadd.f32 %v2255_v61, %v4508_v32  ;;  %v2540_v41 = vpop.f32.mrf.mxu2  ;;  %v1368_v50 = vrot.slane %v1008_v13, 1  ;;  %v1369_v61 = vrot.slane %v1080_v53, 1 }
 0x2c0   : > { %v1292_v60 = vor.u32 %v1291_v21, %v1287_v29 }
 0x2c1   : > { %v2779_v16 = vadd.f32 %v2716_v7, %v2256_v5  ;;  %2668 = vmatmul.bf16.gmra.mxu3 %v4531_v52  ;;  %v1294_v52 = vshll.u32 %v1080_v53, 16  ;;  %v1370_v35 = vsel %vm1316_vm0, %v1368_v50, %v1369_v61 }
 0x2c3   : > { %2811 = vst [vmem:[%s4627_s11 + $0x58] sm:$0xff] %v2779_v16  ;;  %v2842_v25 = vadd.f32 %v2841_v20, %v2779_v16  ;;  %v2880_v34 = vmul.f32 %v2779_v16, %v2779_v16  ;;  %v1296_v30 = vrot.slane %v1294_v52, 1 }
 0x2c4   : > { %v2629_v11 = vpop.f32.mrf.mxu3 }
 0x2c5   : > { %v2911_v48 = vadd.f32 %v2910_v17, %v2880_v34  ;;  %v2630_v39 = vadd.f32 %v2629_v11, %v2540_v41  ;;  %v2718_v56 = vpop.f32.mrf.mxu0 }
 0x2c6   : > { %v2258_v14 = vpop.f32.mrf.mxu1 }
 0x2c7   : > { %v2719_v28 = vadd.f32 %v2718_v56, %v2630_v39  ;;  %v2259_v32 = vadd.f32 %v2258_v14, %v4521_v23  ;;  %v2542_v58 = vpop.f32.mrf.mxu2 }
 0x2c8   : > { %2757 = vmatmul.bf16.gmra.mxu0 %v4842_v59 }
 0x2c9   : > { %v2780_v18 = vadd.f32 %v2719_v28, %v2259_v32  ;;  %2297 = vmatmul.bf16.gmra.mxu1 %v4479_v38  ;;  %v1297_v38 = vsel %vm1081_vm1, %v1292_v60, %v1296_v30 }
 0x2cb   : > { %2812 = vst [vmem:[%s4627_s11 + $0x60] sm:$0xff] %v2780_v18  ;;  %v2843_v8 = vadd.f32 %v2842_v25, %v2780_v18  ;;  %v2881_v36 = vmul.f32 %v2780_v18, %v2780_v18 }
 0x2cc   : > { %2584 = vmatmul.bf16.gmra.mxu2 %v1008_v13  ;;  %v2631_v2 = vpop.f32.mrf.mxu3 }
 0x2cd   : > { %v2912_v10 = vadd.f32 %v2911_v48, %v2881_v36  ;;  %v2632_v51 = vadd.f32 %v2631_v2, %v2542_v58  ;;  %v2720_v23 = vpop.f32.mrf.mxu0 }
 0x2ce   : > { %v2260_v4 = vpop.f32.mrf.mxu1 }
 0x2cf   : > { %v2721_v24 = vadd.f32 %v2720_v23, %v2632_v51  ;;  %v2261_v20 = vadd.f32 %v2260_v4, %v4527_v22  ;;  %v2545_v55 = vpop.f32.mrf.mxu2 }
 0x2d1   : > { %v2781_v54 = vadd.f32 %v2721_v24, %v2261_v20  ;;  %2673 = vmatmul.bf16.gmra.mxu3 %v1297_v38 }
 0x2d3   : > { %2813 = vst [vmem:[%s4627_s11 + $0x68] sm:$0xff] %v2781_v54  ;;  %v2844_v49 = vadd.f32 %v2843_v8, %v2781_v54  ;;  %v2882_v62 = vmul.f32 %v2781_v54, %v2781_v54 }
 0x2d4   : > { %v2634_v17 = vpop.f32.mrf.mxu3 }
 0x2d5   : > { %v2913_v15 = vadd.f32 %v2912_v10, %v2882_v62  ;;  %v2635_v6 = vadd.f32 %v2634_v17, %v2545_v55  ;;  %v2723_v7 = vpop.f32.mrf.mxu0 }
 0x2d6   : > { %v2263_v5 = vpop.f32.mrf.mxu1 }
 0x2d7   : > { %v2724_v41 = vadd.f32 %v2723_v7, %v2635_v6  ;;  %v2264_v16 = vadd.f32 %v2263_v5, %v4536_v12  ;;  %v2547_v22 = vpop.f32.mrf.mxu2 }
 0x2d8   : > { %2762 = vmatmul.bf16.gmra.mxu0 %v1370_v35 }
 0x2d9   : > { %v2782_v25 = vadd.f32 %v2724_v41, %v2264_v16  ;;  %2302 = vmatmul.bf16.gmra.mxu1 %v4499_v45 }
 0x2db   : > { %2814 = vst [vmem:[%s4627_s11 + $0x70] sm:$0xff] %v2782_v25  ;;  %v2845_v34 = vadd.f32 %v2844_v49, %v2782_v25  ;;  %v2883_v11 = vmul.f32 %v2782_v25, %v2782_v25 }
 0x2dc   : > { %v2636_v13 = vpop.f32.mrf.mxu3 }
 0x2dd   : > { %v2914_v43 = vadd.f32 %v2913_v15, %v2883_v11  ;;  %v2637_v48 = vadd.f32 %v2636_v13, %v2547_v22  ;;  %v2725_v39 = vpop.f32.mrf.mxu0 }
 0x2de   : > { %v2265_v53 = vpop.f32.mrf.mxu1 }
 0x2df   : > { %v2726_v56 = vadd.f32 %v2725_v39, %v2637_v48  ;;  %v2266_v12 = vadd.f32 %v2265_v53, %v4540_v19  ;;  %v2550_v14 = vpop.f32.mrf.mxu2 }
 0x2e1   : > { %v2783_v28 = vadd.f32 %v2726_v56, %v2266_v12 }
 0x2e3   : > { %2815 = vst [vmem:[%s4627_s11 + $0x78] sm:$0xff] %v2783_v28  ;;  %v2846_v32 = vadd.f32 %v2845_v34, %v2783_v28  ;;  %v2884_v58 = vmul.f32 %v2783_v28, %v2783_v28 }
 0x2e4   : > { %v2639_v21 = vpop.f32.mrf.mxu3 }
 0x2e5   : > { %v2915_v18 = vadd.f32 %v2914_v43, %v2884_v58  ;;  %v2640_v45 = vadd.f32 %v2639_v21, %v2550_v14  ;;  %v2728_v59 = vpop.f32.mrf.mxu0 }
 0x2e6   : > { %v2268_v52 = vpop.f32.mrf.mxu1 }
 0x2e7   : > { %v2729_v29 = vadd.f32 %v2728_v59, %v2640_v45  ;;  %v2269_v8 = vadd.f32 %v2268_v52, %v4546_v42  ;;  %v2552_v36 = vpop.f32.mrf.mxu2 }
 0x2e9   : > { %v2784_v2 = vadd.f32 %v2729_v29, %v2269_v8 }
 0x2eb   : > { %2816 = vst [vmem:[%s4627_s11 + $0x80] sm:$0xff] %v2784_v2  ;;  %v2847_v60 = vadd.f32 %v2846_v32, %v2784_v2  ;;  %v2885_v10 = vmul.f32 %v2784_v2, %v2784_v2 }
 0x2ec   : > { %v2641_v19 = vpop.f32.mrf.mxu3 }
 0x2ed   : > { %v2916_v51 = vadd.f32 %v2915_v18, %v2885_v10  ;;  %v2642_v30 = vadd.f32 %v2641_v19, %v2552_v36  ;;  %v2730_v23 = vpop.f32.mrf.mxu0 }
 0x2ee   : > { %v2270_v4 = vpop.f32.mrf.mxu1 }
 0x2ef   : > { %v2731_v24 = vadd.f32 %v2730_v23, %v2642_v30  ;;  %v2271_v20 = vadd.f32 %v2270_v4, %v4550_v0  ;;  %v2555_v55 = vpop.f32.mrf.mxu2 }
 0x2f1   : > { %v2785_v38 = vadd.f32 %v2731_v24, %v2271_v20 }
 0x2f3   : > { %2817 = vst [vmem:[%s4627_s11 + $0x88] sm:$0xff] %v2785_v38  ;;  %v2848_v54 = vadd.f32 %v2847_v60, %v2785_v38  ;;  %v2886_v49 = vmul.f32 %v2785_v38, %v2785_v38 }
 0x2f4   : > { %v2644_v42 = vpop.f32.mrf.mxu3 }
 0x2f5   : > { %v2917_v62 = vadd.f32 %v2916_v51, %v2886_v49  ;;  %v2645_v17 = vadd.f32 %v2644_v42, %v2555_v55  ;;  %v2733_v50 = vpop.f32.mrf.mxu0 }
 0x2f6   : > { %v2273_v15 = vpop.f32.mrf.mxu1 }
 0x2f7   : > { %v2734_v6 = vadd.f32 %v2733_v50, %v2645_v17  ;;  %v2274_v61 = vadd.f32 %v2273_v15, %v4556_v57  ;;  %v2557_v7 = vpop.f32.mrf.mxu2 }
 0x2f9   : > { %v2786_v5 = vadd.f32 %v2734_v6, %v2274_v61 }
 0x2fb   : > { %2818 = vst [vmem:[%s4627_s11 + $0x90] sm:$0xff] %v2786_v5  ;;  %v2849_v41 = vadd.f32 %v2848_v54, %v2786_v5  ;;  %v2887_v16 = vmul.f32 %v2786_v5, %v2786_v5 }
 0x2fc   : > { %v2646_v0 = vpop.f32.mrf.mxu3 }
 0x2fd   : > { %v2918_v22 = vadd.f32 %v2917_v62, %v2887_v16  ;;  %v2647_v35 = vadd.f32 %v2646_v0, %v2557_v7  ;;  %v2735_v25 = vpop.f32.mrf.mxu0 }
 0x2fe   : > { %v2275_v34 = vpop.f32.mrf.mxu1 }
 0x2ff   : > { %v2736_v11 = vadd.f32 %v2735_v25, %v2647_v35  ;;  %v2276_v13 = vadd.f32 %v2275_v34, %v4560_v40  ;;  %v2560_v43 = vpop.f32.mrf.mxu2 }
 0x301   : > { %v2787_v48 = vadd.f32 %v2736_v11, %v2276_v13 }
 0x303   : > { %2819 = vst [vmem:[%s4627_s11 + $0x98] sm:$0xff] %v2787_v48  ;;  %v2850_v39 = vadd.f32 %v2849_v41, %v2787_v48  ;;  %v2888_v53 = vmul.f32 %v2787_v48, %v2787_v48 }
 0x304   : > { %v2649_v57 = vpop.f32.mrf.mxu3 }
 0x305   : > { %v2919_v56 = vadd.f32 %v2918_v22, %v2888_v53  ;;  %v2650_v12 = vadd.f32 %v2649_v57, %v2560_v43  ;;  %v2738_v14 = vpop.f32.mrf.mxu0 }
 0x306   : > { %v2278_v28 = vpop.f32.mrf.mxu1 }
 0x307   : > { %v2739_v32 = vadd.f32 %v2738_v14, %v2650_v12  ;;  %v2279_v58 = vadd.f32 %v2278_v28, %v4566_v27  ;;  %v2562_v21 = vpop.f32.mrf.mxu2 }
 0x309   : > { %v2788_v18 = vadd.f32 %v2739_v32, %v2279_v58 }
 0x30b   : > { %2820 = vst [vmem:[%s4627_s11 + $0xa0] sm:$0xff] %v2788_v18  ;;  %v2851_v45 = vadd.f32 %v2850_v39, %v2788_v18  ;;  %v2889_v59 = vmul.f32 %v2788_v18, %v2788_v18 }
 0x30c   : > { %v2651_v40 = vpop.f32.mrf.mxu3 }
 0x30d   : > { %v2920_v52 = vadd.f32 %v2919_v56, %v2889_v59  ;;  %v2652_v29 = vadd.f32 %v2651_v40, %v2562_v21  ;;  %v2740_v8 = vpop.f32.mrf.mxu0 }
 0x30e   : > { %v2280_v36 = vpop.f32.mrf.mxu1 }
 0x30f   : > { %v2741_v2 = vadd.f32 %v2740_v8, %v2652_v29  ;;  %v2281_v60 = vadd.f32 %v2280_v36, %v4570_v33  ;;  %v2565_v10 = vpop.f32.mrf.mxu2 }
 0x311   : > { %v2789_v19 = vadd.f32 %v2741_v2, %v2281_v60 }
 0x313   : > { %2821 = vst [vmem:[%s4627_s11 + $0xa8] sm:$0xff] %v2789_v19  ;;  %v2852_v51 = vadd.f32 %v2851_v45, %v2789_v19  ;;  %v2890_v30 = vmul.f32 %v2789_v19, %v2789_v19 }
 0x314   : > { %v2654_v27 = vpop.f32.mrf.mxu3 }
 0x315   : > { %v2921_v23 = vadd.f32 %v2920_v52, %v2890_v30  ;;  %v2655_v4 = vadd.f32 %v2654_v27, %v2565_v10  ;;  %v2743_v24 = vpop.f32.mrf.mxu0 }
 0x316   : > { %v2283_v20 = vpop.f32.mrf.mxu1 }
 0x317   : > { %v2744_v55 = vadd.f32 %v2743_v24, %v2655_v4  ;;  %v2284_v38 = vadd.f32 %v2283_v20, %v4576_v47  ;;  %v2567_v54 = vpop.f32.mrf.mxu2 }
 0x319   : > { %v2790_v49 = vadd.f32 %v2744_v55, %v2284_v38 }
 0x31b   : > { %2822 = vst [vmem:[%s4627_s11 + $0xb0] sm:$0xff] %v2790_v49  ;;  %v2853_v42 = vadd.f32 %v2852_v51, %v2790_v49  ;;  %v2891_v62 = vmul.f32 %v2790_v49, %v2790_v49 }
 0x31c   : > { %v2656_v33 = vpop.f32.mrf.mxu3 }
 0x31d   : > { %v2922_v17 = vadd.f32 %v2921_v23, %v2891_v62  ;;  %v2657_v50 = vadd.f32 %v2656_v33, %v2567_v54  ;;  %v2745_v15 = vpop.f32.mrf.mxu0 }
 0x31e   : > { %v2285_v6 = vpop.f32.mrf.mxu1 }
 0x31f   : > { %v2746_v61 = vadd.f32 %v2745_v15, %v2657_v50  ;;  %v2286_v7 = vadd.f32 %v2285_v6, %v4580_v26  ;;  %v2570_v5 = vpop.f32.mrf.mxu2 }
 0x321   : > { %v2791_v41 = vadd.f32 %v2746_v61, %v2286_v7 }
 0x323   : > { %2823 = vst [vmem:[%s4627_s11 + $0xb8] sm:$0xff] %v2791_v41  ;;  %v2854_v16 = vadd.f32 %v2853_v42, %v2791_v41  ;;  %v2892_v0 = vmul.f32 %v2791_v41, %v2791_v41 }
 0x324   : > { %v2659_v47 = vpop.f32.mrf.mxu3 }
 0x325   : > { %v2923_v22 = vadd.f32 %v2922_v17, %v2892_v0  ;;  %v2660_v35 = vadd.f32 %v2659_v47, %v2570_v5  ;;  %v2748_v25 = vpop.f32.mrf.mxu0 }
 0x326   : > { %v2288_v34 = vpop.f32.mrf.mxu1 }
 0x327   : > { %v2749_v11 = vadd.f32 %v2748_v25, %v2660_v35  ;;  %v2289_v13 = vadd.f32 %v2288_v34, %v4586_v63  ;;  %v2572_v43 = vpop.f32.mrf.mxu2 }
 0x329   : > { %v2792_v48 = vadd.f32 %v2749_v11, %v2289_v13 }
 0x32b   : > { %2824 = vst [vmem:[%s4627_s11 + $0xc0] sm:$0xff] %v2792_v48  ;;  %v2855_v39 = vadd.f32 %v2854_v16, %v2792_v48  ;;  %v2893_v53 = vmul.f32 %v2792_v48, %v2792_v48 }
 0x32c   : > { %v2661_v26 = vpop.f32.mrf.mxu3 }
 0x32d   : > { %v2924_v57 = vadd.f32 %v2923_v22, %v2893_v53  ;;  %v2662_v56 = vadd.f32 %v2661_v26, %v2572_v43  ;;  %v2750_v12 = vpop.f32.mrf.mxu0 }
 0x32e   : > { %v2290_v14 = vpop.f32.mrf.mxu1 }
 0x32f   : > { %v2751_v28 = vadd.f32 %v2750_v12, %v2662_v56  ;;  %v2291_v32 = vadd.f32 %v2290_v14, %v4590_v31  ;;  %v2575_v58 = vpop.f32.mrf.mxu2 }
 0x331   : > { %v2793_v21 = vadd.f32 %v2751_v28, %v2291_v32 }
 0x333   : > { %2825 = vst [vmem:[%s4627_s11 + $0xc8] sm:$0xff] %v2793_v21  ;;  %v2856_v18 = vadd.f32 %v2855_v39, %v2793_v21  ;;  %v2894_v45 = vmul.f32 %v2793_v21, %v2793_v21 }
 0x334   : > { %v2664_v63 = vpop.f32.mrf.mxu3 }
 0x335   : > { %v2925_v59 = vadd.f32 %v2924_v57, %v2894_v45  ;;  %v2665_v40 = vadd.f32 %v2664_v63, %v2575_v58  ;;  %v2753_v52 = vpop.f32.mrf.mxu0 }
 0x336   : > { %v2293_v29 = vpop.f32.mrf.mxu1 }
 0x337   : > { %v2754_v8 = vadd.f32 %v2753_v52, %v2665_v40  ;;  %v2294_v36 = vadd.f32 %v2293_v29, %v4596_v1  ;;  %v2577_v2 = vpop.f32.mrf.mxu2 }
 0x339   : > { %v2794_v60 = vadd.f32 %v2754_v8, %v2294_v36 }
 0x33b   : > { %2826 = vst [vmem:[%s4627_s11 + $0xd0] sm:$0xff] %v2794_v60  ;;  %v2857_v10 = vadd.f32 %v2856_v18, %v2794_v60  ;;  %v2895_v19 = vmul.f32 %v2794_v60, %v2794_v60 }
 0x33c   : > { %v2666_v31 = vpop.f32.mrf.mxu3 }
 0x33d   : > { %v2926_v51 = vadd.f32 %v2925_v59, %v2895_v19  ;;  %v2667_v30 = vadd.f32 %v2666_v31, %v2577_v2  ;;  %v2755_v27 = vpop.f32.mrf.mxu0 }
 0x33e   : > { %v2295_v23 = vpop.f32.mrf.mxu1 }
 0x33f   : > { %v2756_v4 = vadd.f32 %v2755_v27, %v2667_v30  ;;  %v2296_v24 = vadd.f32 %v2295_v23, %v4600_v9  ;;  %v2580_v20 = vpop.f32.mrf.mxu2 }
 0x341   : > { %v2795_v55 = vadd.f32 %v2756_v4, %v2296_v24 }
 0x343   : > { %2827 = vst [vmem:[%s4627_s11 + $0xd8] sm:$0xff] %v2795_v55  ;;  %v2858_v38 = vadd.f32 %v2857_v10, %v2795_v55  ;;  %v2896_v54 = vmul.f32 %v2795_v55, %v2795_v55 }
 0x344   : > { %v2669_v1 = vpop.f32.mrf.mxu3 }
 0x345   : > { %v2927_v49 = vadd.f32 %v2926_v51, %v2896_v54  ;;  %v2670_v42 = vadd.f32 %v2669_v1, %v2580_v20  ;;  %v2758_v62 = vpop.f32.mrf.mxu0 }
 0x346   : > { %v2298_v33 = vpop.f32.mrf.mxu1 }
 0x347   : > { %v2759_v17 = vadd.f32 %v2758_v62, %v2670_v42  ;;  %v2299_v50 = vadd.f32 %v2298_v33, %v4606_v46  ;;  %v2582_v15 = vpop.f32.mrf.mxu2 }
 0x349   : > { %v2796_v6 = vadd.f32 %v2759_v17, %v2299_v50 }
 0x34b   : > { %2828 = vst [vmem:[%s4627_s11 + $0xe0] sm:$0xff] %v2796_v6  ;;  %v2859_v61 = vadd.f32 %v2858_v38, %v2796_v6  ;;  %v2897_v7 = vmul.f32 %v2796_v6, %v2796_v6 }
 0x34c   : > { %v2671_v9 = vpop.f32.mrf.mxu3 }
 0x34d   : > { %v2928_v5 = vadd.f32 %v2927_v49, %v2897_v7  ;;  %v2672_v41 = vadd.f32 %v2671_v9, %v2582_v15  ;;  %v2760_v16 = vpop.f32.mrf.mxu0 }
 0x34e   : > { %v2300_v0 = vpop.f32.mrf.mxu1 }
 0x34f   : > { %v2761_v47 = vadd.f32 %v2760_v16, %v2672_v41  ;;  %v2301_v22 = vadd.f32 %v2300_v0, %v4610_v3  ;;  %v2585_v25 = vpop.f32.mrf.mxu2 }
 0x351   : > { %v2797_v35 = vadd.f32 %v2761_v47, %v2301_v22 }
 0x353   : > { %2829 = vst [vmem:[%s4627_s11 + $0xe8] sm:$0xff] %v2797_v35  ;;  %v2860_v34 = vadd.f32 %v2859_v61, %v2797_v35  ;;  %v2898_v11 = vmul.f32 %v2797_v35, %v2797_v35 }
 0x354   : > { %v2674_v46 = vpop.f32.mrf.mxu3 }
 0x355   : > { %v2929_v13 = vadd.f32 %v2928_v5, %v2898_v11  ;;  %v2675_v43 = vadd.f32 %v2674_v46, %v2585_v25  ;;  %v2763_v48 = vpop.f32.mrf.mxu0 }
 0x356   : > { %v2303_v39 = vpop.f32.mrf.mxu1 }
 0x357   : > { %v2764_v53 = vadd.f32 %v2763_v48, %v2675_v43  ;;  %v2304_v26 = vadd.f32 %v2303_v39, %v4616_v44  ;;  %v2587_v14 = vpop.f32.mrf.mxu2 }
 0x359   : > { %v2798_v57 = vadd.f32 %v2764_v53, %v2304_v26 }
 0x35b   : > { %2830 = vst [vmem:[%s4627_s11 + $0xf0] sm:$0xff] %v2798_v57  ;;  %v2861_v56 = vadd.f32 %v2860_v34, %v2798_v57  ;;  %v2899_v12 = vmul.f32 %v2798_v57, %v2798_v57 }
 0x35c   : > { %v2676_v3 = vpop.f32.mrf.mxu3 }
 0x35d   : > { %v2930_v28 = vadd.f32 %v2929_v13, %v2899_v12  ;;  %v2677_v32 = vadd.f32 %v2676_v3, %v2587_v14  ;;  %v2765_v58 = vpop.f32.mrf.mxu0 }
 0x35e   : > { %v2305_v21 = vpop.f32.mrf.mxu1 }
 0x35f   : > { %v2766_v18 = vadd.f32 %v2765_v58, %v2677_v32  ;;  %v2306_v45 = vadd.f32 %v2305_v21, %v4621_v37 }
 0x361   : > { %v2799_v63 = vadd.f32 %v2766_v18, %v2306_v45 }
 0x363   : > { %2831 = vst [vmem:[%s4627_s11 + $0xf8] sm:$0xff] %v2799_v63  ;;  %v2862_v59 = vadd.f32 %v2861_v56, %v2799_v63  ;;  %v2900_v40 = vmul.f32 %v2799_v63, %v2799_v63 }
 0x365   : > { %v2863_v52 = vrot.slane %v2862_v59, 4  ;;  %v2931_v44 = vadd.f32 %v2930_v28, %v2900_v40 }
 0x367   : > { %v2864_v29 = vadd.f32 %v2863_v52, %v2862_v59  ;;  %v2932_v8 = vrot.slane %v2931_v44, 4 }
 0x369   : > { %v2865_v36 = vrot.slane %v2864_v29, 2  ;;  %v2933_v2 = vadd.f32 %v2932_v8, %v2931_v44 }
 0x36b   : > { %v2866_v60 = vadd.f32 %v2865_v36, %v2864_v29  ;;  %v2934_v10 = vrot.slane %v2933_v2, 2 }
 0x36d   : > { %v2867_v19 = vrot.slane %v2866_v60, 1  ;;  %v2935_v31 = vadd.f32 %v2934_v10, %v2933_v2 }
 0x36f   : > { %v2936_v51 = vrot.slane %v2935_v31, 1  ;;  %v2868_v37 = vadd.f32 %v2867_v19, %v2866_v60 }
 0x371   : > { %v2937_v30 = vadd.f32 %v2936_v51, %v2935_v31 }
 0x373   : > { %v2939_v27 = vsel %vm2938_vm2, %v2868_v37, %v2937_v30 }
 0x374   : > { %2940 = vst [vmem:[%s262_s18] sm:$0x3] %v2939_v27 }
 0x375 PF: > { %s17_s21 = sadd.s32 1, %s3544_s21  }
 0x376   : > { %p14_p4 = scmp.ge.s32.totalorder %s17_s21, 4  }
 0x378   :  { %16 = sbr.rel (!%p14_p4) target bundleno = 1 (0x1), region = 84 }

</bundles_post_ra>
